<compile_context>
chip_gen: v5e
topology: v5e:2x2
jax: 0.10.0
libtpu: 0.0.40
codegen_flags: <defaults>
</compile_context>

<pallas_src>
import jax
import jax.numpy as jnp
from jax.experimental import pallas as pl
from jax.experimental.pallas import tpu as pltpu

IN_FEATURES = 3 * 64 * 64   # 12288
HIDDEN = 64
OUT = 6
OUT_PAD = 128               # lane-dense output width (multiple of 128)


def _linear_classifier_kernel(x_ref, w_ref, b_ref, o_ref):
    # x_ref: (TB, 12288)  w_ref: (12288, 128)  b_ref: (1, 128)  o_ref: (TB, 128)
    out = jnp.dot(x_ref[...], w_ref[...], preferred_element_type=jnp.float32)
    o_ref[...] = (out + b_ref[...]).astype(o_ref.dtype)


def _pick_batch_tile(b_work):
    """Batch-tile size: >=2 grid steps when possible (v7x megacore), long DMAs for big B."""
    if b_work <= 16:
        return 8
    if b_work <= 512:
        # split roughly in half so both v7x TensorCores get a tile
        return min(128, ((pl.cdiv(b_work, 2) + 7) // 8) * 8)
    return 256


def linear_classifier_forward(x, w1, b1, w2, b2):
    """x: (B, 3, 64, 64) float32 -> (B, 6) float32. Same math as the PyTorch module."""
    B = x.shape[0]
    x_flat = x.reshape(B, IN_FEATURES)            # same order as torch Flatten on NCHW

    # Fuse the two Linears (no activation in between):
    #   (x @ w1 + b1) @ w2 + b2  ==  x @ (w1 @ w2) + (b1 @ w2 + b2)
    # Pad the 6-wide output dim to 128 lanes so the kernel's store is lane-dense.
    w_fused = jnp.zeros((IN_FEATURES, OUT_PAD), jnp.float32).at[:, :OUT].set(w1 @ w2)
    b_fused = jnp.zeros((1, OUT_PAD), jnp.float32).at[:, :OUT].set((b1 @ w2 + b2).reshape(1, OUT))

    # Only pad batches smaller than one sublane tile; everything else uses a
    # cdiv grid with a ragged last tile (no full-array copy of x).
    b_work = B
    if b_work < 8:
        x_flat = jnp.pad(x_flat, ((0, 8 - b_work), (0, 0)))
        b_work = 8

    TB = _pick_batch_tile(b_work)
    n_b = pl.cdiv(b_work, TB)

    cost = pl.CostEstimate(
        flops=2 * b_work * IN_FEATURES * OUT_PAD,
        transcendentals=0,
        bytes_accessed=(b_work * IN_FEATURES * 4          # x read
                        + IN_FEATURES * OUT_PAD * 4       # fused W read
                        + OUT_PAD * 4                     # bias read
                        + b_work * OUT_PAD * 4),          # output write
    )

    out_padded = pl.pallas_call(
        _linear_classifier_kernel,
        out_shape=jax.ShapeDtypeStruct((b_work, OUT_PAD), x.dtype),
        grid_spec=pltpu.PrefetchScalarGridSpec(
            num_scalar_prefetch=0,
            grid=(n_b,),
            in_specs=[
                pl.BlockSpec((TB, IN_FEATURES), lambda i: (i, 0)),       # x batch tile
                pl.BlockSpec((IN_FEATURES, OUT_PAD), lambda i: (0, 0)),  # fused W (VMEM-resident)
                pl.BlockSpec((1, OUT_PAD), lambda i: (0, 0)),            # fused bias (resident)
            ],
            out_specs=pl.BlockSpec((TB, OUT_PAD), lambda i: (i, 0)),
        ),
        compiler_params=pltpu.CompilerParams(
            dimension_semantics=("parallel",),
            vmem_limit_bytes=48 * 1024 * 1024,
        ),
        cost_estimate=cost,
    )(x_flat, w_fused, b_fused)

    return out_padded[:B, :OUT]


def init_params(key):
    """Deterministic init mimicking torch.nn.Linear defaults (uniform +/- 1/sqrt(fan_in))."""
    k1, k2, k3, k4 = jax.random.split(key, 4)
    bound1 = 1.0 / jnp.sqrt(IN_FEATURES)
    bound2 = 1.0 / jnp.sqrt(HIDDEN)
    # stored as (in, out) so the math is x @ w + b
    w1 = jax.random.uniform(k1, (IN_FEATURES, HIDDEN), jnp.float32, -bound1, bound1)
    b1 = jax.random.uniform(k2, (HIDDEN,), jnp.float32, -bound1, bound1)
    w2 = jax.random.uniform(k3, (HIDDEN, OUT), jnp.float32, -bound2, bound2)
    b2 = jax.random.uniform(k4, (OUT,), jnp.float32, -bound2, bound2)
    return w1, b1, w2, b2


if __name__ == "__main__":
    key = jax.random.PRNGKey(0)
    kx, kp = jax.random.split(key)
    w1, b1, w2, b2 = init_params(kp)

    # B=2 exercises the tiny-batch pad path; B=9 exercises the cdiv grid with a
    # ragged last tile (no whole-array padding of x).
    for B in (2, 9):
        x = jax.random.normal(jax.random.fold_in(kx, B), (B, 3, 64, 64), jnp.float32)
        out = jax.block_until_ready(linear_classifier_forward(x, w1, b1, w2, b2))

        # Reference: same math as the PyTorch module, in plain JAX f32.
        ref = (x.reshape(B, -1) @ w1 + b1) @ w2 + b2
        assert out.shape == (B, OUT), out.shape
        assert jnp.allclose(out, ref, atol=1e-3, rtol=1e-3), f"mismatch vs reference at B={B}"

    print("KERNEL_OK")
</pallas_src>

<mosaic_0001>
module attributes {stable_mosaic.version = 11 : i64} {
  func.func @_linear_classifier_kernel(%arg0: i32, %arg1: memref<8x12288xf32, #tpu.memory_space<vmem>>, %arg2: memref<12288x128xf32, #tpu.memory_space<vmem>>, %arg3: memref<1x128xf32, #tpu.memory_space<vmem>>, %arg4: memref<8x128xf32, #tpu.memory_space<vmem>>) attributes {dimension_semantics = [#tpu.dimension_semantics<parallel>], iteration_bounds = array<i64: 1>, scalar_prefetch = 0 : i64, scratch_operands = 0 : i64, tpu.core_type = #tpu.core_type<tc>, window_params = [{transform_indices = @transform_0, window_bounds = array<i64: 8, 12288>}, {pipeline_mode = #tpu.pipeline_mode<synchronous>, transform_indices = @transform_1, window_bounds = array<i64: 12288, 128>}, {pipeline_mode = #tpu.pipeline_mode<synchronous>, transform_indices = @transform_2, window_bounds = array<i64: 1, 128>}, {transform_indices = @transform_3, window_bounds = array<i64: 8, 128>}]} {
    %c0 = arith.constant 0 : index
    %c0_0 = arith.constant 0 : index
    %0 = vector.load %arg1[%c0, %c0_0] : memref<8x12288xf32, #tpu.memory_space<vmem>>, vector<8x12288xf32>
    %c0_1 = arith.constant 0 : index
    %c0_2 = arith.constant 0 : index
    %1 = vector.load %arg2[%c0_1, %c0_2] : memref<12288x128xf32, #tpu.memory_space<vmem>>, vector<12288x128xf32>
    %cst = arith.constant dense<0.000000e+00> : vector<8x128xf32>
    %2 = tpu.matmul %0, %1, %cst {dimension_numbers = #tpu.dot_dimension_numbers<[1], [0], [0], [1], [0, 0, 1, 1], [], []>} : vector<8x12288xf32>, vector<12288x128xf32>, vector<8x128xf32> -> vector<8x128xf32>
    %c0_3 = arith.constant 0 : index
    %c0_4 = arith.constant 0 : index
    %3 = vector.load %arg3[%c0_3, %c0_4] : memref<1x128xf32, #tpu.memory_space<vmem>>, vector<1x128xf32>
    %4 = vector.broadcast %3 : vector<1x128xf32> to vector<8x128xf32>
    %5 = arith.addf %2, %4 : vector<8x128xf32>
    %c0_5 = arith.constant 0 : index
    %c0_6 = arith.constant 0 : index
    %6 = vector.load %arg4[%c0_5, %c0_6] : memref<8x128xf32, #tpu.memory_space<vmem>>, vector<8x128xf32>
    tpu.vector_store %arg4[%c0_5, %c0_6], %5 {strides = array<i32>} : memref<8x128xf32, #tpu.memory_space<vmem>>, vector<8x128xf32>,
    return
  }
  func.func @transform_0(%arg0: i32) -> (i32, i32) {
    %c0_i32 = arith.constant 0 : i32
    %c0_i32_0 = arith.constant 0 : i32
    return %arg0, %c0_i32 : i32, i32
  }
  func.func @transform_1(%arg0: i32) -> (i32, i32) {
    %c0_i32 = arith.constant 0 : i32
    %c0_i32_0 = arith.constant 0 : i32
    %c0_i32_1 = arith.constant 0 : i32
    return %c0_i32, %c0_i32_0 : i32, i32
  }
  func.func @transform_2(%arg0: i32) -> (i32, i32) {
    %c0_i32 = arith.constant 0 : i32
    %c0_i32_0 = arith.constant 0 : i32
    %c0_i32_1 = arith.constant 0 : i32
    return %c0_i32, %c0_i32_0 : i32, i32
  }
  func.func @transform_3(%arg0: i32) -> (i32, i32) {
    %c0_i32 = arith.constant 0 : i32
    %c0_i32_0 = arith.constant 0 : i32
    return %arg0, %c0_i32 : i32, i32
  }
}

</mosaic_0001>

<bundles_post_ra>
// kernel: tpu_custom_call.1
= control target key start
LH: loop header
LB: loop body
LE: loop exit
PB: predicated region body
PF: predicated region fallthrough
CT: control target
= control target key end

     0   :  { %8 = vsyncpa [#allocation3], 0  ;;  %s3780_s0 = inlined_call_operand.hbm [shape: f32[8,12288], index: 0, kind: input, shape index: {}]   ;;  %s3781_s1 = inlined_call_operand.hbm [shape: f32[12288,128], index: 1, kind: input, shape index: {}]   ;;  %s3782_s2 = inlined_call_operand.hbm [shape: f32[1,128], index: 2, kind: input, shape index: {}]   ;;  %s3783_s3 = inlined_call_operand.hbm [shape: f32[8,128], index: 3, kind: output, shape index: {}]  }
   0x1   :  { %9 = vsyncpa [#allocation6], 0  ;;  %s26_s14 = sshll.u32 %s3781_s1, 4  ;;  %s27_s14 = int_to_ptr.hbm [resolvable:$true] %s26_s14 }
   0x2   :  { %10 = vsyncpa [#allocation4], 0  ;;  %s3742_s15 = smov [#allocation5]   ;;  %s16_s19 = sshll.u32 %s3780_s0, 4  ;;  %s17_s19 = int_to_ptr.hbm [resolvable:$true] %s16_s19 }
   0x3   :  { %s28_s16 = sshll.u32 %s3742_s15, 4  ;;  %s3743_s20 = smov 128   ;;  %s29_s16 = int_to_ptr.vmem [resolvable:$true] %s28_s16 }
   0x4   :  { %s3744_s21 = smov 8   ;;  %s3745_s22 = smov [#allocation2]  }
   0x5   :  { %34 = dma.hbm_to_vmem [thread:$0]  %s27_s14, 196608, %s29_s16, [#allocation6], %s3743_s20, %s3743_s20, %s3744_s21  }
   0x6   :  { %s18_s23 = sshll.u32 %s3745_s22, 4  ;;  %s40_s26 = sshll.u32 %s3782_s2, 4  ;;  %s19_s23 = int_to_ptr.vmem [resolvable:$true] %s18_s23  ;;  %s41_s26 = int_to_ptr.hbm [resolvable:$true] %s40_s26 }
   0x7   :  { %21 = dma.hbm_to_vmem [thread:$0]  %s17_s19, 12288, %s19_s23, [#allocation3]  }
   0x8   :  { %s3746_s1 = smov [#allocation7]  }
   0x9   :  { %s42_s27 = sshll.u32 %s3746_s1, 4  ;;  %s43_s27 = int_to_ptr.vmem [resolvable:$true] %s42_s27 }
   0xa   :  { %45 = dma.hbm_to_vmem [thread:$0]  %s41_s26, 16, %s43_s27, [#allocation6]  }
   0xb   :  { %3736 = dma.done.wait [#allocation3], 12288  }
   0xc   :  { %3737 = vsyncadd [#allocation3], 4294955008 }
   0xd   :  { %3738 = dma.done.wait [#allocation6], 196624  }
   0xe   :  { %3739 = vsyncadd [#allocation6], 4294770672  ;;  %v169_v0 = vld [vmem:[#allocation5 + $0x78] sm:$0xff]  ;;  %v168_v2 = vld [vmem:[#allocation5 + $0x70] sm:$0xff]  ;;  %s3747_s0 = smov [#allocation8]   ;;  %s3622_s30 = sshll.u32 %s3783_s3, 4  ;;  %s3623_s30 = int_to_ptr.hbm [resolvable:$true] %s3622_s30 }
   0xf   :  { %v201_v1 = vld [vmem:[#allocation5 + $0x178] sm:$0xff]  ;;  %1694 = vmatpush.msra.mxu0 %v169_v0  ;;  %v200_v4 = vld [vmem:[#allocation5 + $0x170] sm:$0xff]  ;;  %v167_v6 = vld [vmem:[#allocation5 + $0x68] sm:$0xff]  ;;  %s3620_s2 = sshll.u32 %s3747_s0, 4  ;;  %s3621_s2 = int_to_ptr.vmem [resolvable:$true] %s3620_s2 }
  0x10   :  { %1734 = vmatpush.msra.mxu2 %v201_v1  ;;  %v185_v3 = vld [vmem:[#allocation5 + $0xf8] sm:$0xff]  ;;  %v184_v7 = vld [vmem:[#allocation5 + $0xf0] sm:$0xff]  ;;  %v199_v8 = vld [vmem:[#allocation5 + $0x168] sm:$0xff] }
  0x11   :  { %v217_v5 = vld [vmem:[#allocation5 + $0x1f8] sm:$0xff]  ;;  %1714 = vmatpush.msra.mxu1 %v185_v3  ;;  %1695 = vmatpush.msra.mxu0 %v168_v2  ;;  %v216_v9 = vld [vmem:[#allocation5 + $0x1f0] sm:$0xff]  ;;  %v183_v10 = vld [vmem:[#allocation5 + $0xe8] sm:$0xff] }
  0x12   :  { %1754 = vmatpush.msra.mxu3 %v217_v5  ;;  %1735 = vmatpush.msra.mxu2 %v200_v4  ;;  %v166_v11 = vld [vmem:[#allocation5 + $0x60] sm:$0xff]  ;;  %v215_v13 = vld [vmem:[#allocation5 + $0x1e8] sm:$0xff]  ;;  %v165_v16 = vld [vmem:[#allocation5 + $0x58] sm:$0xff] }
  0x13   :  { %1715 = vmatpush.msra.mxu1 %v184_v7  ;;  %v198_v12 = vld [vmem:[#allocation5 + $0x160] sm:$0xff]  ;;  %1696 = vmatpush.msra.mxu0 %v167_v6  ;;  %v197_v17 = vld [vmem:[#allocation5 + $0x158] sm:$0xff]  ;;  %v164_v20 = vld [vmem:[#allocation5 + $0x50] sm:$0xff] }
  0x14   :  { %1755 = vmatpush.msra.mxu3 %v216_v9  ;;  %1736 = vmatpush.msra.mxu2 %v199_v8  ;;  %v182_v14 = vld [vmem:[#allocation5 + $0xe0] sm:$0xff]  ;;  %v181_v18 = vld [vmem:[#allocation5 + $0xd8] sm:$0xff]  ;;  %v196_v21 = vld [vmem:[#allocation5 + $0x150] sm:$0xff] }
  0x15   :  { %v214_v15 = vld [vmem:[#allocation5 + $0x1e0] sm:$0xff]  ;;  %1716 = vmatpush.msra.mxu1 %v183_v10  ;;  %1697 = vmatpush.msra.mxu0 %v166_v11  ;;  %v213_v19 = vld [vmem:[#allocation5 + $0x1d8] sm:$0xff]  ;;  %v180_v22 = vld [vmem:[#allocation5 + $0xd0] sm:$0xff] }
  0x16   :  { %1756 = vmatpush.msra.mxu3 %v215_v13  ;;  %1737 = vmatpush.msra.mxu2 %v198_v12  ;;  %v212_v23 = vld [vmem:[#allocation5 + $0x1d0] sm:$0xff]  ;;  %v163_v24 = vld [vmem:[#allocation5 + $0x48] sm:$0xff]  ;;  %v162_v28 = vld [vmem:[#allocation5 + $0x40] sm:$0xff] }
  0x17   :  { %1717 = vmatpush.msra.mxu1 %v182_v14  ;;  %1698 = vmatpush.msra.mxu0 %v165_v16  ;;  %v195_v25 = vld [vmem:[#allocation5 + $0x148] sm:$0xff]  ;;  %v194_v29 = vld [vmem:[#allocation5 + $0x140] sm:$0xff]  ;;  %v161_v32 = vld [vmem:[#allocation5 + $0x38] sm:$0xff] }
  0x18   :  { %1757 = vmatpush.msra.mxu3 %v214_v15  ;;  %1738 = vmatpush.msra.mxu2 %v197_v17  ;;  %v179_v26 = vld [vmem:[#allocation5 + $0xc8] sm:$0xff]  ;;  %v178_v30 = vld [vmem:[#allocation5 + $0xc0] sm:$0xff]  ;;  %v193_v33 = vld [vmem:[#allocation5 + $0x138] sm:$0xff] }
  0x19   :  { %1718 = vmatpush.msra.mxu1 %v181_v18  ;;  %1699 = vmatpush.msra.mxu0 %v164_v20  ;;  %v211_v27 = vld [vmem:[#allocation5 + $0x1c8] sm:$0xff]  ;;  %v210_v31 = vld [vmem:[#allocation5 + $0x1c0] sm:$0xff]  ;;  %v177_v34 = vld [vmem:[#allocation5 + $0xb8] sm:$0xff] }
  0x1a   :  { %1758 = vmatpush.msra.mxu3 %v213_v19  ;;  %1739 = vmatpush.msra.mxu2 %v196_v21  ;;  %v209_v35 = vld [vmem:[#allocation5 + $0x1b8] sm:$0xff]  ;;  %v160_v36 = vld [vmem:[#allocation5 + $0x30] sm:$0xff]  ;;  %v159_v40 = vld [vmem:[#allocation5 + $0x28] sm:$0xff] }
  0x1b   :  { %1719 = vmatpush.msra.mxu1 %v180_v22  ;;  %1700 = vmatpush.msra.mxu0 %v163_v24  ;;  %v192_v37 = vld [vmem:[#allocation5 + $0x130] sm:$0xff]  ;;  %v191_v41 = vld [vmem:[#allocation5 + $0x128] sm:$0xff]  ;;  %v158_v44 = vld [vmem:[#allocation5 + $0x20] sm:$0xff] }
  0x1c   :  { %1759 = vmatpush.msra.mxu3 %v212_v23  ;;  %1740 = vmatpush.msra.mxu2 %v195_v25  ;;  %v176_v38 = vld [vmem:[#allocation5 + $0xb0] sm:$0xff]  ;;  %v175_v42 = vld [vmem:[#allocation5 + $0xa8] sm:$0xff]  ;;  %v190_v45 = vld [vmem:[#allocation5 + $0x120] sm:$0xff] }
  0x1d   :  { %1720 = vmatpush.msra.mxu1 %v179_v26  ;;  %1701 = vmatpush.msra.mxu0 %v162_v28  ;;  %v208_v39 = vld [vmem:[#allocation5 + $0x1b0] sm:$0xff]  ;;  %v207_v43 = vld [vmem:[#allocation5 + $0x1a8] sm:$0xff]  ;;  %v174_v46 = vld [vmem:[#allocation5 + $0xa0] sm:$0xff] }
  0x1e   :  { %1760 = vmatpush.msra.mxu3 %v211_v27  ;;  %1741 = vmatpush.msra.mxu2 %v194_v29  ;;  %v206_v47 = vld [vmem:[#allocation5 + $0x1a0] sm:$0xff]  ;;  %v157_v48 = vld [vmem:[#allocation5 + $0x18] sm:$0xff]  ;;  %v156_v52 = vld [vmem:[#allocation5 + $0x10] sm:$0xff] }
  0x1f   :  { %1721 = vmatpush.msra.mxu1 %v178_v30  ;;  %1702 = vmatpush.msra.mxu0 %v161_v32  ;;  %v189_v49 = vld [vmem:[#allocation5 + $0x118] sm:$0xff]  ;;  %v188_v53 = vld [vmem:[#allocation5 + $0x110] sm:$0xff]  ;;  %v155_v56 = vld [vmem:[#allocation5 + $0x8] sm:$0xff] }
  0x20   :  { %1761 = vmatpush.msra.mxu3 %v210_v31  ;;  %1742 = vmatpush.msra.mxu2 %v193_v33  ;;  %v173_v50 = vld [vmem:[#allocation5 + $0x98] sm:$0xff]  ;;  %v172_v54 = vld [vmem:[#allocation5 + $0x90] sm:$0xff]  ;;  %v187_v57 = vld [vmem:[#allocation5 + $0x108] sm:$0xff] }
  0x21   :  { %1722 = vmatpush.msra.mxu1 %v177_v34  ;;  %1703 = vmatpush.msra.mxu0 %v160_v36  ;;  %v205_v51 = vld [vmem:[#allocation5 + $0x198] sm:$0xff]  ;;  %v204_v55 = vld [vmem:[#allocation5 + $0x190] sm:$0xff]  ;;  %v171_v58 = vld [vmem:[#allocation5 + $0x88] sm:$0xff] }
  0x22   :  { %1762 = vmatpush.msra.mxu3 %v209_v35  ;;  %1743 = vmatpush.msra.mxu2 %v192_v37  ;;  %v203_v59 = vld [vmem:[#allocation5 + $0x188] sm:$0xff]  ;;  %v154_v60 = vld [vmem:[#allocation5] sm:$0xff]  ;;  %v233_v62 = vld [vmem:[#allocation5 + $0x278] sm:$0xff] }
  0x23   :  { %1723 = vmatpush.msra.mxu1 %v176_v38  ;;  %1704 = vmatpush.msra.mxu0 %v159_v40  ;;  %v186_v61 = vld [vmem:[#allocation5 + $0x100] sm:$0xff]  ;;  %v265_v63 = vld [vmem:[#allocation5 + $0x378] sm:$0xff]  ;;  %v232_v2 = vld [vmem:[#allocation5 + $0x270] sm:$0xff] }
  0x24   :  { %1763 = vmatpush.msra.mxu3 %v208_v39  ;;  %1744 = vmatpush.msra.mxu2 %v191_v41  ;;  %v170_v0 = vld [vmem:[#allocation5 + $0x80] sm:$0xff]  ;;  %v249_v3 = vld [vmem:[#allocation5 + $0x2f8] sm:$0xff]  ;;  %v264_v4 = vld [vmem:[#allocation5 + $0x370] sm:$0xff] }
  0x25   :  { %1724 = vmatpush.msra.mxu1 %v175_v42  ;;  %1705 = vmatpush.msra.mxu0 %v158_v44  ;;  %v202_v1 = vld [vmem:[#allocation5 + $0x180] sm:$0xff]  ;;  %v281_v5 = vld [vmem:[#allocation5 + $0x3f8] sm:$0xff]  ;;  %v231_v6 = vld [vmem:[#allocation5 + $0x268] sm:$0xff] }
  0x26   :  { %1764 = vmatpush.msra.mxu3 %v207_v43  ;;  %1745 = vmatpush.msra.mxu2 %v190_v45  ;;  %v248_v7 = vld [vmem:[#allocation5 + $0x2f0] sm:$0xff]  ;;  %v263_v8 = vld [vmem:[#allocation5 + $0x368] sm:$0xff]  ;;  %v230_v10 = vld [vmem:[#allocation5 + $0x260] sm:$0xff] }
  0x27   :  { %1725 = vmatpush.msra.mxu1 %v174_v46  ;;  %1706 = vmatpush.msra.mxu0 %v157_v48  ;;  %v280_v9 = vld [vmem:[#allocation5 + $0x3f0] sm:$0xff]  ;;  %v247_v11 = vld [vmem:[#allocation5 + $0x2e8] sm:$0xff]  ;;  %v262_v12 = vld [vmem:[#allocation5 + $0x360] sm:$0xff] }
  0x28   :  { %1765 = vmatpush.msra.mxu3 %v206_v47  ;;  %1746 = vmatpush.msra.mxu2 %v189_v49  ;;  %v279_v13 = vld [vmem:[#allocation5 + $0x3e8] sm:$0xff]  ;;  %v229_v14 = vld [vmem:[#allocation5 + $0x258] sm:$0xff]  ;;  %v246_v15 = vld [vmem:[#allocation5 + $0x2e0] sm:$0xff] }
  0x29   :  { %1726 = vmatpush.msra.mxu1 %v173_v50  ;;  %1707 = vmatpush.msra.mxu0 %v156_v52  ;;  %v261_v16 = vld [vmem:[#allocation5 + $0x358] sm:$0xff]  ;;  %v278_v17 = vld [vmem:[#allocation5 + $0x3e0] sm:$0xff]  ;;  %v228_v18 = vld [vmem:[#allocation5 + $0x250] sm:$0xff] }
  0x2a   :  { %1766 = vmatpush.msra.mxu3 %v205_v51  ;;  %1747 = vmatpush.msra.mxu2 %v188_v53  ;;  %v245_v19 = vld [vmem:[#allocation5 + $0x2d8] sm:$0xff]  ;;  %v260_v20 = vld [vmem:[#allocation5 + $0x350] sm:$0xff]  ;;  %v227_v22 = vld [vmem:[#allocation5 + $0x248] sm:$0xff] }
  0x2b   :  { %1727 = vmatpush.msra.mxu1 %v172_v54  ;;  %1708 = vmatpush.msra.mxu0 %v155_v56  ;;  %v277_v21 = vld [vmem:[#allocation5 + $0x3d8] sm:$0xff]  ;;  %v244_v23 = vld [vmem:[#allocation5 + $0x2d0] sm:$0xff]  ;;  %v259_v24 = vld [vmem:[#allocation5 + $0x348] sm:$0xff] }
  0x2c   :  { %1767 = vmatpush.msra.mxu3 %v204_v55  ;;  %1748 = vmatpush.msra.mxu2 %v187_v57  ;;  %v276_v25 = vld [vmem:[#allocation5 + $0x3d0] sm:$0xff]  ;;  %v226_v26 = vld [vmem:[#allocation5 + $0x240] sm:$0xff]  ;;  %v243_v27 = vld [vmem:[#allocation5 + $0x2c8] sm:$0xff] }
  0x2d   :  { %1728 = vmatpush.msra.mxu1 %v171_v58  ;;  %1709 = vmatpush.msra.mxu0 %v154_v60  ;;  %v258_v28 = vld [vmem:[#allocation5 + $0x340] sm:$0xff]  ;;  %v275_v29 = vld [vmem:[#allocation5 + $0x3c8] sm:$0xff]  ;;  %v225_v30 = vld [vmem:[#allocation5 + $0x238] sm:$0xff] }
  0x2e   :  { %1768 = vmatpush.msra.mxu3 %v203_v59  ;;  %1749 = vmatpush.msra.mxu2 %v186_v61  ;;  %v242_v31 = vld [vmem:[#allocation5 + $0x2c0] sm:$0xff]  ;;  %v257_v32 = vld [vmem:[#allocation5 + $0x338] sm:$0xff]  ;;  %v224_v34 = vld [vmem:[#allocation5 + $0x230] sm:$0xff] }
  0x2f   :  { %1774 = vmatpush.msrb.mxu0 %v233_v62  ;;  %1729 = vmatpush.msra.mxu1 %v170_v0  ;;  %v274_v33 = vld [vmem:[#allocation5 + $0x3c0] sm:$0xff]  ;;  %v241_v35 = vld [vmem:[#allocation5 + $0x2b8] sm:$0xff]  ;;  %v256_v36 = vld [vmem:[#allocation5 + $0x330] sm:$0xff] }
  0x30   :  { %1814 = vmatpush.msrb.mxu2 %v265_v63  ;;  %1769 = vmatpush.msra.mxu3 %v202_v1  ;;  %v273_v37 = vld [vmem:[#allocation5 + $0x3b8] sm:$0xff]  ;;  %v223_v38 = vld [vmem:[#allocation5 + $0x228] sm:$0xff]  ;;  %v240_v39 = vld [vmem:[#allocation5 + $0x2b0] sm:$0xff] }
  0x31   :  { %1775 = vmatpush.msrb.mxu0 %v232_v2  ;;  %1794 = vmatpush.msrb.mxu1 %v249_v3  ;;  %v255_v40 = vld [vmem:[#allocation5 + $0x328] sm:$0xff]  ;;  %v272_v41 = vld [vmem:[#allocation5 + $0x3b0] sm:$0xff]  ;;  %v222_v42 = vld [vmem:[#allocation5 + $0x220] sm:$0xff] }
  0x32   :  { %1815 = vmatpush.msrb.mxu2 %v264_v4  ;;  %1834 = vmatpush.msrb.mxu3 %v281_v5  ;;  %v239_v43 = vld [vmem:[#allocation5 + $0x2a8] sm:$0xff]  ;;  %v254_v44 = vld [vmem:[#allocation5 + $0x320] sm:$0xff]  ;;  %v221_v46 = vld [vmem:[#allocation5 + $0x218] sm:$0xff] }
  0x33   :  { %1776 = vmatpush.msrb.mxu0 %v231_v6  ;;  %1795 = vmatpush.msrb.mxu1 %v248_v7  ;;  %v271_v45 = vld [vmem:[#allocation5 + $0x3a8] sm:$0xff]  ;;  %v238_v47 = vld [vmem:[#allocation5 + $0x2a0] sm:$0xff]  ;;  %v253_v48 = vld [vmem:[#allocation5 + $0x318] sm:$0xff] }
  0x34   :  { %1816 = vmatpush.msrb.mxu2 %v263_v8  ;;  %1835 = vmatpush.msrb.mxu3 %v280_v9  ;;  %v270_v49 = vld [vmem:[#allocation5 + $0x3a0] sm:$0xff]  ;;  %v220_v50 = vld [vmem:[#allocation5 + $0x210] sm:$0xff]  ;;  %v237_v51 = vld [vmem:[#allocation5 + $0x298] sm:$0xff] }
  0x35   :  { %1777 = vmatpush.msrb.mxu0 %v230_v10  ;;  %1796 = vmatpush.msrb.mxu1 %v247_v11  ;;  %v252_v52 = vld [vmem:[#allocation5 + $0x310] sm:$0xff]  ;;  %v269_v53 = vld [vmem:[#allocation5 + $0x398] sm:$0xff]  ;;  %v219_v54 = vld [vmem:[#allocation5 + $0x208] sm:$0xff] }
  0x36   :  { %1817 = vmatpush.msrb.mxu2 %v262_v12  ;;  %1836 = vmatpush.msrb.mxu3 %v279_v13  ;;  %v236_v55 = vld [vmem:[#allocation5 + $0x290] sm:$0xff]  ;;  %v251_v56 = vld [vmem:[#allocation5 + $0x308] sm:$0xff]  ;;  %v218_v58 = vld [vmem:[#allocation5 + $0x200] sm:$0xff] }
  0x37   :  { %1778 = vmatpush.msrb.mxu0 %v229_v14  ;;  %1797 = vmatpush.msrb.mxu1 %v246_v15  ;;  %v268_v57 = vld [vmem:[#allocation5 + $0x390] sm:$0xff]  ;;  %v235_v59 = vld [vmem:[#allocation5 + $0x288] sm:$0xff]  ;;  %v250_v60 = vld [vmem:[#allocation5 + $0x300] sm:$0xff] }
  0x38   :  { %1818 = vmatpush.msrb.mxu2 %v261_v16  ;;  %1837 = vmatpush.msrb.mxu3 %v278_v17  ;;  %v267_v61 = vld [vmem:[#allocation5 + $0x388] sm:$0xff]  ;;  %v58_v62 = vld [vmem:[#allocation2] sm:$0xff]  ;;  %v60_v63 = vld [vmem:[#allocation2 + $0x10] sm:$0xff] }
  0x39   :  { %1779 = vmatpush.msrb.mxu0 %v228_v18  ;;  %1798 = vmatpush.msrb.mxu1 %v245_v19  ;;  %v297_v0 = vld [vmem:[#allocation5 + $0x478] sm:$0xff]  ;;  %v234_v2 = vld [vmem:[#allocation5 + $0x280] sm:$0xff]  ;;  %v59_v4 = vld [vmem:[#allocation2 + $0x8] sm:$0xff] }
  0x3a   :  { %1819 = vmatpush.msrb.mxu2 %v260_v20  ;;  %1838 = vmatpush.msrb.mxu3 %v277_v21  ;;  %v329_v1 = vld [vmem:[#allocation5 + $0x578] sm:$0xff]  ;;  %v266_v3 = vld [vmem:[#allocation5 + $0x380] sm:$0xff]  ;;  %v296_v6 = vld [vmem:[#allocation5 + $0x470] sm:$0xff] }
  0x3b   :  { %1780 = vmatpush.msrb.mxu0 %v227_v22  ;;  %1799 = vmatpush.msrb.mxu1 %v244_v23  ;;  %v61_v5 = vld [vmem:[#allocation2 + $0x18] sm:$0xff]  ;;  %v328_v8 = vld [vmem:[#allocation5 + $0x570] sm:$0xff]  ;;  %v295_v10 = vld [vmem:[#allocation5 + $0x468] sm:$0xff] }
  0x3c   :  { %1820 = vmatpush.msrb.mxu2 %v259_v24  ;;  %1839 = vmatpush.msrb.mxu3 %v276_v25  ;;  %v313_v7 = vld [vmem:[#allocation5 + $0x4f8] sm:$0xff]  ;;  %v312_v11 = vld [vmem:[#allocation5 + $0x4f0] sm:$0xff]  ;;  %v327_v12 = vld [vmem:[#allocation5 + $0x568] sm:$0xff] }
  0x3d   :  { %1781 = vmatpush.msrb.mxu0 %v226_v26  ;;  %1800 = vmatpush.msrb.mxu1 %v243_v27  ;;  %v345_v9 = vld [vmem:[#allocation5 + $0x5f8] sm:$0xff]  ;;  %v344_v13 = vld [vmem:[#allocation5 + $0x5f0] sm:$0xff]  ;;  %v294_v14 = vld [vmem:[#allocation5 + $0x460] sm:$0xff] }
  0x3e   :  { %1821 = vmatpush.msrb.mxu2 %v258_v28  ;;  %1840 = vmatpush.msrb.mxu3 %v275_v29  ;;  %v311_v15 = vld [vmem:[#allocation5 + $0x4e8] sm:$0xff]  ;;  %v326_v16 = vld [vmem:[#allocation5 + $0x560] sm:$0xff]  ;;  %v64_v18 = vld [vmem:[#allocation2 + $0x30] sm:$0xff] }
  0x3f   :  { %1782 = vmatpush.msrb.mxu0 %v225_v30  ;;  %1801 = vmatpush.msrb.mxu1 %v242_v31  ;;  %v343_v17 = vld [vmem:[#allocation5 + $0x5e8] sm:$0xff]  ;;  %v293_v19 = vld [vmem:[#allocation5 + $0x458] sm:$0xff]  ;;  %v310_v20 = vld [vmem:[#allocation5 + $0x4e0] sm:$0xff] }
  0x40   :  { %1822 = vmatpush.msrb.mxu2 %v257_v32  ;;  %1841 = vmatpush.msrb.mxu3 %v274_v33  ;;  %v325_v21 = vld [vmem:[#allocation5 + $0x558] sm:$0xff]  ;;  %v342_v22 = vld [vmem:[#allocation5 + $0x5e0] sm:$0xff]  ;;  %v292_v25 = vld [vmem:[#allocation5 + $0x450] sm:$0xff] }
  0x41   :  { %1783 = vmatpush.msrb.mxu0 %v224_v34  ;;  %1802 = vmatpush.msrb.mxu1 %v241_v35  ;;  %v62_v23 = vld [vmem:[#allocation2 + $0x20] sm:$0xff]  ;;  %v65_v24 = vld [vmem:[#allocation2 + $0x38] sm:$0xff]  ;;  %v324_v27 = vld [vmem:[#allocation5 + $0x550] sm:$0xff] }
  0x42   :  { %1823 = vmatpush.msrb.mxu2 %v256_v36  ;;  %1842 = vmatpush.msrb.mxu3 %v273_v37  ;;  %v309_v26 = vld [vmem:[#allocation5 + $0x4d8] sm:$0xff]  ;;  %v63_v29 = vld [vmem:[#allocation2 + $0x28] sm:$0xff]  ;;  %v308_v31 = vld [vmem:[#allocation5 + $0x4d0] sm:$0xff] }
  0x43   :  { %1784 = vmatpush.msrb.mxu0 %v223_v38  ;;  %1803 = vmatpush.msrb.mxu1 %v240_v39  ;;  %v341_v28 = vld [vmem:[#allocation5 + $0x5d8] sm:$0xff]  ;;  %v291_v30 = vld [vmem:[#allocation5 + $0x448] sm:$0xff]  ;;  %v340_v33 = vld [vmem:[#allocation5 + $0x5d0] sm:$0xff] }
  0x44   :  { %1824 = vmatpush.msrb.mxu2 %v255_v40  ;;  %1843 = vmatpush.msrb.mxu3 %v272_v41  ;;  %v323_v32 = vld [vmem:[#allocation5 + $0x548] sm:$0xff]  ;;  %v290_v34 = vld [vmem:[#allocation5 + $0x440] sm:$0xff]  ;;  %v289_v38 = vld [vmem:[#allocation5 + $0x438] sm:$0xff] }
  0x45   :  { %1785 = vmatpush.msrb.mxu0 %v222_v42  ;;  %1804 = vmatpush.msrb.mxu1 %v239_v43  ;;  %v307_v35 = vld [vmem:[#allocation5 + $0x4c8] sm:$0xff]  ;;  %v322_v36 = vld [vmem:[#allocation5 + $0x540] sm:$0xff]  ;;  %v321_v40 = vld [vmem:[#allocation5 + $0x538] sm:$0xff] }
  0x46   :  { %1825 = vmatpush.msrb.mxu2 %v254_v44  ;;  %1844 = vmatpush.msrb.mxu3 %v271_v45  ;;  %v339_v37 = vld [vmem:[#allocation5 + $0x5c8] sm:$0xff]  ;;  %v306_v39 = vld [vmem:[#allocation5 + $0x4c0] sm:$0xff]  ;;  %v288_v42 = vld [vmem:[#allocation5 + $0x430] sm:$0xff] }
  0x47   :  { %1786 = vmatpush.msrb.mxu0 %v221_v46  ;;  %1805 = vmatpush.msrb.mxu1 %v238_v47  ;;  %v338_v41 = vld [vmem:[#allocation5 + $0x5c0] sm:$0xff]  ;;  %v305_v43 = vld [vmem:[#allocation5 + $0x4b8] sm:$0xff]  ;;  %v320_v44 = vld [vmem:[#allocation5 + $0x530] sm:$0xff] }
  0x48   :  { %1826 = vmatpush.msrb.mxu2 %v253_v48  ;;  %1845 = vmatpush.msrb.mxu3 %v270_v49  ;;  %v337_v45 = vld [vmem:[#allocation5 + $0x5b8] sm:$0xff]  ;;  %v287_v46 = vld [vmem:[#allocation5 + $0x428] sm:$0xff]  ;;  %v304_v47 = vld [vmem:[#allocation5 + $0x4b0] sm:$0xff] }
  0x49   :  { %1787 = vmatpush.msrb.mxu0 %v220_v50  ;;  %1806 = vmatpush.msrb.mxu1 %v237_v51  ;;  %v319_v48 = vld [vmem:[#allocation5 + $0x528] sm:$0xff]  ;;  %v336_v49 = vld [vmem:[#allocation5 + $0x5b0] sm:$0xff]  ;;  %v286_v50 = vld [vmem:[#allocation5 + $0x420] sm:$0xff] }
  0x4a   :  { %1827 = vmatpush.msrb.mxu2 %v252_v52  ;;  %1846 = vmatpush.msrb.mxu3 %v269_v53  ;;  %v303_v51 = vld [vmem:[#allocation5 + $0x4a8] sm:$0xff]  ;;  %v318_v52 = vld [vmem:[#allocation5 + $0x520] sm:$0xff] }
  0x4b   :  { %1788 = vmatpush.msrb.mxu0 %v219_v54  ;;  %1807 = vmatpush.msrb.mxu1 %v236_v55  ;;  %v335_v53 = vld [vmem:[#allocation5 + $0x5a8] sm:$0xff]  ;;  %v285_v54 = vld [vmem:[#allocation5 + $0x418] sm:$0xff]  ;;  %v302_v55 = vld [vmem:[#allocation5 + $0x4a0] sm:$0xff] }
  0x4c   :  { %1828 = vmatpush.msrb.mxu2 %v251_v56  ;;  %1847 = vmatpush.msrb.mxu3 %v268_v57  ;;  %v317_v56 = vld [vmem:[#allocation5 + $0x518] sm:$0xff]  ;;  %v334_v57 = vld [vmem:[#allocation5 + $0x5a0] sm:$0xff] }
  0x4d   :  { %1789 = vmatpush.msrb.mxu0 %v218_v58  ;;  %1808 = vmatpush.msrb.mxu1 %v235_v59  ;;  %v284_v58 = vld [vmem:[#allocation5 + $0x410] sm:$0xff]  ;;  %v301_v59 = vld [vmem:[#allocation5 + $0x498] sm:$0xff] }
  0x4e   :  { %1829 = vmatpush.msrb.mxu2 %v250_v60  ;;  %1848 = vmatpush.msrb.mxu3 %v267_v61  ;;  %v316_v60 = vld [vmem:[#allocation5 + $0x510] sm:$0xff]  ;;  %v333_v61 = vld [vmem:[#allocation5 + $0x598] sm:$0xff] }
  0x4f   :  { %1710 = vmatmul.f32.vlgmr.msra.gmra.mxu0 %v58_v62  ;;  %1750 = vmatmul.f32.vlgmr.msra.gmra.mxu2 %v60_v63  ;;  %v283_v62 = vld [vmem:[#allocation5 + $0x408] sm:$0xff]  ;;  %v300_v63 = vld [vmem:[#allocation5 + $0x490] sm:$0xff] }
  0x50   :  { %1854 = vmatpush.msra.mxu0 %v297_v0  ;;  %1894 = vmatpush.msra.mxu2 %v329_v1  ;;  %v315_v0 = vld [vmem:[#allocation5 + $0x508] sm:$0xff]  ;;  %v332_v1 = vld [vmem:[#allocation5 + $0x590] sm:$0xff] }
  0x51   :  { %1809 = vmatpush.msrb.mxu1 %v234_v2  ;;  %1849 = vmatpush.msrb.mxu3 %v266_v3  ;;  %v282_v2 = vld [vmem:[#allocation5 + $0x400] sm:$0xff]  ;;  %v299_v3 = vld [vmem:[#allocation5 + $0x488] sm:$0xff] }
  0x52   :  { %1730 = vmatmul.f32.vlgmr.msra.gmra.mxu1 %v59_v4  ;;  %1770 = vmatmul.f32.vlgmr.msra.gmra.mxu3 %v61_v5  ;;  %v314_v4 = vld [vmem:[#allocation5 + $0x500] sm:$0xff]  ;;  %v331_v5 = vld [vmem:[#allocation5 + $0x588] sm:$0xff] }
  0x53   :  { %1855 = vmatpush.msra.mxu0 %v296_v6  ;;  %1874 = vmatpush.msra.mxu1 %v313_v7  ;;  %v66_v6 = vld [vmem:[#allocation2 + $0x40] sm:$0xff]  ;;  %v68_v7 = vld [vmem:[#allocation2 + $0x50] sm:$0xff] }
  0x54   :  { %1895 = vmatpush.msra.mxu2 %v328_v8  ;;  %1914 = vmatpush.msra.mxu3 %v345_v9  ;;  %v361_v8 = vld [vmem:[#allocation5 + $0x678] sm:$0xff] }
  0x55   :  { %1856 = vmatpush.msra.mxu0 %v295_v10  ;;  %1875 = vmatpush.msra.mxu1 %v312_v11  ;;  %v393_v9 = vld [vmem:[#allocation5 + $0x778] sm:$0xff]  ;;  %v298_v10 = vld [vmem:[#allocation5 + $0x480] sm:$0xff] }
  0x56   :  { %1896 = vmatpush.msra.mxu2 %v327_v12  ;;  %1915 = vmatpush.msra.mxu3 %v344_v13  ;;  %v330_v11 = vld [vmem:[#allocation5 + $0x580] sm:$0xff]  ;;  %v67_v12 = vld [vmem:[#allocation2 + $0x48] sm:$0xff]  ;;  %v69_v13 = vld [vmem:[#allocation2 + $0x58] sm:$0xff] }
  0x57   :  { %1857 = vmatpush.msra.mxu0 %v294_v14  ;;  %1876 = vmatpush.msra.mxu1 %v311_v15  ;;  %v360_v14 = vld [vmem:[#allocation5 + $0x670] sm:$0xff]  ;;  %v377_v15 = vld [vmem:[#allocation5 + $0x6f8] sm:$0xff] }
  0x58   :  { %1897 = vmatpush.msra.mxu2 %v326_v16  ;;  %1916 = vmatpush.msra.mxu3 %v343_v17  ;;  %v392_v16 = vld [vmem:[#allocation5 + $0x770] sm:$0xff]  ;;  %v409_v17 = vld [vmem:[#allocation5 + $0x7f8] sm:$0xff] }
  0x59   :  { %1830 = vmatmul.f32.vlgmr.msrb.gmra.mxu2 %v64_v18  ;;  %1858 = vmatpush.msra.mxu0 %v293_v19  ;;  %v359_v18 = vld [vmem:[#allocation5 + $0x668] sm:$0xff]  ;;  %v376_v19 = vld [vmem:[#allocation5 + $0x6f0] sm:$0xff] }
  0x5a   :  { %1877 = vmatpush.msra.mxu1 %v310_v20  ;;  %1898 = vmatpush.msra.mxu2 %v325_v21  ;;  %v391_v20 = vld [vmem:[#allocation5 + $0x768] sm:$0xff]  ;;  %v408_v21 = vld [vmem:[#allocation5 + $0x7f0] sm:$0xff] }
  0x5b   :  { %1917 = vmatpush.msra.mxu3 %v342_v22  ;;  %1790 = vmatmul.f32.vlgmr.msrb.gmra.mxu0 %v62_v23  ;;  %v358_v22 = vld [vmem:[#allocation5 + $0x660] sm:$0xff]  ;;  %v375_v23 = vld [vmem:[#allocation5 + $0x6e8] sm:$0xff] }
  0x5c   :  { %1850 = vmatmul.f32.vlgmr.msrb.gmra.mxu3 %v65_v24  ;;  %1859 = vmatpush.msra.mxu0 %v292_v25  ;;  %v390_v24 = vld [vmem:[#allocation5 + $0x760] sm:$0xff]  ;;  %v407_v25 = vld [vmem:[#allocation5 + $0x7e8] sm:$0xff] }
  0x5d   :  { %1878 = vmatpush.msra.mxu1 %v309_v26  ;;  %1899 = vmatpush.msra.mxu2 %v324_v27  ;;  %v357_v26 = vld [vmem:[#allocation5 + $0x658] sm:$0xff]  ;;  %v374_v27 = vld [vmem:[#allocation5 + $0x6e0] sm:$0xff] }
  0x5e   :  { %1918 = vmatpush.msra.mxu3 %v341_v28  ;;  %1810 = vmatmul.f32.vlgmr.msrb.gmra.mxu1 %v63_v29  ;;  %v389_v28 = vld [vmem:[#allocation5 + $0x758] sm:$0xff]  ;;  %v406_v29 = vld [vmem:[#allocation5 + $0x7e0] sm:$0xff] }
  0x5f   :  { %1860 = vmatpush.msra.mxu0 %v291_v30  ;;  %1879 = vmatpush.msra.mxu1 %v308_v31  ;;  %v356_v30 = vld [vmem:[#allocation5 + $0x650] sm:$0xff]  ;;  %v373_v31 = vld [vmem:[#allocation5 + $0x6d8] sm:$0xff] }
  0x60   :  { %1900 = vmatpush.msra.mxu2 %v323_v32  ;;  %1919 = vmatpush.msra.mxu3 %v340_v33  ;;  %v388_v32 = vld [vmem:[#allocation5 + $0x750] sm:$0xff]  ;;  %v405_v33 = vld [vmem:[#allocation5 + $0x7d8] sm:$0xff] }
  0x61   :  { %1861 = vmatpush.msra.mxu0 %v290_v34  ;;  %1880 = vmatpush.msra.mxu1 %v307_v35  ;;  %v355_v34 = vld [vmem:[#allocation5 + $0x648] sm:$0xff]  ;;  %v372_v35 = vld [vmem:[#allocation5 + $0x6d0] sm:$0xff] }
  0x62   :  { %1901 = vmatpush.msra.mxu2 %v322_v36  ;;  %1920 = vmatpush.msra.mxu3 %v339_v37  ;;  %v387_v36 = vld [vmem:[#allocation5 + $0x748] sm:$0xff]  ;;  %v404_v37 = vld [vmem:[#allocation5 + $0x7d0] sm:$0xff] }
  0x63   :  { %1862 = vmatpush.msra.mxu0 %v289_v38  ;;  %1881 = vmatpush.msra.mxu1 %v306_v39  ;;  %v354_v38 = vld [vmem:[#allocation5 + $0x640] sm:$0xff]  ;;  %v371_v39 = vld [vmem:[#allocation5 + $0x6c8] sm:$0xff] }
  0x64   :  { %1902 = vmatpush.msra.mxu2 %v321_v40  ;;  %1921 = vmatpush.msra.mxu3 %v338_v41  ;;  %v386_v40 = vld [vmem:[#allocation5 + $0x740] sm:$0xff]  ;;  %v403_v41 = vld [vmem:[#allocation5 + $0x7c8] sm:$0xff] }
  0x65   :  { %1863 = vmatpush.msra.mxu0 %v288_v42  ;;  %1882 = vmatpush.msra.mxu1 %v305_v43  ;;  %v353_v42 = vld [vmem:[#allocation5 + $0x638] sm:$0xff]  ;;  %v370_v43 = vld [vmem:[#allocation5 + $0x6c0] sm:$0xff] }
  0x66   :  { %1903 = vmatpush.msra.mxu2 %v320_v44  ;;  %1922 = vmatpush.msra.mxu3 %v337_v45  ;;  %v385_v44 = vld [vmem:[#allocation5 + $0x738] sm:$0xff]  ;;  %v402_v45 = vld [vmem:[#allocation5 + $0x7c0] sm:$0xff] }
  0x67   :  { %1864 = vmatpush.msra.mxu0 %v287_v46  ;;  %1883 = vmatpush.msra.mxu1 %v304_v47  ;;  %v352_v46 = vld [vmem:[#allocation5 + $0x630] sm:$0xff]  ;;  %v369_v47 = vld [vmem:[#allocation5 + $0x6b8] sm:$0xff] }
  0x68   :  { %1904 = vmatpush.msra.mxu2 %v319_v48  ;;  %1923 = vmatpush.msra.mxu3 %v336_v49  ;;  %v384_v48 = vld [vmem:[#allocation5 + $0x730] sm:$0xff]  ;;  %v401_v49 = vld [vmem:[#allocation5 + $0x7b8] sm:$0xff] }
  0x69   :  { %1865 = vmatpush.msra.mxu0 %v286_v50  ;;  %1884 = vmatpush.msra.mxu1 %v303_v51  ;;  %v351_v50 = vld [vmem:[#allocation5 + $0x628] sm:$0xff]  ;;  %v368_v51 = vld [vmem:[#allocation5 + $0x6b0] sm:$0xff] }
  0x6a   :  { %1905 = vmatpush.msra.mxu2 %v318_v52  ;;  %1924 = vmatpush.msra.mxu3 %v335_v53  ;;  %v383_v52 = vld [vmem:[#allocation5 + $0x728] sm:$0xff]  ;;  %v400_v53 = vld [vmem:[#allocation5 + $0x7b0] sm:$0xff] }
  0x6b   :  { %1866 = vmatpush.msra.mxu0 %v285_v54  ;;  %1885 = vmatpush.msra.mxu1 %v302_v55  ;;  %v350_v54 = vld [vmem:[#allocation5 + $0x620] sm:$0xff]  ;;  %v367_v55 = vld [vmem:[#allocation5 + $0x6a8] sm:$0xff] }
  0x6c   :  { %1906 = vmatpush.msra.mxu2 %v317_v56  ;;  %1925 = vmatpush.msra.mxu3 %v334_v57  ;;  %v382_v56 = vld [vmem:[#allocation5 + $0x720] sm:$0xff]  ;;  %v399_v57 = vld [vmem:[#allocation5 + $0x7a8] sm:$0xff] }
  0x6d   :  { %1867 = vmatpush.msra.mxu0 %v284_v58  ;;  %1886 = vmatpush.msra.mxu1 %v301_v59  ;;  %v349_v58 = vld [vmem:[#allocation5 + $0x618] sm:$0xff]  ;;  %v366_v59 = vld [vmem:[#allocation5 + $0x6a0] sm:$0xff] }
  0x6e   :  { %1907 = vmatpush.msra.mxu2 %v316_v60  ;;  %1926 = vmatpush.msra.mxu3 %v333_v61  ;;  %v381_v60 = vld [vmem:[#allocation5 + $0x718] sm:$0xff]  ;;  %v398_v61 = vld [vmem:[#allocation5 + $0x7a0] sm:$0xff] }
  0x6f   :  { %1868 = vmatpush.msra.mxu0 %v283_v62  ;;  %1887 = vmatpush.msra.mxu1 %v300_v63  ;;  %v348_v62 = vld [vmem:[#allocation5 + $0x610] sm:$0xff]  ;;  %v365_v63 = vld [vmem:[#allocation5 + $0x698] sm:$0xff] }
  0x70   :  { %1908 = vmatpush.msra.mxu2 %v315_v0  ;;  %1927 = vmatpush.msra.mxu3 %v332_v1  ;;  %v380_v0 = vld [vmem:[#allocation5 + $0x710] sm:$0xff]  ;;  %v397_v1 = vld [vmem:[#allocation5 + $0x798] sm:$0xff] }
  0x71   :  { %1869 = vmatpush.msra.mxu0 %v282_v2  ;;  %1888 = vmatpush.msra.mxu1 %v299_v3  ;;  %v347_v2 = vld [vmem:[#allocation5 + $0x608] sm:$0xff]  ;;  %v364_v3 = vld [vmem:[#allocation5 + $0x690] sm:$0xff] }
  0x72   :  { %1909 = vmatpush.msra.mxu2 %v314_v4  ;;  %1928 = vmatpush.msra.mxu3 %v331_v5  ;;  %v379_v4 = vld [vmem:[#allocation5 + $0x708] sm:$0xff]  ;;  %v396_v5 = vld [vmem:[#allocation5 + $0x790] sm:$0xff] }
  0x73   :  { %1870 = vmatmul.f32.vlgmr.msra.gmra.mxu0 %v66_v6  ;;  %1910 = vmatmul.f32.vlgmr.msra.gmra.mxu2 %v68_v7  ;;  %v346_v6 = vld [vmem:[#allocation5 + $0x600] sm:$0xff]  ;;  %v363_v7 = vld [vmem:[#allocation5 + $0x688] sm:$0xff] }
  0x74   :  { %1934 = vmatpush.msrb.mxu0 %v361_v8  ;;  %1974 = vmatpush.msrb.mxu2 %v393_v9  ;;  %v378_v8 = vld [vmem:[#allocation5 + $0x700] sm:$0xff]  ;;  %v395_v9 = vld [vmem:[#allocation5 + $0x788] sm:$0xff] }
  0x75   :  { %1889 = vmatpush.msra.mxu1 %v298_v10  ;;  %1929 = vmatpush.msra.mxu3 %v330_v11  ;;  %v70_v10 = vld [vmem:[#allocation2 + $0x60] sm:$0xff]  ;;  %v72_v11 = vld [vmem:[#allocation2 + $0x70] sm:$0xff] }
  0x76   :  { %1890 = vmatmul.f32.vlgmr.msra.gmra.mxu1 %v67_v12  ;;  %1930 = vmatmul.f32.vlgmr.msra.gmra.mxu3 %v69_v13  ;;  %v425_v12 = vld [vmem:[#allocation5 + $0x878] sm:$0xff] }
  0x77   :  { %1935 = vmatpush.msrb.mxu0 %v360_v14  ;;  %1954 = vmatpush.msrb.mxu1 %v377_v15  ;;  %v457_v13 = vld [vmem:[#allocation5 + $0x978] sm:$0xff]  ;;  %v362_v14 = vld [vmem:[#allocation5 + $0x680] sm:$0xff] }
  0x78   :  { %1975 = vmatpush.msrb.mxu2 %v392_v16  ;;  %1994 = vmatpush.msrb.mxu3 %v409_v17  ;;  %v394_v15 = vld [vmem:[#allocation5 + $0x780] sm:$0xff]  ;;  %v71_v16 = vld [vmem:[#allocation2 + $0x68] sm:$0xff]  ;;  %v73_v17 = vld [vmem:[#allocation2 + $0x78] sm:$0xff] }
  0x79   :  { %1936 = vmatpush.msrb.mxu0 %v359_v18  ;;  %1955 = vmatpush.msrb.mxu1 %v376_v19  ;;  %v424_v18 = vld [vmem:[#allocation5 + $0x870] sm:$0xff]  ;;  %v441_v19 = vld [vmem:[#allocation5 + $0x8f8] sm:$0xff] }
  0x7a   :  { %1976 = vmatpush.msrb.mxu2 %v391_v20  ;;  %1995 = vmatpush.msrb.mxu3 %v408_v21  ;;  %v456_v20 = vld [vmem:[#allocation5 + $0x970] sm:$0xff]  ;;  %v473_v21 = vld [vmem:[#allocation5 + $0x9f8] sm:$0xff] }
  0x7b   :  { %1937 = vmatpush.msrb.mxu0 %v358_v22  ;;  %1956 = vmatpush.msrb.mxu1 %v375_v23  ;;  %v423_v22 = vld [vmem:[#allocation5 + $0x868] sm:$0xff]  ;;  %v440_v23 = vld [vmem:[#allocation5 + $0x8f0] sm:$0xff] }
  0x7c   :  { %1977 = vmatpush.msrb.mxu2 %v390_v24  ;;  %1996 = vmatpush.msrb.mxu3 %v407_v25  ;;  %v455_v24 = vld [vmem:[#allocation5 + $0x968] sm:$0xff]  ;;  %v472_v25 = vld [vmem:[#allocation5 + $0x9f0] sm:$0xff] }
  0x7d   :  { %1938 = vmatpush.msrb.mxu0 %v357_v26  ;;  %1957 = vmatpush.msrb.mxu1 %v374_v27  ;;  %v422_v26 = vld [vmem:[#allocation5 + $0x860] sm:$0xff]  ;;  %v439_v27 = vld [vmem:[#allocation5 + $0x8e8] sm:$0xff] }
  0x7e   :  { %1978 = vmatpush.msrb.mxu2 %v389_v28  ;;  %1997 = vmatpush.msrb.mxu3 %v406_v29  ;;  %v454_v28 = vld [vmem:[#allocation5 + $0x960] sm:$0xff]  ;;  %v471_v29 = vld [vmem:[#allocation5 + $0x9e8] sm:$0xff] }
  0x7f   :  { %1939 = vmatpush.msrb.mxu0 %v356_v30  ;;  %1958 = vmatpush.msrb.mxu1 %v373_v31  ;;  %v421_v30 = vld [vmem:[#allocation5 + $0x858] sm:$0xff]  ;;  %v438_v31 = vld [vmem:[#allocation5 + $0x8e0] sm:$0xff] }
  0x80   :  { %1979 = vmatpush.msrb.mxu2 %v388_v32  ;;  %1998 = vmatpush.msrb.mxu3 %v405_v33  ;;  %v453_v32 = vld [vmem:[#allocation5 + $0x958] sm:$0xff]  ;;  %v470_v33 = vld [vmem:[#allocation5 + $0x9e0] sm:$0xff] }
  0x81   :  { %1940 = vmatpush.msrb.mxu0 %v355_v34  ;;  %1959 = vmatpush.msrb.mxu1 %v372_v35  ;;  %v420_v34 = vld [vmem:[#allocation5 + $0x850] sm:$0xff]  ;;  %v437_v35 = vld [vmem:[#allocation5 + $0x8d8] sm:$0xff] }
  0x82   :  { %1980 = vmatpush.msrb.mxu2 %v387_v36  ;;  %1999 = vmatpush.msrb.mxu3 %v404_v37  ;;  %v452_v36 = vld [vmem:[#allocation5 + $0x950] sm:$0xff]  ;;  %v469_v37 = vld [vmem:[#allocation5 + $0x9d8] sm:$0xff] }
  0x83   :  { %1941 = vmatpush.msrb.mxu0 %v354_v38  ;;  %1960 = vmatpush.msrb.mxu1 %v371_v39  ;;  %v419_v38 = vld [vmem:[#allocation5 + $0x848] sm:$0xff]  ;;  %v436_v39 = vld [vmem:[#allocation5 + $0x8d0] sm:$0xff] }
  0x84   :  { %1981 = vmatpush.msrb.mxu2 %v386_v40  ;;  %2000 = vmatpush.msrb.mxu3 %v403_v41  ;;  %v451_v40 = vld [vmem:[#allocation5 + $0x948] sm:$0xff]  ;;  %v468_v41 = vld [vmem:[#allocation5 + $0x9d0] sm:$0xff] }
  0x85   :  { %1942 = vmatpush.msrb.mxu0 %v353_v42  ;;  %1961 = vmatpush.msrb.mxu1 %v370_v43  ;;  %v418_v42 = vld [vmem:[#allocation5 + $0x840] sm:$0xff]  ;;  %v435_v43 = vld [vmem:[#allocation5 + $0x8c8] sm:$0xff] }
  0x86   :  { %1982 = vmatpush.msrb.mxu2 %v385_v44  ;;  %2001 = vmatpush.msrb.mxu3 %v402_v45  ;;  %v450_v44 = vld [vmem:[#allocation5 + $0x940] sm:$0xff]  ;;  %v467_v45 = vld [vmem:[#allocation5 + $0x9c8] sm:$0xff] }
  0x87   :  { %1943 = vmatpush.msrb.mxu0 %v352_v46  ;;  %1962 = vmatpush.msrb.mxu1 %v369_v47  ;;  %v417_v46 = vld [vmem:[#allocation5 + $0x838] sm:$0xff]  ;;  %v434_v47 = vld [vmem:[#allocation5 + $0x8c0] sm:$0xff] }
  0x88   :  { %1983 = vmatpush.msrb.mxu2 %v384_v48  ;;  %2002 = vmatpush.msrb.mxu3 %v401_v49  ;;  %v449_v48 = vld [vmem:[#allocation5 + $0x938] sm:$0xff]  ;;  %v466_v49 = vld [vmem:[#allocation5 + $0x9c0] sm:$0xff] }
  0x89   :  { %1944 = vmatpush.msrb.mxu0 %v351_v50  ;;  %1963 = vmatpush.msrb.mxu1 %v368_v51  ;;  %v416_v50 = vld [vmem:[#allocation5 + $0x830] sm:$0xff]  ;;  %v433_v51 = vld [vmem:[#allocation5 + $0x8b8] sm:$0xff] }
  0x8a   :  { %1984 = vmatpush.msrb.mxu2 %v383_v52  ;;  %2003 = vmatpush.msrb.mxu3 %v400_v53  ;;  %v448_v52 = vld [vmem:[#allocation5 + $0x930] sm:$0xff]  ;;  %v465_v53 = vld [vmem:[#allocation5 + $0x9b8] sm:$0xff] }
  0x8b   :  { %1945 = vmatpush.msrb.mxu0 %v350_v54  ;;  %1964 = vmatpush.msrb.mxu1 %v367_v55  ;;  %v415_v54 = vld [vmem:[#allocation5 + $0x828] sm:$0xff]  ;;  %v432_v55 = vld [vmem:[#allocation5 + $0x8b0] sm:$0xff] }
  0x8c   :  { %1985 = vmatpush.msrb.mxu2 %v382_v56  ;;  %2004 = vmatpush.msrb.mxu3 %v399_v57  ;;  %v447_v56 = vld [vmem:[#allocation5 + $0x928] sm:$0xff]  ;;  %v464_v57 = vld [vmem:[#allocation5 + $0x9b0] sm:$0xff] }
  0x8d   :  { %1946 = vmatpush.msrb.mxu0 %v349_v58  ;;  %1965 = vmatpush.msrb.mxu1 %v366_v59  ;;  %v414_v58 = vld [vmem:[#allocation5 + $0x820] sm:$0xff]  ;;  %v431_v59 = vld [vmem:[#allocation5 + $0x8a8] sm:$0xff] }
  0x8e   :  { %1986 = vmatpush.msrb.mxu2 %v381_v60  ;;  %2005 = vmatpush.msrb.mxu3 %v398_v61  ;;  %v446_v60 = vld [vmem:[#allocation5 + $0x920] sm:$0xff]  ;;  %v463_v61 = vld [vmem:[#allocation5 + $0x9a8] sm:$0xff] }
  0x8f   :  { %1947 = vmatpush.msrb.mxu0 %v348_v62  ;;  %1966 = vmatpush.msrb.mxu1 %v365_v63  ;;  %v413_v62 = vld [vmem:[#allocation5 + $0x818] sm:$0xff]  ;;  %v430_v63 = vld [vmem:[#allocation5 + $0x8a0] sm:$0xff] }
  0x90   :  { %1987 = vmatpush.msrb.mxu2 %v380_v0  ;;  %2006 = vmatpush.msrb.mxu3 %v397_v1  ;;  %v445_v0 = vld [vmem:[#allocation5 + $0x918] sm:$0xff]  ;;  %v462_v1 = vld [vmem:[#allocation5 + $0x9a0] sm:$0xff] }
  0x91   :  { %1948 = vmatpush.msrb.mxu0 %v347_v2  ;;  %1967 = vmatpush.msrb.mxu1 %v364_v3  ;;  %v412_v2 = vld [vmem:[#allocation5 + $0x810] sm:$0xff]  ;;  %v429_v3 = vld [vmem:[#allocation5 + $0x898] sm:$0xff] }
  0x92   :  { %1988 = vmatpush.msrb.mxu2 %v379_v4  ;;  %2007 = vmatpush.msrb.mxu3 %v396_v5  ;;  %v444_v4 = vld [vmem:[#allocation5 + $0x910] sm:$0xff]  ;;  %v461_v5 = vld [vmem:[#allocation5 + $0x998] sm:$0xff] }
  0x93   :  { %1949 = vmatpush.msrb.mxu0 %v346_v6  ;;  %1968 = vmatpush.msrb.mxu1 %v363_v7  ;;  %v411_v6 = vld [vmem:[#allocation5 + $0x808] sm:$0xff]  ;;  %v428_v7 = vld [vmem:[#allocation5 + $0x890] sm:$0xff] }
  0x94   :  { %1989 = vmatpush.msrb.mxu2 %v378_v8  ;;  %2008 = vmatpush.msrb.mxu3 %v395_v9  ;;  %v443_v8 = vld [vmem:[#allocation5 + $0x908] sm:$0xff]  ;;  %v460_v9 = vld [vmem:[#allocation5 + $0x990] sm:$0xff] }
  0x95   :  { %1950 = vmatmul.f32.vlgmr.msrb.gmra.mxu0 %v70_v10  ;;  %1990 = vmatmul.f32.vlgmr.msrb.gmra.mxu2 %v72_v11  ;;  %v410_v10 = vld [vmem:[#allocation5 + $0x800] sm:$0xff]  ;;  %v427_v11 = vld [vmem:[#allocation5 + $0x888] sm:$0xff] }
  0x96   :  { %2014 = vmatpush.msra.mxu0 %v425_v12  ;;  %2054 = vmatpush.msra.mxu2 %v457_v13  ;;  %v442_v12 = vld [vmem:[#allocation5 + $0x900] sm:$0xff]  ;;  %v459_v13 = vld [vmem:[#allocation5 + $0x988] sm:$0xff] }
  0x97   :  { %1969 = vmatpush.msrb.mxu1 %v362_v14  ;;  %2009 = vmatpush.msrb.mxu3 %v394_v15  ;;  %v74_v14 = vld [vmem:[#allocation2 + $0x80] sm:$0xff]  ;;  %v76_v15 = vld [vmem:[#allocation2 + $0x90] sm:$0xff] }
  0x98   :  { %1970 = vmatmul.f32.vlgmr.msrb.gmra.mxu1 %v71_v16  ;;  %2010 = vmatmul.f32.vlgmr.msrb.gmra.mxu3 %v73_v17  ;;  %v489_v16 = vld [vmem:[#allocation5 + $0xa78] sm:$0xff] }
  0x99   :  { %2015 = vmatpush.msra.mxu0 %v424_v18  ;;  %2034 = vmatpush.msra.mxu1 %v441_v19  ;;  %v521_v17 = vld [vmem:[#allocation5 + $0xb78] sm:$0xff]  ;;  %v426_v18 = vld [vmem:[#allocation5 + $0x880] sm:$0xff] }
  0x9a   :  { %2055 = vmatpush.msra.mxu2 %v456_v20  ;;  %2074 = vmatpush.msra.mxu3 %v473_v21  ;;  %v458_v19 = vld [vmem:[#allocation5 + $0x980] sm:$0xff]  ;;  %v75_v20 = vld [vmem:[#allocation2 + $0x88] sm:$0xff]  ;;  %v77_v21 = vld [vmem:[#allocation2 + $0x98] sm:$0xff] }
  0x9b   :  { %2016 = vmatpush.msra.mxu0 %v423_v22  ;;  %2035 = vmatpush.msra.mxu1 %v440_v23  ;;  %v488_v22 = vld [vmem:[#allocation5 + $0xa70] sm:$0xff]  ;;  %v505_v23 = vld [vmem:[#allocation5 + $0xaf8] sm:$0xff] }
  0x9c   :  { %2056 = vmatpush.msra.mxu2 %v455_v24  ;;  %2075 = vmatpush.msra.mxu3 %v472_v25  ;;  %v520_v24 = vld [vmem:[#allocation5 + $0xb70] sm:$0xff]  ;;  %v537_v25 = vld [vmem:[#allocation5 + $0xbf8] sm:$0xff] }
  0x9d   :  { %2017 = vmatpush.msra.mxu0 %v422_v26  ;;  %2036 = vmatpush.msra.mxu1 %v439_v27  ;;  %v487_v26 = vld [vmem:[#allocation5 + $0xa68] sm:$0xff]  ;;  %v504_v27 = vld [vmem:[#allocation5 + $0xaf0] sm:$0xff] }
  0x9e   :  { %2057 = vmatpush.msra.mxu2 %v454_v28  ;;  %2076 = vmatpush.msra.mxu3 %v471_v29  ;;  %v519_v28 = vld [vmem:[#allocation5 + $0xb68] sm:$0xff]  ;;  %v536_v29 = vld [vmem:[#allocation5 + $0xbf0] sm:$0xff] }
  0x9f   :  { %2018 = vmatpush.msra.mxu0 %v421_v30  ;;  %2037 = vmatpush.msra.mxu1 %v438_v31  ;;  %v486_v30 = vld [vmem:[#allocation5 + $0xa60] sm:$0xff]  ;;  %v503_v31 = vld [vmem:[#allocation5 + $0xae8] sm:$0xff] }
  0xa0   :  { %2058 = vmatpush.msra.mxu2 %v453_v32  ;;  %2077 = vmatpush.msra.mxu3 %v470_v33  ;;  %v518_v32 = vld [vmem:[#allocation5 + $0xb60] sm:$0xff]  ;;  %v535_v33 = vld [vmem:[#allocation5 + $0xbe8] sm:$0xff] }
  0xa1   :  { %2019 = vmatpush.msra.mxu0 %v420_v34  ;;  %2038 = vmatpush.msra.mxu1 %v437_v35  ;;  %v485_v34 = vld [vmem:[#allocation5 + $0xa58] sm:$0xff]  ;;  %v502_v35 = vld [vmem:[#allocation5 + $0xae0] sm:$0xff] }
  0xa2   :  { %2059 = vmatpush.msra.mxu2 %v452_v36  ;;  %2078 = vmatpush.msra.mxu3 %v469_v37  ;;  %v517_v36 = vld [vmem:[#allocation5 + $0xb58] sm:$0xff]  ;;  %v534_v37 = vld [vmem:[#allocation5 + $0xbe0] sm:$0xff] }
  0xa3   :  { %2020 = vmatpush.msra.mxu0 %v419_v38  ;;  %2039 = vmatpush.msra.mxu1 %v436_v39  ;;  %v484_v38 = vld [vmem:[#allocation5 + $0xa50] sm:$0xff]  ;;  %v501_v39 = vld [vmem:[#allocation5 + $0xad8] sm:$0xff] }
  0xa4   :  { %2060 = vmatpush.msra.mxu2 %v451_v40  ;;  %2079 = vmatpush.msra.mxu3 %v468_v41  ;;  %v516_v40 = vld [vmem:[#allocation5 + $0xb50] sm:$0xff]  ;;  %v533_v41 = vld [vmem:[#allocation5 + $0xbd8] sm:$0xff] }
  0xa5   :  { %2021 = vmatpush.msra.mxu0 %v418_v42  ;;  %2040 = vmatpush.msra.mxu1 %v435_v43  ;;  %v483_v42 = vld [vmem:[#allocation5 + $0xa48] sm:$0xff]  ;;  %v500_v43 = vld [vmem:[#allocation5 + $0xad0] sm:$0xff] }
  0xa6   :  { %2061 = vmatpush.msra.mxu2 %v450_v44  ;;  %2080 = vmatpush.msra.mxu3 %v467_v45  ;;  %v515_v44 = vld [vmem:[#allocation5 + $0xb48] sm:$0xff]  ;;  %v532_v45 = vld [vmem:[#allocation5 + $0xbd0] sm:$0xff] }
  0xa7   :  { %2022 = vmatpush.msra.mxu0 %v417_v46  ;;  %2041 = vmatpush.msra.mxu1 %v434_v47  ;;  %v482_v46 = vld [vmem:[#allocation5 + $0xa40] sm:$0xff]  ;;  %v499_v47 = vld [vmem:[#allocation5 + $0xac8] sm:$0xff] }
  0xa8   :  { %2062 = vmatpush.msra.mxu2 %v449_v48  ;;  %2081 = vmatpush.msra.mxu3 %v466_v49  ;;  %v514_v48 = vld [vmem:[#allocation5 + $0xb40] sm:$0xff]  ;;  %v531_v49 = vld [vmem:[#allocation5 + $0xbc8] sm:$0xff] }
  0xa9   :  { %2023 = vmatpush.msra.mxu0 %v416_v50  ;;  %2042 = vmatpush.msra.mxu1 %v433_v51  ;;  %v481_v50 = vld [vmem:[#allocation5 + $0xa38] sm:$0xff]  ;;  %v498_v51 = vld [vmem:[#allocation5 + $0xac0] sm:$0xff] }
  0xaa   :  { %2063 = vmatpush.msra.mxu2 %v448_v52  ;;  %2082 = vmatpush.msra.mxu3 %v465_v53  ;;  %v513_v52 = vld [vmem:[#allocation5 + $0xb38] sm:$0xff]  ;;  %v530_v53 = vld [vmem:[#allocation5 + $0xbc0] sm:$0xff] }
  0xab   :  { %2024 = vmatpush.msra.mxu0 %v415_v54  ;;  %2043 = vmatpush.msra.mxu1 %v432_v55  ;;  %v480_v54 = vld [vmem:[#allocation5 + $0xa30] sm:$0xff]  ;;  %v497_v55 = vld [vmem:[#allocation5 + $0xab8] sm:$0xff] }
  0xac   :  { %2064 = vmatpush.msra.mxu2 %v447_v56  ;;  %2083 = vmatpush.msra.mxu3 %v464_v57  ;;  %v512_v56 = vld [vmem:[#allocation5 + $0xb30] sm:$0xff]  ;;  %v529_v57 = vld [vmem:[#allocation5 + $0xbb8] sm:$0xff] }
  0xad   :  { %2025 = vmatpush.msra.mxu0 %v414_v58  ;;  %2044 = vmatpush.msra.mxu1 %v431_v59  ;;  %v479_v58 = vld [vmem:[#allocation5 + $0xa28] sm:$0xff]  ;;  %v496_v59 = vld [vmem:[#allocation5 + $0xab0] sm:$0xff] }
  0xae   :  { %2065 = vmatpush.msra.mxu2 %v446_v60  ;;  %2084 = vmatpush.msra.mxu3 %v463_v61  ;;  %v511_v60 = vld [vmem:[#allocation5 + $0xb28] sm:$0xff]  ;;  %v528_v61 = vld [vmem:[#allocation5 + $0xbb0] sm:$0xff] }
  0xaf   :  { %2026 = vmatpush.msra.mxu0 %v413_v62  ;;  %2045 = vmatpush.msra.mxu1 %v430_v63  ;;  %v478_v62 = vld [vmem:[#allocation5 + $0xa20] sm:$0xff]  ;;  %v495_v63 = vld [vmem:[#allocation5 + $0xaa8] sm:$0xff] }
  0xb0   :  { %2066 = vmatpush.msra.mxu2 %v445_v0  ;;  %2085 = vmatpush.msra.mxu3 %v462_v1  ;;  %v510_v0 = vld [vmem:[#allocation5 + $0xb20] sm:$0xff]  ;;  %v527_v1 = vld [vmem:[#allocation5 + $0xba8] sm:$0xff] }
  0xb1   :  { %2027 = vmatpush.msra.mxu0 %v412_v2  ;;  %2046 = vmatpush.msra.mxu1 %v429_v3  ;;  %v477_v2 = vld [vmem:[#allocation5 + $0xa18] sm:$0xff]  ;;  %v494_v3 = vld [vmem:[#allocation5 + $0xaa0] sm:$0xff] }
  0xb2   :  { %2067 = vmatpush.msra.mxu2 %v444_v4  ;;  %2086 = vmatpush.msra.mxu3 %v461_v5  ;;  %v509_v4 = vld [vmem:[#allocation5 + $0xb18] sm:$0xff]  ;;  %v526_v5 = vld [vmem:[#allocation5 + $0xba0] sm:$0xff] }
  0xb3   :  { %2028 = vmatpush.msra.mxu0 %v411_v6  ;;  %2047 = vmatpush.msra.mxu1 %v428_v7  ;;  %v476_v6 = vld [vmem:[#allocation5 + $0xa10] sm:$0xff]  ;;  %v493_v7 = vld [vmem:[#allocation5 + $0xa98] sm:$0xff] }
  0xb4   :  { %2068 = vmatpush.msra.mxu2 %v443_v8  ;;  %2087 = vmatpush.msra.mxu3 %v460_v9  ;;  %v508_v8 = vld [vmem:[#allocation5 + $0xb10] sm:$0xff]  ;;  %v525_v9 = vld [vmem:[#allocation5 + $0xb98] sm:$0xff] }
  0xb5   :  { %2029 = vmatpush.msra.mxu0 %v410_v10  ;;  %2048 = vmatpush.msra.mxu1 %v427_v11  ;;  %v475_v10 = vld [vmem:[#allocation5 + $0xa08] sm:$0xff]  ;;  %v492_v11 = vld [vmem:[#allocation5 + $0xa90] sm:$0xff] }
  0xb6   :  { %2069 = vmatpush.msra.mxu2 %v442_v12  ;;  %2088 = vmatpush.msra.mxu3 %v459_v13  ;;  %v507_v12 = vld [vmem:[#allocation5 + $0xb08] sm:$0xff]  ;;  %v524_v13 = vld [vmem:[#allocation5 + $0xb90] sm:$0xff] }
  0xb7   :  { %2030 = vmatmul.f32.vlgmr.msra.gmra.mxu0 %v74_v14  ;;  %2070 = vmatmul.f32.vlgmr.msra.gmra.mxu2 %v76_v15  ;;  %v474_v14 = vld [vmem:[#allocation5 + $0xa00] sm:$0xff]  ;;  %v491_v15 = vld [vmem:[#allocation5 + $0xa88] sm:$0xff] }
  0xb8   :  { %2094 = vmatpush.msrb.mxu0 %v489_v16  ;;  %2134 = vmatpush.msrb.mxu2 %v521_v17  ;;  %v506_v16 = vld [vmem:[#allocation5 + $0xb00] sm:$0xff]  ;;  %v523_v17 = vld [vmem:[#allocation5 + $0xb88] sm:$0xff] }
  0xb9   :  { %2049 = vmatpush.msra.mxu1 %v426_v18  ;;  %2089 = vmatpush.msra.mxu3 %v458_v19  ;;  %v78_v18 = vld [vmem:[#allocation2 + $0xa0] sm:$0xff]  ;;  %v80_v19 = vld [vmem:[#allocation2 + $0xb0] sm:$0xff] }
  0xba   :  { %2050 = vmatmul.f32.vlgmr.msra.gmra.mxu1 %v75_v20  ;;  %2090 = vmatmul.f32.vlgmr.msra.gmra.mxu3 %v77_v21  ;;  %v553_v20 = vld [vmem:[#allocation5 + $0xc78] sm:$0xff] }
  0xbb   :  { %2095 = vmatpush.msrb.mxu0 %v488_v22  ;;  %2114 = vmatpush.msrb.mxu1 %v505_v23  ;;  %v585_v21 = vld [vmem:[#allocation5 + $0xd78] sm:$0xff]  ;;  %v490_v22 = vld [vmem:[#allocation5 + $0xa80] sm:$0xff] }
  0xbc   :  { %2135 = vmatpush.msrb.mxu2 %v520_v24  ;;  %2154 = vmatpush.msrb.mxu3 %v537_v25  ;;  %v522_v23 = vld [vmem:[#allocation5 + $0xb80] sm:$0xff]  ;;  %v79_v24 = vld [vmem:[#allocation2 + $0xa8] sm:$0xff]  ;;  %v81_v25 = vld [vmem:[#allocation2 + $0xb8] sm:$0xff] }
  0xbd   :  { %2096 = vmatpush.msrb.mxu0 %v487_v26  ;;  %2115 = vmatpush.msrb.mxu1 %v504_v27  ;;  %v552_v26 = vld [vmem:[#allocation5 + $0xc70] sm:$0xff]  ;;  %v569_v27 = vld [vmem:[#allocation5 + $0xcf8] sm:$0xff] }
  0xbe   :  { %2136 = vmatpush.msrb.mxu2 %v519_v28  ;;  %2155 = vmatpush.msrb.mxu3 %v536_v29  ;;  %v584_v28 = vld [vmem:[#allocation5 + $0xd70] sm:$0xff]  ;;  %v601_v29 = vld [vmem:[#allocation5 + $0xdf8] sm:$0xff] }
  0xbf   :  { %2097 = vmatpush.msrb.mxu0 %v486_v30  ;;  %2116 = vmatpush.msrb.mxu1 %v503_v31  ;;  %v551_v30 = vld [vmem:[#allocation5 + $0xc68] sm:$0xff]  ;;  %v568_v31 = vld [vmem:[#allocation5 + $0xcf0] sm:$0xff] }
  0xc0   :  { %2137 = vmatpush.msrb.mxu2 %v518_v32  ;;  %2156 = vmatpush.msrb.mxu3 %v535_v33  ;;  %v583_v32 = vld [vmem:[#allocation5 + $0xd68] sm:$0xff]  ;;  %v600_v33 = vld [vmem:[#allocation5 + $0xdf0] sm:$0xff] }
  0xc1   :  { %2098 = vmatpush.msrb.mxu0 %v485_v34  ;;  %2117 = vmatpush.msrb.mxu1 %v502_v35  ;;  %v550_v34 = vld [vmem:[#allocation5 + $0xc60] sm:$0xff]  ;;  %v567_v35 = vld [vmem:[#allocation5 + $0xce8] sm:$0xff] }
  0xc2   :  { %2138 = vmatpush.msrb.mxu2 %v517_v36  ;;  %2157 = vmatpush.msrb.mxu3 %v534_v37  ;;  %v582_v36 = vld [vmem:[#allocation5 + $0xd60] sm:$0xff]  ;;  %v599_v37 = vld [vmem:[#allocation5 + $0xde8] sm:$0xff] }
  0xc3   :  { %2099 = vmatpush.msrb.mxu0 %v484_v38  ;;  %2118 = vmatpush.msrb.mxu1 %v501_v39  ;;  %v549_v38 = vld [vmem:[#allocation5 + $0xc58] sm:$0xff]  ;;  %v566_v39 = vld [vmem:[#allocation5 + $0xce0] sm:$0xff] }
  0xc4   :  { %2139 = vmatpush.msrb.mxu2 %v516_v40  ;;  %2158 = vmatpush.msrb.mxu3 %v533_v41  ;;  %v581_v40 = vld [vmem:[#allocation5 + $0xd58] sm:$0xff]  ;;  %v598_v41 = vld [vmem:[#allocation5 + $0xde0] sm:$0xff] }
  0xc5   :  { %2100 = vmatpush.msrb.mxu0 %v483_v42  ;;  %2119 = vmatpush.msrb.mxu1 %v500_v43  ;;  %v548_v42 = vld [vmem:[#allocation5 + $0xc50] sm:$0xff]  ;;  %v565_v43 = vld [vmem:[#allocation5 + $0xcd8] sm:$0xff] }
  0xc6   :  { %2140 = vmatpush.msrb.mxu2 %v515_v44  ;;  %2159 = vmatpush.msrb.mxu3 %v532_v45  ;;  %v580_v44 = vld [vmem:[#allocation5 + $0xd50] sm:$0xff]  ;;  %v597_v45 = vld [vmem:[#allocation5 + $0xdd8] sm:$0xff] }
  0xc7   :  { %2101 = vmatpush.msrb.mxu0 %v482_v46  ;;  %2120 = vmatpush.msrb.mxu1 %v499_v47  ;;  %v547_v46 = vld [vmem:[#allocation5 + $0xc48] sm:$0xff]  ;;  %v564_v47 = vld [vmem:[#allocation5 + $0xcd0] sm:$0xff] }
  0xc8   :  { %2141 = vmatpush.msrb.mxu2 %v514_v48  ;;  %2160 = vmatpush.msrb.mxu3 %v531_v49  ;;  %v579_v48 = vld [vmem:[#allocation5 + $0xd48] sm:$0xff]  ;;  %v596_v49 = vld [vmem:[#allocation5 + $0xdd0] sm:$0xff] }
  0xc9   :  { %2102 = vmatpush.msrb.mxu0 %v481_v50  ;;  %2121 = vmatpush.msrb.mxu1 %v498_v51  ;;  %v546_v50 = vld [vmem:[#allocation5 + $0xc40] sm:$0xff]  ;;  %v563_v51 = vld [vmem:[#allocation5 + $0xcc8] sm:$0xff] }
  0xca   :  { %2142 = vmatpush.msrb.mxu2 %v513_v52  ;;  %2161 = vmatpush.msrb.mxu3 %v530_v53  ;;  %v578_v52 = vld [vmem:[#allocation5 + $0xd40] sm:$0xff]  ;;  %v595_v53 = vld [vmem:[#allocation5 + $0xdc8] sm:$0xff] }
  0xcb   :  { %2103 = vmatpush.msrb.mxu0 %v480_v54  ;;  %2122 = vmatpush.msrb.mxu1 %v497_v55  ;;  %v545_v54 = vld [vmem:[#allocation5 + $0xc38] sm:$0xff]  ;;  %v562_v55 = vld [vmem:[#allocation5 + $0xcc0] sm:$0xff] }
  0xcc   :  { %2143 = vmatpush.msrb.mxu2 %v512_v56  ;;  %2162 = vmatpush.msrb.mxu3 %v529_v57  ;;  %v577_v56 = vld [vmem:[#allocation5 + $0xd38] sm:$0xff]  ;;  %v594_v57 = vld [vmem:[#allocation5 + $0xdc0] sm:$0xff] }
  0xcd   :  { %2104 = vmatpush.msrb.mxu0 %v479_v58  ;;  %2123 = vmatpush.msrb.mxu1 %v496_v59  ;;  %v544_v58 = vld [vmem:[#allocation5 + $0xc30] sm:$0xff]  ;;  %v561_v59 = vld [vmem:[#allocation5 + $0xcb8] sm:$0xff] }
  0xce   :  { %2144 = vmatpush.msrb.mxu2 %v511_v60  ;;  %2163 = vmatpush.msrb.mxu3 %v528_v61  ;;  %v576_v60 = vld [vmem:[#allocation5 + $0xd30] sm:$0xff]  ;;  %v593_v61 = vld [vmem:[#allocation5 + $0xdb8] sm:$0xff] }
  0xcf   :  { %2105 = vmatpush.msrb.mxu0 %v478_v62  ;;  %2124 = vmatpush.msrb.mxu1 %v495_v63  ;;  %v543_v62 = vld [vmem:[#allocation5 + $0xc28] sm:$0xff]  ;;  %v560_v63 = vld [vmem:[#allocation5 + $0xcb0] sm:$0xff] }
  0xd0   :  { %2145 = vmatpush.msrb.mxu2 %v510_v0  ;;  %2164 = vmatpush.msrb.mxu3 %v527_v1  ;;  %v575_v0 = vld [vmem:[#allocation5 + $0xd28] sm:$0xff]  ;;  %v592_v1 = vld [vmem:[#allocation5 + $0xdb0] sm:$0xff] }
  0xd1   :  { %2106 = vmatpush.msrb.mxu0 %v477_v2  ;;  %2125 = vmatpush.msrb.mxu1 %v494_v3  ;;  %v542_v2 = vld [vmem:[#allocation5 + $0xc20] sm:$0xff]  ;;  %v559_v3 = vld [vmem:[#allocation5 + $0xca8] sm:$0xff] }
  0xd2   :  { %2146 = vmatpush.msrb.mxu2 %v509_v4  ;;  %2165 = vmatpush.msrb.mxu3 %v526_v5  ;;  %v574_v4 = vld [vmem:[#allocation5 + $0xd20] sm:$0xff]  ;;  %v591_v5 = vld [vmem:[#allocation5 + $0xda8] sm:$0xff] }
  0xd3   :  { %2107 = vmatpush.msrb.mxu0 %v476_v6  ;;  %2126 = vmatpush.msrb.mxu1 %v493_v7  ;;  %v541_v6 = vld [vmem:[#allocation5 + $0xc18] sm:$0xff]  ;;  %v558_v7 = vld [vmem:[#allocation5 + $0xca0] sm:$0xff] }
  0xd4   :  { %2147 = vmatpush.msrb.mxu2 %v508_v8  ;;  %2166 = vmatpush.msrb.mxu3 %v525_v9  ;;  %v573_v8 = vld [vmem:[#allocation5 + $0xd18] sm:$0xff]  ;;  %v590_v9 = vld [vmem:[#allocation5 + $0xda0] sm:$0xff] }
  0xd5   :  { %2108 = vmatpush.msrb.mxu0 %v475_v10  ;;  %2127 = vmatpush.msrb.mxu1 %v492_v11  ;;  %v540_v10 = vld [vmem:[#allocation5 + $0xc10] sm:$0xff]  ;;  %v557_v11 = vld [vmem:[#allocation5 + $0xc98] sm:$0xff] }
  0xd6   :  { %2148 = vmatpush.msrb.mxu2 %v507_v12  ;;  %2167 = vmatpush.msrb.mxu3 %v524_v13  ;;  %v572_v12 = vld [vmem:[#allocation5 + $0xd10] sm:$0xff]  ;;  %v589_v13 = vld [vmem:[#allocation5 + $0xd98] sm:$0xff] }
  0xd7   :  { %2109 = vmatpush.msrb.mxu0 %v474_v14  ;;  %2128 = vmatpush.msrb.mxu1 %v491_v15  ;;  %v539_v14 = vld [vmem:[#allocation5 + $0xc08] sm:$0xff]  ;;  %v556_v15 = vld [vmem:[#allocation5 + $0xc90] sm:$0xff] }
  0xd8   :  { %2149 = vmatpush.msrb.mxu2 %v506_v16  ;;  %2168 = vmatpush.msrb.mxu3 %v523_v17  ;;  %v571_v16 = vld [vmem:[#allocation5 + $0xd08] sm:$0xff]  ;;  %v588_v17 = vld [vmem:[#allocation5 + $0xd90] sm:$0xff] }
  0xd9   :  { %2110 = vmatmul.f32.vlgmr.msrb.gmra.mxu0 %v78_v18  ;;  %2150 = vmatmul.f32.vlgmr.msrb.gmra.mxu2 %v80_v19  ;;  %v538_v18 = vld [vmem:[#allocation5 + $0xc00] sm:$0xff]  ;;  %v555_v19 = vld [vmem:[#allocation5 + $0xc88] sm:$0xff] }
  0xda   :  { %2174 = vmatpush.msra.mxu0 %v553_v20  ;;  %2214 = vmatpush.msra.mxu2 %v585_v21  ;;  %v570_v20 = vld [vmem:[#allocation5 + $0xd00] sm:$0xff]  ;;  %v587_v21 = vld [vmem:[#allocation5 + $0xd88] sm:$0xff] }
  0xdb   :  { %2129 = vmatpush.msrb.mxu1 %v490_v22  ;;  %2169 = vmatpush.msrb.mxu3 %v522_v23  ;;  %v82_v22 = vld [vmem:[#allocation2 + $0xc0] sm:$0xff]  ;;  %v84_v23 = vld [vmem:[#allocation2 + $0xd0] sm:$0xff] }
  0xdc   :  { %2130 = vmatmul.f32.vlgmr.msrb.gmra.mxu1 %v79_v24  ;;  %2170 = vmatmul.f32.vlgmr.msrb.gmra.mxu3 %v81_v25  ;;  %v617_v24 = vld [vmem:[#allocation5 + $0xe78] sm:$0xff] }
  0xdd   :  { %2175 = vmatpush.msra.mxu0 %v552_v26  ;;  %2194 = vmatpush.msra.mxu1 %v569_v27  ;;  %v649_v25 = vld [vmem:[#allocation5 + $0xf78] sm:$0xff]  ;;  %v554_v26 = vld [vmem:[#allocation5 + $0xc80] sm:$0xff] }
  0xde   :  { %2215 = vmatpush.msra.mxu2 %v584_v28  ;;  %2234 = vmatpush.msra.mxu3 %v601_v29  ;;  %v586_v27 = vld [vmem:[#allocation5 + $0xd80] sm:$0xff]  ;;  %v83_v28 = vld [vmem:[#allocation2 + $0xc8] sm:$0xff]  ;;  %v85_v29 = vld [vmem:[#allocation2 + $0xd8] sm:$0xff] }
  0xdf   :  { %2176 = vmatpush.msra.mxu0 %v551_v30  ;;  %2195 = vmatpush.msra.mxu1 %v568_v31  ;;  %v616_v30 = vld [vmem:[#allocation5 + $0xe70] sm:$0xff]  ;;  %v633_v31 = vld [vmem:[#allocation5 + $0xef8] sm:$0xff] }
  0xe0   :  { %2216 = vmatpush.msra.mxu2 %v583_v32  ;;  %2235 = vmatpush.msra.mxu3 %v600_v33  ;;  %v648_v32 = vld [vmem:[#allocation5 + $0xf70] sm:$0xff]  ;;  %v665_v33 = vld [vmem:[#allocation5 + $0xff8] sm:$0xff] }
  0xe1   :  { %2177 = vmatpush.msra.mxu0 %v550_v34  ;;  %2196 = vmatpush.msra.mxu1 %v567_v35  ;;  %v615_v34 = vld [vmem:[#allocation5 + $0xe68] sm:$0xff]  ;;  %v632_v35 = vld [vmem:[#allocation5 + $0xef0] sm:$0xff] }
  0xe2   :  { %2217 = vmatpush.msra.mxu2 %v582_v36  ;;  %2236 = vmatpush.msra.mxu3 %v599_v37  ;;  %v647_v36 = vld [vmem:[#allocation5 + $0xf68] sm:$0xff]  ;;  %v664_v37 = vld [vmem:[#allocation5 + $0xff0] sm:$0xff] }
  0xe3   :  { %2178 = vmatpush.msra.mxu0 %v549_v38  ;;  %2197 = vmatpush.msra.mxu1 %v566_v39  ;;  %v614_v38 = vld [vmem:[#allocation5 + $0xe60] sm:$0xff]  ;;  %v631_v39 = vld [vmem:[#allocation5 + $0xee8] sm:$0xff] }
  0xe4   :  { %2218 = vmatpush.msra.mxu2 %v581_v40  ;;  %2237 = vmatpush.msra.mxu3 %v598_v41  ;;  %v646_v40 = vld [vmem:[#allocation5 + $0xf60] sm:$0xff]  ;;  %v663_v41 = vld [vmem:[#allocation5 + $0xfe8] sm:$0xff] }
  0xe5   :  { %2179 = vmatpush.msra.mxu0 %v548_v42  ;;  %2198 = vmatpush.msra.mxu1 %v565_v43  ;;  %v613_v42 = vld [vmem:[#allocation5 + $0xe58] sm:$0xff]  ;;  %v630_v43 = vld [vmem:[#allocation5 + $0xee0] sm:$0xff] }
  0xe6   :  { %2219 = vmatpush.msra.mxu2 %v580_v44  ;;  %2238 = vmatpush.msra.mxu3 %v597_v45  ;;  %v645_v44 = vld [vmem:[#allocation5 + $0xf58] sm:$0xff]  ;;  %v662_v45 = vld [vmem:[#allocation5 + $0xfe0] sm:$0xff] }
  0xe7   :  { %2180 = vmatpush.msra.mxu0 %v547_v46  ;;  %2199 = vmatpush.msra.mxu1 %v564_v47  ;;  %v612_v46 = vld [vmem:[#allocation5 + $0xe50] sm:$0xff]  ;;  %v629_v47 = vld [vmem:[#allocation5 + $0xed8] sm:$0xff] }
  0xe8   :  { %2220 = vmatpush.msra.mxu2 %v579_v48  ;;  %2239 = vmatpush.msra.mxu3 %v596_v49  ;;  %v644_v48 = vld [vmem:[#allocation5 + $0xf50] sm:$0xff]  ;;  %v661_v49 = vld [vmem:[#allocation5 + $0xfd8] sm:$0xff] }
  0xe9   :  { %2181 = vmatpush.msra.mxu0 %v546_v50  ;;  %2200 = vmatpush.msra.mxu1 %v563_v51  ;;  %v611_v50 = vld [vmem:[#allocation5 + $0xe48] sm:$0xff]  ;;  %v628_v51 = vld [vmem:[#allocation5 + $0xed0] sm:$0xff] }
  0xea   :  { %2221 = vmatpush.msra.mxu2 %v578_v52  ;;  %2240 = vmatpush.msra.mxu3 %v595_v53  ;;  %v643_v52 = vld [vmem:[#allocation5 + $0xf48] sm:$0xff]  ;;  %v660_v53 = vld [vmem:[#allocation5 + $0xfd0] sm:$0xff] }
  0xeb   :  { %2182 = vmatpush.msra.mxu0 %v545_v54  ;;  %2201 = vmatpush.msra.mxu1 %v562_v55  ;;  %v610_v54 = vld [vmem:[#allocation5 + $0xe40] sm:$0xff]  ;;  %v627_v55 = vld [vmem:[#allocation5 + $0xec8] sm:$0xff] }
  0xec   :  { %2222 = vmatpush.msra.mxu2 %v577_v56  ;;  %2241 = vmatpush.msra.mxu3 %v594_v57  ;;  %v642_v56 = vld [vmem:[#allocation5 + $0xf40] sm:$0xff]  ;;  %v659_v57 = vld [vmem:[#allocation5 + $0xfc8] sm:$0xff] }
  0xed   :  { %2183 = vmatpush.msra.mxu0 %v544_v58  ;;  %2202 = vmatpush.msra.mxu1 %v561_v59  ;;  %v609_v58 = vld [vmem:[#allocation5 + $0xe38] sm:$0xff]  ;;  %v626_v59 = vld [vmem:[#allocation5 + $0xec0] sm:$0xff] }
  0xee   :  { %2223 = vmatpush.msra.mxu2 %v576_v60  ;;  %2242 = vmatpush.msra.mxu3 %v593_v61  ;;  %v641_v60 = vld [vmem:[#allocation5 + $0xf38] sm:$0xff]  ;;  %v658_v61 = vld [vmem:[#allocation5 + $0xfc0] sm:$0xff] }
  0xef   :  { %2184 = vmatpush.msra.mxu0 %v543_v62  ;;  %2203 = vmatpush.msra.mxu1 %v560_v63  ;;  %v608_v62 = vld [vmem:[#allocation5 + $0xe30] sm:$0xff]  ;;  %v625_v63 = vld [vmem:[#allocation5 + $0xeb8] sm:$0xff] }
  0xf0   :  { %2224 = vmatpush.msra.mxu2 %v575_v0  ;;  %2243 = vmatpush.msra.mxu3 %v592_v1  ;;  %v640_v0 = vld [vmem:[#allocation5 + $0xf30] sm:$0xff]  ;;  %v657_v1 = vld [vmem:[#allocation5 + $0xfb8] sm:$0xff] }
  0xf1   :  { %2185 = vmatpush.msra.mxu0 %v542_v2  ;;  %2204 = vmatpush.msra.mxu1 %v559_v3  ;;  %v607_v2 = vld [vmem:[#allocation5 + $0xe28] sm:$0xff]  ;;  %v624_v3 = vld [vmem:[#allocation5 + $0xeb0] sm:$0xff] }
  0xf2   :  { %2225 = vmatpush.msra.mxu2 %v574_v4  ;;  %2244 = vmatpush.msra.mxu3 %v591_v5  ;;  %v639_v4 = vld [vmem:[#allocation5 + $0xf28] sm:$0xff]  ;;  %v656_v5 = vld [vmem:[#allocation5 + $0xfb0] sm:$0xff] }
  0xf3   :  { %2186 = vmatpush.msra.mxu0 %v541_v6  ;;  %2205 = vmatpush.msra.mxu1 %v558_v7  ;;  %v606_v6 = vld [vmem:[#allocation5 + $0xe20] sm:$0xff]  ;;  %v623_v7 = vld [vmem:[#allocation5 + $0xea8] sm:$0xff] }
  0xf4   :  { %2226 = vmatpush.msra.mxu2 %v573_v8  ;;  %2245 = vmatpush.msra.mxu3 %v590_v9  ;;  %v638_v8 = vld [vmem:[#allocation5 + $0xf20] sm:$0xff]  ;;  %v655_v9 = vld [vmem:[#allocation5 + $0xfa8] sm:$0xff] }
  0xf5   :  { %2187 = vmatpush.msra.mxu0 %v540_v10  ;;  %2206 = vmatpush.msra.mxu1 %v557_v11  ;;  %v605_v10 = vld [vmem:[#allocation5 + $0xe18] sm:$0xff]  ;;  %v622_v11 = vld [vmem:[#allocation5 + $0xea0] sm:$0xff] }
  0xf6   :  { %2227 = vmatpush.msra.mxu2 %v572_v12  ;;  %2246 = vmatpush.msra.mxu3 %v589_v13  ;;  %v637_v12 = vld [vmem:[#allocation5 + $0xf18] sm:$0xff]  ;;  %v654_v13 = vld [vmem:[#allocation5 + $0xfa0] sm:$0xff] }
  0xf7   :  { %2188 = vmatpush.msra.mxu0 %v539_v14  ;;  %2207 = vmatpush.msra.mxu1 %v556_v15  ;;  %v604_v14 = vld [vmem:[#allocation5 + $0xe10] sm:$0xff]  ;;  %v621_v15 = vld [vmem:[#allocation5 + $0xe98] sm:$0xff] }
  0xf8   :  { %2228 = vmatpush.msra.mxu2 %v571_v16  ;;  %2247 = vmatpush.msra.mxu3 %v588_v17  ;;  %v636_v16 = vld [vmem:[#allocation5 + $0xf10] sm:$0xff]  ;;  %v653_v17 = vld [vmem:[#allocation5 + $0xf98] sm:$0xff] }
  0xf9   :  { %2189 = vmatpush.msra.mxu0 %v538_v18  ;;  %2208 = vmatpush.msra.mxu1 %v555_v19  ;;  %v603_v18 = vld [vmem:[#allocation5 + $0xe08] sm:$0xff]  ;;  %v620_v19 = vld [vmem:[#allocation5 + $0xe90] sm:$0xff] }
  0xfa   :  { %2229 = vmatpush.msra.mxu2 %v570_v20  ;;  %2248 = vmatpush.msra.mxu3 %v587_v21  ;;  %v635_v20 = vld [vmem:[#allocation5 + $0xf08] sm:$0xff]  ;;  %v652_v21 = vld [vmem:[#allocation5 + $0xf90] sm:$0xff] }
  0xfb   :  { %2190 = vmatmul.f32.vlgmr.msra.gmra.mxu0 %v82_v22  ;;  %2230 = vmatmul.f32.vlgmr.msra.gmra.mxu2 %v84_v23  ;;  %v602_v22 = vld [vmem:[#allocation5 + $0xe00] sm:$0xff]  ;;  %v619_v23 = vld [vmem:[#allocation5 + $0xe88] sm:$0xff] }
  0xfc   :  { %2254 = vmatpush.msrb.mxu0 %v617_v24  ;;  %2294 = vmatpush.msrb.mxu2 %v649_v25  ;;  %v634_v24 = vld [vmem:[#allocation5 + $0xf00] sm:$0xff]  ;;  %v651_v25 = vld [vmem:[#allocation5 + $0xf88] sm:$0xff] }
  0xfd   :  { %2209 = vmatpush.msra.mxu1 %v554_v26  ;;  %2249 = vmatpush.msra.mxu3 %v586_v27  ;;  %v86_v26 = vld [vmem:[#allocation2 + $0xe0] sm:$0xff]  ;;  %v88_v27 = vld [vmem:[#allocation2 + $0xf0] sm:$0xff] }
  0xfe   :  { %2210 = vmatmul.f32.vlgmr.msra.gmra.mxu1 %v83_v28  ;;  %2250 = vmatmul.f32.vlgmr.msra.gmra.mxu3 %v85_v29  ;;  %v681_v28 = vld [vmem:[#allocation5 + $0x1078] sm:$0xff] }
  0xff   :  { %2255 = vmatpush.msrb.mxu0 %v616_v30  ;;  %2274 = vmatpush.msrb.mxu1 %v633_v31  ;;  %v713_v29 = vld [vmem:[#allocation5 + $0x1178] sm:$0xff]  ;;  %v618_v30 = vld [vmem:[#allocation5 + $0xe80] sm:$0xff] }
 0x100   :  { %2295 = vmatpush.msrb.mxu2 %v648_v32  ;;  %2314 = vmatpush.msrb.mxu3 %v665_v33  ;;  %v650_v31 = vld [vmem:[#allocation5 + $0xf80] sm:$0xff]  ;;  %v87_v32 = vld [vmem:[#allocation2 + $0xe8] sm:$0xff]  ;;  %v89_v33 = vld [vmem:[#allocation2 + $0xf8] sm:$0xff] }
 0x101   :  { %2256 = vmatpush.msrb.mxu0 %v615_v34  ;;  %2275 = vmatpush.msrb.mxu1 %v632_v35  ;;  %v680_v34 = vld [vmem:[#allocation5 + $0x1070] sm:$0xff]  ;;  %v697_v35 = vld [vmem:[#allocation5 + $0x10f8] sm:$0xff] }
 0x102   :  { %2296 = vmatpush.msrb.mxu2 %v647_v36  ;;  %2315 = vmatpush.msrb.mxu3 %v664_v37  ;;  %v712_v36 = vld [vmem:[#allocation5 + $0x1170] sm:$0xff]  ;;  %v729_v37 = vld [vmem:[#allocation5 + $0x11f8] sm:$0xff] }
 0x103   :  { %2257 = vmatpush.msrb.mxu0 %v614_v38  ;;  %2276 = vmatpush.msrb.mxu1 %v631_v39  ;;  %v679_v38 = vld [vmem:[#allocation5 + $0x1068] sm:$0xff]  ;;  %v696_v39 = vld [vmem:[#allocation5 + $0x10f0] sm:$0xff] }
 0x104   :  { %2297 = vmatpush.msrb.mxu2 %v646_v40  ;;  %2316 = vmatpush.msrb.mxu3 %v663_v41  ;;  %v711_v40 = vld [vmem:[#allocation5 + $0x1168] sm:$0xff]  ;;  %v728_v41 = vld [vmem:[#allocation5 + $0x11f0] sm:$0xff] }
 0x105   :  { %2258 = vmatpush.msrb.mxu0 %v613_v42  ;;  %2277 = vmatpush.msrb.mxu1 %v630_v43  ;;  %v678_v42 = vld [vmem:[#allocation5 + $0x1060] sm:$0xff]  ;;  %v695_v43 = vld [vmem:[#allocation5 + $0x10e8] sm:$0xff] }
 0x106   :  { %2298 = vmatpush.msrb.mxu2 %v645_v44  ;;  %2317 = vmatpush.msrb.mxu3 %v662_v45  ;;  %v710_v44 = vld [vmem:[#allocation5 + $0x1160] sm:$0xff]  ;;  %v727_v45 = vld [vmem:[#allocation5 + $0x11e8] sm:$0xff] }
 0x107   :  { %2259 = vmatpush.msrb.mxu0 %v612_v46  ;;  %2278 = vmatpush.msrb.mxu1 %v629_v47  ;;  %v677_v46 = vld [vmem:[#allocation5 + $0x1058] sm:$0xff]  ;;  %v694_v47 = vld [vmem:[#allocation5 + $0x10e0] sm:$0xff] }
 0x108   :  { %2299 = vmatpush.msrb.mxu2 %v644_v48  ;;  %2318 = vmatpush.msrb.mxu3 %v661_v49  ;;  %v709_v48 = vld [vmem:[#allocation5 + $0x1158] sm:$0xff]  ;;  %v726_v49 = vld [vmem:[#allocation5 + $0x11e0] sm:$0xff] }
 0x109   :  { %2260 = vmatpush.msrb.mxu0 %v611_v50  ;;  %2279 = vmatpush.msrb.mxu1 %v628_v51  ;;  %v676_v50 = vld [vmem:[#allocation5 + $0x1050] sm:$0xff]  ;;  %v693_v51 = vld [vmem:[#allocation5 + $0x10d8] sm:$0xff] }
 0x10a   :  { %2300 = vmatpush.msrb.mxu2 %v643_v52  ;;  %2319 = vmatpush.msrb.mxu3 %v660_v53  ;;  %v708_v52 = vld [vmem:[#allocation5 + $0x1150] sm:$0xff]  ;;  %v725_v53 = vld [vmem:[#allocation5 + $0x11d8] sm:$0xff] }
 0x10b   :  { %2261 = vmatpush.msrb.mxu0 %v610_v54  ;;  %2280 = vmatpush.msrb.mxu1 %v627_v55  ;;  %v675_v54 = vld [vmem:[#allocation5 + $0x1048] sm:$0xff]  ;;  %v692_v55 = vld [vmem:[#allocation5 + $0x10d0] sm:$0xff] }
 0x10c   :  { %2301 = vmatpush.msrb.mxu2 %v642_v56  ;;  %2320 = vmatpush.msrb.mxu3 %v659_v57  ;;  %v707_v56 = vld [vmem:[#allocation5 + $0x1148] sm:$0xff]  ;;  %v724_v57 = vld [vmem:[#allocation5 + $0x11d0] sm:$0xff] }
 0x10d   :  { %2262 = vmatpush.msrb.mxu0 %v609_v58  ;;  %2281 = vmatpush.msrb.mxu1 %v626_v59  ;;  %v674_v58 = vld [vmem:[#allocation5 + $0x1040] sm:$0xff]  ;;  %v691_v59 = vld [vmem:[#allocation5 + $0x10c8] sm:$0xff] }
 0x10e   :  { %2302 = vmatpush.msrb.mxu2 %v641_v60  ;;  %2321 = vmatpush.msrb.mxu3 %v658_v61  ;;  %v706_v60 = vld [vmem:[#allocation5 + $0x1140] sm:$0xff]  ;;  %v723_v61 = vld [vmem:[#allocation5 + $0x11c8] sm:$0xff] }
 0x10f   :  { %2263 = vmatpush.msrb.mxu0 %v608_v62  ;;  %2282 = vmatpush.msrb.mxu1 %v625_v63  ;;  %v673_v62 = vld [vmem:[#allocation5 + $0x1038] sm:$0xff]  ;;  %v690_v63 = vld [vmem:[#allocation5 + $0x10c0] sm:$0xff] }
 0x110   :  { %2303 = vmatpush.msrb.mxu2 %v640_v0  ;;  %2322 = vmatpush.msrb.mxu3 %v657_v1  ;;  %v705_v0 = vld [vmem:[#allocation5 + $0x1138] sm:$0xff]  ;;  %v722_v1 = vld [vmem:[#allocation5 + $0x11c0] sm:$0xff] }
 0x111   :  { %2264 = vmatpush.msrb.mxu0 %v607_v2  ;;  %2283 = vmatpush.msrb.mxu1 %v624_v3  ;;  %v672_v2 = vld [vmem:[#allocation5 + $0x1030] sm:$0xff]  ;;  %v689_v3 = vld [vmem:[#allocation5 + $0x10b8] sm:$0xff] }
 0x112   :  { %2304 = vmatpush.msrb.mxu2 %v639_v4  ;;  %2323 = vmatpush.msrb.mxu3 %v656_v5  ;;  %v704_v4 = vld [vmem:[#allocation5 + $0x1130] sm:$0xff]  ;;  %v721_v5 = vld [vmem:[#allocation5 + $0x11b8] sm:$0xff] }
 0x113   :  { %2265 = vmatpush.msrb.mxu0 %v606_v6  ;;  %2284 = vmatpush.msrb.mxu1 %v623_v7  ;;  %v671_v6 = vld [vmem:[#allocation5 + $0x1028] sm:$0xff]  ;;  %v688_v7 = vld [vmem:[#allocation5 + $0x10b0] sm:$0xff] }
 0x114   :  { %2305 = vmatpush.msrb.mxu2 %v638_v8  ;;  %2324 = vmatpush.msrb.mxu3 %v655_v9  ;;  %v703_v8 = vld [vmem:[#allocation5 + $0x1128] sm:$0xff]  ;;  %v720_v9 = vld [vmem:[#allocation5 + $0x11b0] sm:$0xff] }
 0x115   :  { %2266 = vmatpush.msrb.mxu0 %v605_v10  ;;  %2285 = vmatpush.msrb.mxu1 %v622_v11  ;;  %v670_v10 = vld [vmem:[#allocation5 + $0x1020] sm:$0xff]  ;;  %v687_v11 = vld [vmem:[#allocation5 + $0x10a8] sm:$0xff] }
 0x116   :  { %2306 = vmatpush.msrb.mxu2 %v637_v12  ;;  %2325 = vmatpush.msrb.mxu3 %v654_v13  ;;  %v702_v12 = vld [vmem:[#allocation5 + $0x1120] sm:$0xff]  ;;  %v719_v13 = vld [vmem:[#allocation5 + $0x11a8] sm:$0xff] }
 0x117   :  { %2267 = vmatpush.msrb.mxu0 %v604_v14  ;;  %2286 = vmatpush.msrb.mxu1 %v621_v15  ;;  %v669_v14 = vld [vmem:[#allocation5 + $0x1018] sm:$0xff]  ;;  %v686_v15 = vld [vmem:[#allocation5 + $0x10a0] sm:$0xff] }
 0x118   :  { %2307 = vmatpush.msrb.mxu2 %v636_v16  ;;  %2326 = vmatpush.msrb.mxu3 %v653_v17  ;;  %v701_v16 = vld [vmem:[#allocation5 + $0x1118] sm:$0xff]  ;;  %v718_v17 = vld [vmem:[#allocation5 + $0x11a0] sm:$0xff] }
 0x119   :  { %2268 = vmatpush.msrb.mxu0 %v603_v18  ;;  %2287 = vmatpush.msrb.mxu1 %v620_v19  ;;  %v668_v18 = vld [vmem:[#allocation5 + $0x1010] sm:$0xff]  ;;  %v685_v19 = vld [vmem:[#allocation5 + $0x1098] sm:$0xff] }
 0x11a   :  { %2308 = vmatpush.msrb.mxu2 %v635_v20  ;;  %2327 = vmatpush.msrb.mxu3 %v652_v21  ;;  %v700_v20 = vld [vmem:[#allocation5 + $0x1110] sm:$0xff]  ;;  %v717_v21 = vld [vmem:[#allocation5 + $0x1198] sm:$0xff] }
 0x11b   :  { %2269 = vmatpush.msrb.mxu0 %v602_v22  ;;  %2288 = vmatpush.msrb.mxu1 %v619_v23  ;;  %v667_v22 = vld [vmem:[#allocation5 + $0x1008] sm:$0xff]  ;;  %v684_v23 = vld [vmem:[#allocation5 + $0x1090] sm:$0xff] }
 0x11c   :  { %2309 = vmatpush.msrb.mxu2 %v634_v24  ;;  %2328 = vmatpush.msrb.mxu3 %v651_v25  ;;  %v699_v24 = vld [vmem:[#allocation5 + $0x1108] sm:$0xff]  ;;  %v716_v25 = vld [vmem:[#allocation5 + $0x1190] sm:$0xff] }
 0x11d   :  { %2270 = vmatmul.f32.vlgmr.msrb.gmra.mxu0 %v86_v26  ;;  %2310 = vmatmul.f32.vlgmr.msrb.gmra.mxu2 %v88_v27  ;;  %v666_v26 = vld [vmem:[#allocation5 + $0x1000] sm:$0xff]  ;;  %v683_v27 = vld [vmem:[#allocation5 + $0x1088] sm:$0xff] }
 0x11e   :  { %2334 = vmatpush.msra.mxu0 %v681_v28  ;;  %2374 = vmatpush.msra.mxu2 %v713_v29  ;;  %v698_v28 = vld [vmem:[#allocation5 + $0x1100] sm:$0xff]  ;;  %v715_v29 = vld [vmem:[#allocation5 + $0x1188] sm:$0xff] }
 0x11f   :  { %2289 = vmatpush.msrb.mxu1 %v618_v30  ;;  %2329 = vmatpush.msrb.mxu3 %v650_v31  ;;  %v90_v30 = vld [vmem:[#allocation2 + $0x100] sm:$0xff]  ;;  %v92_v31 = vld [vmem:[#allocation2 + $0x110] sm:$0xff] }
 0x120   :  { %2290 = vmatmul.f32.vlgmr.msrb.gmra.mxu1 %v87_v32  ;;  %2330 = vmatmul.f32.vlgmr.msrb.gmra.mxu3 %v89_v33  ;;  %v745_v32 = vld [vmem:[#allocation5 + $0x1278] sm:$0xff] }
 0x121   :  { %2335 = vmatpush.msra.mxu0 %v680_v34  ;;  %2354 = vmatpush.msra.mxu1 %v697_v35  ;;  %v777_v33 = vld [vmem:[#allocation5 + $0x1378] sm:$0xff]  ;;  %v682_v34 = vld [vmem:[#allocation5 + $0x1080] sm:$0xff] }
 0x122   :  { %2375 = vmatpush.msra.mxu2 %v712_v36  ;;  %2394 = vmatpush.msra.mxu3 %v729_v37  ;;  %v714_v35 = vld [vmem:[#allocation5 + $0x1180] sm:$0xff]  ;;  %v91_v36 = vld [vmem:[#allocation2 + $0x108] sm:$0xff]  ;;  %v93_v37 = vld [vmem:[#allocation2 + $0x118] sm:$0xff] }
 0x123   :  { %2336 = vmatpush.msra.mxu0 %v679_v38  ;;  %2355 = vmatpush.msra.mxu1 %v696_v39  ;;  %v744_v38 = vld [vmem:[#allocation5 + $0x1270] sm:$0xff]  ;;  %v761_v39 = vld [vmem:[#allocation5 + $0x12f8] sm:$0xff] }
 0x124   :  { %2376 = vmatpush.msra.mxu2 %v711_v40  ;;  %2395 = vmatpush.msra.mxu3 %v728_v41  ;;  %v776_v40 = vld [vmem:[#allocation5 + $0x1370] sm:$0xff]  ;;  %v793_v41 = vld [vmem:[#allocation5 + $0x13f8] sm:$0xff] }
 0x125   :  { %2337 = vmatpush.msra.mxu0 %v678_v42  ;;  %2356 = vmatpush.msra.mxu1 %v695_v43  ;;  %v743_v42 = vld [vmem:[#allocation5 + $0x1268] sm:$0xff]  ;;  %v760_v43 = vld [vmem:[#allocation5 + $0x12f0] sm:$0xff] }
 0x126   :  { %2377 = vmatpush.msra.mxu2 %v710_v44  ;;  %2396 = vmatpush.msra.mxu3 %v727_v45  ;;  %v775_v44 = vld [vmem:[#allocation5 + $0x1368] sm:$0xff]  ;;  %v792_v45 = vld [vmem:[#allocation5 + $0x13f0] sm:$0xff] }
 0x127   :  { %2338 = vmatpush.msra.mxu0 %v677_v46  ;;  %2357 = vmatpush.msra.mxu1 %v694_v47  ;;  %v742_v46 = vld [vmem:[#allocation5 + $0x1260] sm:$0xff]  ;;  %v759_v47 = vld [vmem:[#allocation5 + $0x12e8] sm:$0xff] }
 0x128   :  { %2378 = vmatpush.msra.mxu2 %v709_v48  ;;  %2397 = vmatpush.msra.mxu3 %v726_v49  ;;  %v774_v48 = vld [vmem:[#allocation5 + $0x1360] sm:$0xff]  ;;  %v791_v49 = vld [vmem:[#allocation5 + $0x13e8] sm:$0xff] }
 0x129   :  { %2339 = vmatpush.msra.mxu0 %v676_v50  ;;  %2358 = vmatpush.msra.mxu1 %v693_v51  ;;  %v741_v50 = vld [vmem:[#allocation5 + $0x1258] sm:$0xff]  ;;  %v758_v51 = vld [vmem:[#allocation5 + $0x12e0] sm:$0xff] }
 0x12a   :  { %2379 = vmatpush.msra.mxu2 %v708_v52  ;;  %2398 = vmatpush.msra.mxu3 %v725_v53  ;;  %v773_v52 = vld [vmem:[#allocation5 + $0x1358] sm:$0xff]  ;;  %v790_v53 = vld [vmem:[#allocation5 + $0x13e0] sm:$0xff] }
 0x12b   :  { %2340 = vmatpush.msra.mxu0 %v675_v54  ;;  %2359 = vmatpush.msra.mxu1 %v692_v55  ;;  %v740_v54 = vld [vmem:[#allocation5 + $0x1250] sm:$0xff]  ;;  %v757_v55 = vld [vmem:[#allocation5 + $0x12d8] sm:$0xff] }
 0x12c   :  { %2380 = vmatpush.msra.mxu2 %v707_v56  ;;  %2399 = vmatpush.msra.mxu3 %v724_v57  ;;  %v772_v56 = vld [vmem:[#allocation5 + $0x1350] sm:$0xff]  ;;  %v789_v57 = vld [vmem:[#allocation5 + $0x13d8] sm:$0xff] }
 0x12d   :  { %2341 = vmatpush.msra.mxu0 %v674_v58  ;;  %2360 = vmatpush.msra.mxu1 %v691_v59  ;;  %v739_v58 = vld [vmem:[#allocation5 + $0x1248] sm:$0xff]  ;;  %v756_v59 = vld [vmem:[#allocation5 + $0x12d0] sm:$0xff] }
 0x12e   :  { %2381 = vmatpush.msra.mxu2 %v706_v60  ;;  %2400 = vmatpush.msra.mxu3 %v723_v61  ;;  %v771_v60 = vld [vmem:[#allocation5 + $0x1348] sm:$0xff]  ;;  %v788_v61 = vld [vmem:[#allocation5 + $0x13d0] sm:$0xff] }
 0x12f   :  { %2342 = vmatpush.msra.mxu0 %v673_v62  ;;  %2361 = vmatpush.msra.mxu1 %v690_v63  ;;  %v738_v62 = vld [vmem:[#allocation5 + $0x1240] sm:$0xff]  ;;  %v755_v63 = vld [vmem:[#allocation5 + $0x12c8] sm:$0xff] }
 0x130   :  { %2382 = vmatpush.msra.mxu2 %v705_v0  ;;  %2401 = vmatpush.msra.mxu3 %v722_v1  ;;  %v770_v0 = vld [vmem:[#allocation5 + $0x1340] sm:$0xff]  ;;  %v787_v1 = vld [vmem:[#allocation5 + $0x13c8] sm:$0xff] }
 0x131   :  { %2343 = vmatpush.msra.mxu0 %v672_v2  ;;  %2362 = vmatpush.msra.mxu1 %v689_v3  ;;  %v737_v2 = vld [vmem:[#allocation5 + $0x1238] sm:$0xff]  ;;  %v754_v3 = vld [vmem:[#allocation5 + $0x12c0] sm:$0xff] }
 0x132   :  { %2383 = vmatpush.msra.mxu2 %v704_v4  ;;  %2402 = vmatpush.msra.mxu3 %v721_v5  ;;  %v769_v4 = vld [vmem:[#allocation5 + $0x1338] sm:$0xff]  ;;  %v786_v5 = vld [vmem:[#allocation5 + $0x13c0] sm:$0xff] }
 0x133   :  { %2344 = vmatpush.msra.mxu0 %v671_v6  ;;  %2363 = vmatpush.msra.mxu1 %v688_v7  ;;  %v736_v6 = vld [vmem:[#allocation5 + $0x1230] sm:$0xff]  ;;  %v753_v7 = vld [vmem:[#allocation5 + $0x12b8] sm:$0xff] }
 0x134   :  { %2384 = vmatpush.msra.mxu2 %v703_v8  ;;  %2403 = vmatpush.msra.mxu3 %v720_v9  ;;  %v768_v8 = vld [vmem:[#allocation5 + $0x1330] sm:$0xff]  ;;  %v785_v9 = vld [vmem:[#allocation5 + $0x13b8] sm:$0xff] }
 0x135   :  { %2345 = vmatpush.msra.mxu0 %v670_v10  ;;  %2364 = vmatpush.msra.mxu1 %v687_v11  ;;  %v735_v10 = vld [vmem:[#allocation5 + $0x1228] sm:$0xff]  ;;  %v752_v11 = vld [vmem:[#allocation5 + $0x12b0] sm:$0xff] }
 0x136   :  { %2385 = vmatpush.msra.mxu2 %v702_v12  ;;  %2404 = vmatpush.msra.mxu3 %v719_v13  ;;  %v767_v12 = vld [vmem:[#allocation5 + $0x1328] sm:$0xff]  ;;  %v784_v13 = vld [vmem:[#allocation5 + $0x13b0] sm:$0xff] }
 0x137   :  { %2346 = vmatpush.msra.mxu0 %v669_v14  ;;  %2365 = vmatpush.msra.mxu1 %v686_v15  ;;  %v734_v14 = vld [vmem:[#allocation5 + $0x1220] sm:$0xff]  ;;  %v751_v15 = vld [vmem:[#allocation5 + $0x12a8] sm:$0xff] }
 0x138   :  { %2386 = vmatpush.msra.mxu2 %v701_v16  ;;  %2405 = vmatpush.msra.mxu3 %v718_v17  ;;  %v766_v16 = vld [vmem:[#allocation5 + $0x1320] sm:$0xff]  ;;  %v783_v17 = vld [vmem:[#allocation5 + $0x13a8] sm:$0xff] }
 0x139   :  { %2347 = vmatpush.msra.mxu0 %v668_v18  ;;  %2366 = vmatpush.msra.mxu1 %v685_v19  ;;  %v733_v18 = vld [vmem:[#allocation5 + $0x1218] sm:$0xff]  ;;  %v750_v19 = vld [vmem:[#allocation5 + $0x12a0] sm:$0xff] }
 0x13a   :  { %2387 = vmatpush.msra.mxu2 %v700_v20  ;;  %2406 = vmatpush.msra.mxu3 %v717_v21  ;;  %v765_v20 = vld [vmem:[#allocation5 + $0x1318] sm:$0xff]  ;;  %v782_v21 = vld [vmem:[#allocation5 + $0x13a0] sm:$0xff] }
 0x13b   :  { %2348 = vmatpush.msra.mxu0 %v667_v22  ;;  %2367 = vmatpush.msra.mxu1 %v684_v23  ;;  %v732_v22 = vld [vmem:[#allocation5 + $0x1210] sm:$0xff]  ;;  %v749_v23 = vld [vmem:[#allocation5 + $0x1298] sm:$0xff] }
 0x13c   :  { %2388 = vmatpush.msra.mxu2 %v699_v24  ;;  %2407 = vmatpush.msra.mxu3 %v716_v25  ;;  %v764_v24 = vld [vmem:[#allocation5 + $0x1310] sm:$0xff]  ;;  %v781_v25 = vld [vmem:[#allocation5 + $0x1398] sm:$0xff] }
 0x13d   :  { %2349 = vmatpush.msra.mxu0 %v666_v26  ;;  %2368 = vmatpush.msra.mxu1 %v683_v27  ;;  %v731_v26 = vld [vmem:[#allocation5 + $0x1208] sm:$0xff]  ;;  %v748_v27 = vld [vmem:[#allocation5 + $0x1290] sm:$0xff] }
 0x13e   :  { %2389 = vmatpush.msra.mxu2 %v698_v28  ;;  %2408 = vmatpush.msra.mxu3 %v715_v29  ;;  %v763_v28 = vld [vmem:[#allocation5 + $0x1308] sm:$0xff]  ;;  %v780_v29 = vld [vmem:[#allocation5 + $0x1390] sm:$0xff] }
 0x13f   :  { %2350 = vmatmul.f32.vlgmr.msra.gmra.mxu0 %v90_v30  ;;  %2390 = vmatmul.f32.vlgmr.msra.gmra.mxu2 %v92_v31  ;;  %v730_v30 = vld [vmem:[#allocation5 + $0x1200] sm:$0xff]  ;;  %v747_v31 = vld [vmem:[#allocation5 + $0x1288] sm:$0xff] }
 0x140   :  { %2414 = vmatpush.msrb.mxu0 %v745_v32  ;;  %2454 = vmatpush.msrb.mxu2 %v777_v33  ;;  %v762_v32 = vld [vmem:[#allocation5 + $0x1300] sm:$0xff]  ;;  %v779_v33 = vld [vmem:[#allocation5 + $0x1388] sm:$0xff] }
 0x141   :  { %2369 = vmatpush.msra.mxu1 %v682_v34  ;;  %2409 = vmatpush.msra.mxu3 %v714_v35  ;;  %v94_v34 = vld [vmem:[#allocation2 + $0x120] sm:$0xff]  ;;  %v96_v35 = vld [vmem:[#allocation2 + $0x130] sm:$0xff] }
 0x142   :  { %2370 = vmatmul.f32.vlgmr.msra.gmra.mxu1 %v91_v36  ;;  %2410 = vmatmul.f32.vlgmr.msra.gmra.mxu3 %v93_v37  ;;  %v809_v36 = vld [vmem:[#allocation5 + $0x1478] sm:$0xff] }
 0x143   :  { %2415 = vmatpush.msrb.mxu0 %v744_v38  ;;  %2434 = vmatpush.msrb.mxu1 %v761_v39  ;;  %v841_v37 = vld [vmem:[#allocation5 + $0x1578] sm:$0xff]  ;;  %v746_v38 = vld [vmem:[#allocation5 + $0x1280] sm:$0xff] }
 0x144   :  { %2455 = vmatpush.msrb.mxu2 %v776_v40  ;;  %2474 = vmatpush.msrb.mxu3 %v793_v41  ;;  %v778_v39 = vld [vmem:[#allocation5 + $0x1380] sm:$0xff]  ;;  %v95_v40 = vld [vmem:[#allocation2 + $0x128] sm:$0xff]  ;;  %v97_v41 = vld [vmem:[#allocation2 + $0x138] sm:$0xff] }
 0x145   :  { %2416 = vmatpush.msrb.mxu0 %v743_v42  ;;  %2435 = vmatpush.msrb.mxu1 %v760_v43  ;;  %v808_v42 = vld [vmem:[#allocation5 + $0x1470] sm:$0xff]  ;;  %v825_v43 = vld [vmem:[#allocation5 + $0x14f8] sm:$0xff] }
 0x146   :  { %2456 = vmatpush.msrb.mxu2 %v775_v44  ;;  %2475 = vmatpush.msrb.mxu3 %v792_v45  ;;  %v840_v44 = vld [vmem:[#allocation5 + $0x1570] sm:$0xff]  ;;  %v857_v45 = vld [vmem:[#allocation5 + $0x15f8] sm:$0xff] }
 0x147   :  { %2417 = vmatpush.msrb.mxu0 %v742_v46  ;;  %2436 = vmatpush.msrb.mxu1 %v759_v47  ;;  %v807_v46 = vld [vmem:[#allocation5 + $0x1468] sm:$0xff]  ;;  %v824_v47 = vld [vmem:[#allocation5 + $0x14f0] sm:$0xff] }
 0x148   :  { %2457 = vmatpush.msrb.mxu2 %v774_v48  ;;  %2476 = vmatpush.msrb.mxu3 %v791_v49  ;;  %v839_v48 = vld [vmem:[#allocation5 + $0x1568] sm:$0xff]  ;;  %v856_v49 = vld [vmem:[#allocation5 + $0x15f0] sm:$0xff] }
 0x149   :  { %2418 = vmatpush.msrb.mxu0 %v741_v50  ;;  %2437 = vmatpush.msrb.mxu1 %v758_v51  ;;  %v806_v50 = vld [vmem:[#allocation5 + $0x1460] sm:$0xff]  ;;  %v823_v51 = vld [vmem:[#allocation5 + $0x14e8] sm:$0xff] }
 0x14a   :  { %2458 = vmatpush.msrb.mxu2 %v773_v52  ;;  %2477 = vmatpush.msrb.mxu3 %v790_v53  ;;  %v838_v52 = vld [vmem:[#allocation5 + $0x1560] sm:$0xff]  ;;  %v855_v53 = vld [vmem:[#allocation5 + $0x15e8] sm:$0xff] }
 0x14b   :  { %2419 = vmatpush.msrb.mxu0 %v740_v54  ;;  %2438 = vmatpush.msrb.mxu1 %v757_v55  ;;  %v805_v54 = vld [vmem:[#allocation5 + $0x1458] sm:$0xff]  ;;  %v822_v55 = vld [vmem:[#allocation5 + $0x14e0] sm:$0xff] }
 0x14c   :  { %2459 = vmatpush.msrb.mxu2 %v772_v56  ;;  %2478 = vmatpush.msrb.mxu3 %v789_v57  ;;  %v837_v56 = vld [vmem:[#allocation5 + $0x1558] sm:$0xff]  ;;  %v854_v57 = vld [vmem:[#allocation5 + $0x15e0] sm:$0xff] }
 0x14d   :  { %2420 = vmatpush.msrb.mxu0 %v739_v58  ;;  %2439 = vmatpush.msrb.mxu1 %v756_v59  ;;  %v804_v58 = vld [vmem:[#allocation5 + $0x1450] sm:$0xff]  ;;  %v821_v59 = vld [vmem:[#allocation5 + $0x14d8] sm:$0xff] }
 0x14e   :  { %2460 = vmatpush.msrb.mxu2 %v771_v60  ;;  %2479 = vmatpush.msrb.mxu3 %v788_v61  ;;  %v836_v60 = vld [vmem:[#allocation5 + $0x1550] sm:$0xff]  ;;  %v853_v61 = vld [vmem:[#allocation5 + $0x15d8] sm:$0xff] }
 0x14f   :  { %2421 = vmatpush.msrb.mxu0 %v738_v62  ;;  %2440 = vmatpush.msrb.mxu1 %v755_v63  ;;  %v803_v62 = vld [vmem:[#allocation5 + $0x1448] sm:$0xff]  ;;  %v820_v63 = vld [vmem:[#allocation5 + $0x14d0] sm:$0xff] }
 0x150   :  { %2461 = vmatpush.msrb.mxu2 %v770_v0  ;;  %2480 = vmatpush.msrb.mxu3 %v787_v1  ;;  %v835_v0 = vld [vmem:[#allocation5 + $0x1548] sm:$0xff]  ;;  %v852_v1 = vld [vmem:[#allocation5 + $0x15d0] sm:$0xff] }
 0x151   :  { %2422 = vmatpush.msrb.mxu0 %v737_v2  ;;  %2441 = vmatpush.msrb.mxu1 %v754_v3  ;;  %v802_v2 = vld [vmem:[#allocation5 + $0x1440] sm:$0xff]  ;;  %v819_v3 = vld [vmem:[#allocation5 + $0x14c8] sm:$0xff] }
 0x152   :  { %2462 = vmatpush.msrb.mxu2 %v769_v4  ;;  %2481 = vmatpush.msrb.mxu3 %v786_v5  ;;  %v834_v4 = vld [vmem:[#allocation5 + $0x1540] sm:$0xff]  ;;  %v851_v5 = vld [vmem:[#allocation5 + $0x15c8] sm:$0xff] }
 0x153   :  { %2423 = vmatpush.msrb.mxu0 %v736_v6  ;;  %2442 = vmatpush.msrb.mxu1 %v753_v7  ;;  %v801_v6 = vld [vmem:[#allocation5 + $0x1438] sm:$0xff]  ;;  %v818_v7 = vld [vmem:[#allocation5 + $0x14c0] sm:$0xff] }
 0x154   :  { %2463 = vmatpush.msrb.mxu2 %v768_v8  ;;  %2482 = vmatpush.msrb.mxu3 %v785_v9  ;;  %v833_v8 = vld [vmem:[#allocation5 + $0x1538] sm:$0xff]  ;;  %v850_v9 = vld [vmem:[#allocation5 + $0x15c0] sm:$0xff] }
 0x155   :  { %2424 = vmatpush.msrb.mxu0 %v735_v10  ;;  %2443 = vmatpush.msrb.mxu1 %v752_v11  ;;  %v800_v10 = vld [vmem:[#allocation5 + $0x1430] sm:$0xff]  ;;  %v817_v11 = vld [vmem:[#allocation5 + $0x14b8] sm:$0xff] }
 0x156   :  { %2464 = vmatpush.msrb.mxu2 %v767_v12  ;;  %2483 = vmatpush.msrb.mxu3 %v784_v13  ;;  %v832_v12 = vld [vmem:[#allocation5 + $0x1530] sm:$0xff]  ;;  %v849_v13 = vld [vmem:[#allocation5 + $0x15b8] sm:$0xff] }
 0x157   :  { %2425 = vmatpush.msrb.mxu0 %v734_v14  ;;  %2444 = vmatpush.msrb.mxu1 %v751_v15  ;;  %v799_v14 = vld [vmem:[#allocation5 + $0x1428] sm:$0xff]  ;;  %v816_v15 = vld [vmem:[#allocation5 + $0x14b0] sm:$0xff] }
 0x158   :  { %2465 = vmatpush.msrb.mxu2 %v766_v16  ;;  %2484 = vmatpush.msrb.mxu3 %v783_v17  ;;  %v831_v16 = vld [vmem:[#allocation5 + $0x1528] sm:$0xff]  ;;  %v848_v17 = vld [vmem:[#allocation5 + $0x15b0] sm:$0xff] }
 0x159   :  { %2426 = vmatpush.msrb.mxu0 %v733_v18  ;;  %2445 = vmatpush.msrb.mxu1 %v750_v19  ;;  %v798_v18 = vld [vmem:[#allocation5 + $0x1420] sm:$0xff]  ;;  %v815_v19 = vld [vmem:[#allocation5 + $0x14a8] sm:$0xff] }
 0x15a   :  { %2466 = vmatpush.msrb.mxu2 %v765_v20  ;;  %2485 = vmatpush.msrb.mxu3 %v782_v21  ;;  %v830_v20 = vld [vmem:[#allocation5 + $0x1520] sm:$0xff]  ;;  %v847_v21 = vld [vmem:[#allocation5 + $0x15a8] sm:$0xff] }
 0x15b   :  { %2427 = vmatpush.msrb.mxu0 %v732_v22  ;;  %2446 = vmatpush.msrb.mxu1 %v749_v23  ;;  %v797_v22 = vld [vmem:[#allocation5 + $0x1418] sm:$0xff]  ;;  %v814_v23 = vld [vmem:[#allocation5 + $0x14a0] sm:$0xff] }
 0x15c   :  { %2467 = vmatpush.msrb.mxu2 %v764_v24  ;;  %2486 = vmatpush.msrb.mxu3 %v781_v25  ;;  %v829_v24 = vld [vmem:[#allocation5 + $0x1518] sm:$0xff]  ;;  %v846_v25 = vld [vmem:[#allocation5 + $0x15a0] sm:$0xff] }
 0x15d   :  { %2428 = vmatpush.msrb.mxu0 %v731_v26  ;;  %2447 = vmatpush.msrb.mxu1 %v748_v27  ;;  %v796_v26 = vld [vmem:[#allocation5 + $0x1410] sm:$0xff]  ;;  %v813_v27 = vld [vmem:[#allocation5 + $0x1498] sm:$0xff] }
 0x15e   :  { %2468 = vmatpush.msrb.mxu2 %v763_v28  ;;  %2487 = vmatpush.msrb.mxu3 %v780_v29  ;;  %v828_v28 = vld [vmem:[#allocation5 + $0x1510] sm:$0xff]  ;;  %v845_v29 = vld [vmem:[#allocation5 + $0x1598] sm:$0xff] }
 0x15f   :  { %2429 = vmatpush.msrb.mxu0 %v730_v30  ;;  %2448 = vmatpush.msrb.mxu1 %v747_v31  ;;  %v795_v30 = vld [vmem:[#allocation5 + $0x1408] sm:$0xff]  ;;  %v812_v31 = vld [vmem:[#allocation5 + $0x1490] sm:$0xff] }
 0x160   :  { %2469 = vmatpush.msrb.mxu2 %v762_v32  ;;  %2488 = vmatpush.msrb.mxu3 %v779_v33  ;;  %v827_v32 = vld [vmem:[#allocation5 + $0x1508] sm:$0xff]  ;;  %v844_v33 = vld [vmem:[#allocation5 + $0x1590] sm:$0xff] }
 0x161   :  { %2430 = vmatmul.f32.vlgmr.msrb.gmra.mxu0 %v94_v34  ;;  %2470 = vmatmul.f32.vlgmr.msrb.gmra.mxu2 %v96_v35  ;;  %v794_v34 = vld [vmem:[#allocation5 + $0x1400] sm:$0xff]  ;;  %v811_v35 = vld [vmem:[#allocation5 + $0x1488] sm:$0xff] }
 0x162   :  { %2494 = vmatpush.msra.mxu0 %v809_v36  ;;  %2534 = vmatpush.msra.mxu2 %v841_v37  ;;  %v826_v36 = vld [vmem:[#allocation5 + $0x1500] sm:$0xff]  ;;  %v843_v37 = vld [vmem:[#allocation5 + $0x1588] sm:$0xff] }
 0x163   :  { %2449 = vmatpush.msrb.mxu1 %v746_v38  ;;  %2489 = vmatpush.msrb.mxu3 %v778_v39  ;;  %v98_v38 = vld [vmem:[#allocation2 + $0x140] sm:$0xff]  ;;  %v100_v39 = vld [vmem:[#allocation2 + $0x150] sm:$0xff] }
 0x164   :  { %2450 = vmatmul.f32.vlgmr.msrb.gmra.mxu1 %v95_v40  ;;  %2490 = vmatmul.f32.vlgmr.msrb.gmra.mxu3 %v97_v41  ;;  %v873_v40 = vld [vmem:[#allocation5 + $0x1678] sm:$0xff] }
 0x165   :  { %2495 = vmatpush.msra.mxu0 %v808_v42  ;;  %2514 = vmatpush.msra.mxu1 %v825_v43  ;;  %v905_v41 = vld [vmem:[#allocation5 + $0x1778] sm:$0xff]  ;;  %v810_v42 = vld [vmem:[#allocation5 + $0x1480] sm:$0xff] }
 0x166   :  { %2535 = vmatpush.msra.mxu2 %v840_v44  ;;  %2554 = vmatpush.msra.mxu3 %v857_v45  ;;  %v842_v43 = vld [vmem:[#allocation5 + $0x1580] sm:$0xff]  ;;  %v99_v44 = vld [vmem:[#allocation2 + $0x148] sm:$0xff]  ;;  %v101_v45 = vld [vmem:[#allocation2 + $0x158] sm:$0xff] }
 0x167   :  { %2496 = vmatpush.msra.mxu0 %v807_v46  ;;  %2515 = vmatpush.msra.mxu1 %v824_v47  ;;  %v872_v46 = vld [vmem:[#allocation5 + $0x1670] sm:$0xff]  ;;  %v889_v47 = vld [vmem:[#allocation5 + $0x16f8] sm:$0xff] }
 0x168   :  { %2536 = vmatpush.msra.mxu2 %v839_v48  ;;  %2555 = vmatpush.msra.mxu3 %v856_v49  ;;  %v904_v48 = vld [vmem:[#allocation5 + $0x1770] sm:$0xff]  ;;  %v921_v49 = vld [vmem:[#allocation5 + $0x17f8] sm:$0xff] }
 0x169   :  { %2497 = vmatpush.msra.mxu0 %v806_v50  ;;  %2516 = vmatpush.msra.mxu1 %v823_v51  ;;  %v871_v50 = vld [vmem:[#allocation5 + $0x1668] sm:$0xff]  ;;  %v888_v51 = vld [vmem:[#allocation5 + $0x16f0] sm:$0xff] }
 0x16a   :  { %2537 = vmatpush.msra.mxu2 %v838_v52  ;;  %2556 = vmatpush.msra.mxu3 %v855_v53  ;;  %v903_v52 = vld [vmem:[#allocation5 + $0x1768] sm:$0xff]  ;;  %v920_v53 = vld [vmem:[#allocation5 + $0x17f0] sm:$0xff] }
 0x16b   :  { %2498 = vmatpush.msra.mxu0 %v805_v54  ;;  %2517 = vmatpush.msra.mxu1 %v822_v55  ;;  %v870_v54 = vld [vmem:[#allocation5 + $0x1660] sm:$0xff]  ;;  %v887_v55 = vld [vmem:[#allocation5 + $0x16e8] sm:$0xff] }
 0x16c   :  { %2538 = vmatpush.msra.mxu2 %v837_v56  ;;  %2557 = vmatpush.msra.mxu3 %v854_v57  ;;  %v902_v56 = vld [vmem:[#allocation5 + $0x1760] sm:$0xff]  ;;  %v919_v57 = vld [vmem:[#allocation5 + $0x17e8] sm:$0xff] }
 0x16d   :  { %2499 = vmatpush.msra.mxu0 %v804_v58  ;;  %2518 = vmatpush.msra.mxu1 %v821_v59  ;;  %v869_v58 = vld [vmem:[#allocation5 + $0x1658] sm:$0xff]  ;;  %v886_v59 = vld [vmem:[#allocation5 + $0x16e0] sm:$0xff] }
 0x16e   :  { %2539 = vmatpush.msra.mxu2 %v836_v60  ;;  %2558 = vmatpush.msra.mxu3 %v853_v61  ;;  %v901_v60 = vld [vmem:[#allocation5 + $0x1758] sm:$0xff]  ;;  %v918_v61 = vld [vmem:[#allocation5 + $0x17e0] sm:$0xff] }
 0x16f   :  { %2500 = vmatpush.msra.mxu0 %v803_v62  ;;  %2519 = vmatpush.msra.mxu1 %v820_v63  ;;  %v868_v62 = vld [vmem:[#allocation5 + $0x1650] sm:$0xff]  ;;  %v885_v63 = vld [vmem:[#allocation5 + $0x16d8] sm:$0xff] }
 0x170   :  { %2540 = vmatpush.msra.mxu2 %v835_v0  ;;  %2559 = vmatpush.msra.mxu3 %v852_v1  ;;  %v900_v0 = vld [vmem:[#allocation5 + $0x1750] sm:$0xff]  ;;  %v917_v1 = vld [vmem:[#allocation5 + $0x17d8] sm:$0xff] }
 0x171   :  { %2501 = vmatpush.msra.mxu0 %v802_v2  ;;  %2520 = vmatpush.msra.mxu1 %v819_v3  ;;  %v867_v2 = vld [vmem:[#allocation5 + $0x1648] sm:$0xff]  ;;  %v884_v3 = vld [vmem:[#allocation5 + $0x16d0] sm:$0xff] }
 0x172   :  { %2541 = vmatpush.msra.mxu2 %v834_v4  ;;  %2560 = vmatpush.msra.mxu3 %v851_v5  ;;  %v899_v4 = vld [vmem:[#allocation5 + $0x1748] sm:$0xff]  ;;  %v916_v5 = vld [vmem:[#allocation5 + $0x17d0] sm:$0xff] }
 0x173   :  { %2502 = vmatpush.msra.mxu0 %v801_v6  ;;  %2521 = vmatpush.msra.mxu1 %v818_v7  ;;  %v866_v6 = vld [vmem:[#allocation5 + $0x1640] sm:$0xff]  ;;  %v883_v7 = vld [vmem:[#allocation5 + $0x16c8] sm:$0xff] }
 0x174   :  { %2542 = vmatpush.msra.mxu2 %v833_v8  ;;  %2561 = vmatpush.msra.mxu3 %v850_v9  ;;  %v898_v8 = vld [vmem:[#allocation5 + $0x1740] sm:$0xff]  ;;  %v915_v9 = vld [vmem:[#allocation5 + $0x17c8] sm:$0xff] }
 0x175   :  { %2503 = vmatpush.msra.mxu0 %v800_v10  ;;  %2522 = vmatpush.msra.mxu1 %v817_v11  ;;  %v865_v10 = vld [vmem:[#allocation5 + $0x1638] sm:$0xff]  ;;  %v882_v11 = vld [vmem:[#allocation5 + $0x16c0] sm:$0xff] }
 0x176   :  { %2543 = vmatpush.msra.mxu2 %v832_v12  ;;  %2562 = vmatpush.msra.mxu3 %v849_v13  ;;  %v897_v12 = vld [vmem:[#allocation5 + $0x1738] sm:$0xff]  ;;  %v914_v13 = vld [vmem:[#allocation5 + $0x17c0] sm:$0xff] }
 0x177   :  { %2504 = vmatpush.msra.mxu0 %v799_v14  ;;  %2523 = vmatpush.msra.mxu1 %v816_v15  ;;  %v864_v14 = vld [vmem:[#allocation5 + $0x1630] sm:$0xff]  ;;  %v881_v15 = vld [vmem:[#allocation5 + $0x16b8] sm:$0xff] }
 0x178   :  { %2544 = vmatpush.msra.mxu2 %v831_v16  ;;  %2563 = vmatpush.msra.mxu3 %v848_v17  ;;  %v896_v16 = vld [vmem:[#allocation5 + $0x1730] sm:$0xff]  ;;  %v913_v17 = vld [vmem:[#allocation5 + $0x17b8] sm:$0xff] }
 0x179   :  { %2505 = vmatpush.msra.mxu0 %v798_v18  ;;  %2524 = vmatpush.msra.mxu1 %v815_v19  ;;  %v863_v18 = vld [vmem:[#allocation5 + $0x1628] sm:$0xff]  ;;  %v880_v19 = vld [vmem:[#allocation5 + $0x16b0] sm:$0xff] }
 0x17a   :  { %2545 = vmatpush.msra.mxu2 %v830_v20  ;;  %2564 = vmatpush.msra.mxu3 %v847_v21  ;;  %v895_v20 = vld [vmem:[#allocation5 + $0x1728] sm:$0xff]  ;;  %v912_v21 = vld [vmem:[#allocation5 + $0x17b0] sm:$0xff] }
 0x17b   :  { %2506 = vmatpush.msra.mxu0 %v797_v22  ;;  %2525 = vmatpush.msra.mxu1 %v814_v23  ;;  %v862_v22 = vld [vmem:[#allocation5 + $0x1620] sm:$0xff]  ;;  %v879_v23 = vld [vmem:[#allocation5 + $0x16a8] sm:$0xff] }
 0x17c   :  { %2546 = vmatpush.msra.mxu2 %v829_v24  ;;  %2565 = vmatpush.msra.mxu3 %v846_v25  ;;  %v894_v24 = vld [vmem:[#allocation5 + $0x1720] sm:$0xff]  ;;  %v911_v25 = vld [vmem:[#allocation5 + $0x17a8] sm:$0xff] }
 0x17d   :  { %2507 = vmatpush.msra.mxu0 %v796_v26  ;;  %2526 = vmatpush.msra.mxu1 %v813_v27  ;;  %v861_v26 = vld [vmem:[#allocation5 + $0x1618] sm:$0xff]  ;;  %v878_v27 = vld [vmem:[#allocation5 + $0x16a0] sm:$0xff] }
 0x17e   :  { %2547 = vmatpush.msra.mxu2 %v828_v28  ;;  %2566 = vmatpush.msra.mxu3 %v845_v29  ;;  %v893_v28 = vld [vmem:[#allocation5 + $0x1718] sm:$0xff]  ;;  %v910_v29 = vld [vmem:[#allocation5 + $0x17a0] sm:$0xff] }
 0x17f   :  { %2508 = vmatpush.msra.mxu0 %v795_v30  ;;  %2527 = vmatpush.msra.mxu1 %v812_v31  ;;  %v860_v30 = vld [vmem:[#allocation5 + $0x1610] sm:$0xff]  ;;  %v877_v31 = vld [vmem:[#allocation5 + $0x1698] sm:$0xff] }
 0x180   :  { %2548 = vmatpush.msra.mxu2 %v827_v32  ;;  %2567 = vmatpush.msra.mxu3 %v844_v33  ;;  %v892_v32 = vld [vmem:[#allocation5 + $0x1710] sm:$0xff]  ;;  %v909_v33 = vld [vmem:[#allocation5 + $0x1798] sm:$0xff] }
 0x181   :  { %2509 = vmatpush.msra.mxu0 %v794_v34  ;;  %2528 = vmatpush.msra.mxu1 %v811_v35  ;;  %v859_v34 = vld [vmem:[#allocation5 + $0x1608] sm:$0xff]  ;;  %v876_v35 = vld [vmem:[#allocation5 + $0x1690] sm:$0xff] }
 0x182   :  { %2549 = vmatpush.msra.mxu2 %v826_v36  ;;  %2568 = vmatpush.msra.mxu3 %v843_v37  ;;  %v891_v36 = vld [vmem:[#allocation5 + $0x1708] sm:$0xff]  ;;  %v908_v37 = vld [vmem:[#allocation5 + $0x1790] sm:$0xff] }
 0x183   :  { %2510 = vmatmul.f32.vlgmr.msra.gmra.mxu0 %v98_v38  ;;  %2550 = vmatmul.f32.vlgmr.msra.gmra.mxu2 %v100_v39  ;;  %v858_v38 = vld [vmem:[#allocation5 + $0x1600] sm:$0xff]  ;;  %v875_v39 = vld [vmem:[#allocation5 + $0x1688] sm:$0xff] }
 0x184   :  { %2574 = vmatpush.msrb.mxu0 %v873_v40  ;;  %2614 = vmatpush.msrb.mxu2 %v905_v41  ;;  %v890_v40 = vld [vmem:[#allocation5 + $0x1700] sm:$0xff]  ;;  %v907_v41 = vld [vmem:[#allocation5 + $0x1788] sm:$0xff] }
 0x185   :  { %2529 = vmatpush.msra.mxu1 %v810_v42  ;;  %2569 = vmatpush.msra.mxu3 %v842_v43  ;;  %v102_v42 = vld [vmem:[#allocation2 + $0x160] sm:$0xff]  ;;  %v104_v43 = vld [vmem:[#allocation2 + $0x170] sm:$0xff] }
 0x186   :  { %2530 = vmatmul.f32.vlgmr.msra.gmra.mxu1 %v99_v44  ;;  %2570 = vmatmul.f32.vlgmr.msra.gmra.mxu3 %v101_v45  ;;  %v937_v44 = vld [vmem:[#allocation5 + $0x1878] sm:$0xff] }
 0x187   :  { %2575 = vmatpush.msrb.mxu0 %v872_v46  ;;  %2594 = vmatpush.msrb.mxu1 %v889_v47  ;;  %v969_v45 = vld [vmem:[#allocation5 + $0x1978] sm:$0xff]  ;;  %v874_v46 = vld [vmem:[#allocation5 + $0x1680] sm:$0xff] }
 0x188   :  { %2615 = vmatpush.msrb.mxu2 %v904_v48  ;;  %2634 = vmatpush.msrb.mxu3 %v921_v49  ;;  %v906_v47 = vld [vmem:[#allocation5 + $0x1780] sm:$0xff]  ;;  %v103_v48 = vld [vmem:[#allocation2 + $0x168] sm:$0xff]  ;;  %v105_v49 = vld [vmem:[#allocation2 + $0x178] sm:$0xff] }
 0x189   :  { %2576 = vmatpush.msrb.mxu0 %v871_v50  ;;  %2595 = vmatpush.msrb.mxu1 %v888_v51  ;;  %v936_v50 = vld [vmem:[#allocation5 + $0x1870] sm:$0xff]  ;;  %v953_v51 = vld [vmem:[#allocation5 + $0x18f8] sm:$0xff] }
 0x18a   :  { %2616 = vmatpush.msrb.mxu2 %v903_v52  ;;  %2635 = vmatpush.msrb.mxu3 %v920_v53  ;;  %v968_v52 = vld [vmem:[#allocation5 + $0x1970] sm:$0xff]  ;;  %v985_v53 = vld [vmem:[#allocation5 + $0x19f8] sm:$0xff] }
 0x18b   :  { %2577 = vmatpush.msrb.mxu0 %v870_v54  ;;  %2596 = vmatpush.msrb.mxu1 %v887_v55  ;;  %v935_v54 = vld [vmem:[#allocation5 + $0x1868] sm:$0xff]  ;;  %v952_v55 = vld [vmem:[#allocation5 + $0x18f0] sm:$0xff] }
 0x18c   :  { %2617 = vmatpush.msrb.mxu2 %v902_v56  ;;  %2636 = vmatpush.msrb.mxu3 %v919_v57  ;;  %v967_v56 = vld [vmem:[#allocation5 + $0x1968] sm:$0xff]  ;;  %v984_v57 = vld [vmem:[#allocation5 + $0x19f0] sm:$0xff] }
 0x18d   :  { %2578 = vmatpush.msrb.mxu0 %v869_v58  ;;  %2597 = vmatpush.msrb.mxu1 %v886_v59  ;;  %v934_v58 = vld [vmem:[#allocation5 + $0x1860] sm:$0xff]  ;;  %v951_v59 = vld [vmem:[#allocation5 + $0x18e8] sm:$0xff] }
 0x18e   :  { %2618 = vmatpush.msrb.mxu2 %v901_v60  ;;  %2637 = vmatpush.msrb.mxu3 %v918_v61  ;;  %v966_v60 = vld [vmem:[#allocation5 + $0x1960] sm:$0xff]  ;;  %v983_v61 = vld [vmem:[#allocation5 + $0x19e8] sm:$0xff] }
 0x18f   :  { %2579 = vmatpush.msrb.mxu0 %v868_v62  ;;  %2598 = vmatpush.msrb.mxu1 %v885_v63  ;;  %v933_v62 = vld [vmem:[#allocation5 + $0x1858] sm:$0xff]  ;;  %v950_v63 = vld [vmem:[#allocation5 + $0x18e0] sm:$0xff] }
 0x190   :  { %2619 = vmatpush.msrb.mxu2 %v900_v0  ;;  %2638 = vmatpush.msrb.mxu3 %v917_v1  ;;  %v965_v0 = vld [vmem:[#allocation5 + $0x1958] sm:$0xff]  ;;  %v982_v1 = vld [vmem:[#allocation5 + $0x19e0] sm:$0xff] }
 0x191   :  { %2580 = vmatpush.msrb.mxu0 %v867_v2  ;;  %2599 = vmatpush.msrb.mxu1 %v884_v3  ;;  %v932_v2 = vld [vmem:[#allocation5 + $0x1850] sm:$0xff]  ;;  %v949_v3 = vld [vmem:[#allocation5 + $0x18d8] sm:$0xff] }
 0x192   :  { %2620 = vmatpush.msrb.mxu2 %v899_v4  ;;  %2639 = vmatpush.msrb.mxu3 %v916_v5  ;;  %v964_v4 = vld [vmem:[#allocation5 + $0x1950] sm:$0xff]  ;;  %v981_v5 = vld [vmem:[#allocation5 + $0x19d8] sm:$0xff] }
 0x193   :  { %2581 = vmatpush.msrb.mxu0 %v866_v6  ;;  %2600 = vmatpush.msrb.mxu1 %v883_v7  ;;  %v931_v6 = vld [vmem:[#allocation5 + $0x1848] sm:$0xff]  ;;  %v948_v7 = vld [vmem:[#allocation5 + $0x18d0] sm:$0xff] }
 0x194   :  { %2621 = vmatpush.msrb.mxu2 %v898_v8  ;;  %2640 = vmatpush.msrb.mxu3 %v915_v9  ;;  %v963_v8 = vld [vmem:[#allocation5 + $0x1948] sm:$0xff]  ;;  %v980_v9 = vld [vmem:[#allocation5 + $0x19d0] sm:$0xff] }
 0x195   :  { %2582 = vmatpush.msrb.mxu0 %v865_v10  ;;  %2601 = vmatpush.msrb.mxu1 %v882_v11  ;;  %v930_v10 = vld [vmem:[#allocation5 + $0x1840] sm:$0xff]  ;;  %v947_v11 = vld [vmem:[#allocation5 + $0x18c8] sm:$0xff] }
 0x196   :  { %2622 = vmatpush.msrb.mxu2 %v897_v12  ;;  %2641 = vmatpush.msrb.mxu3 %v914_v13  ;;  %v962_v12 = vld [vmem:[#allocation5 + $0x1940] sm:$0xff]  ;;  %v979_v13 = vld [vmem:[#allocation5 + $0x19c8] sm:$0xff] }
 0x197   :  { %2583 = vmatpush.msrb.mxu0 %v864_v14  ;;  %2602 = vmatpush.msrb.mxu1 %v881_v15  ;;  %v929_v14 = vld [vmem:[#allocation5 + $0x1838] sm:$0xff]  ;;  %v946_v15 = vld [vmem:[#allocation5 + $0x18c0] sm:$0xff] }
 0x198   :  { %2623 = vmatpush.msrb.mxu2 %v896_v16  ;;  %2642 = vmatpush.msrb.mxu3 %v913_v17  ;;  %v961_v16 = vld [vmem:[#allocation5 + $0x1938] sm:$0xff]  ;;  %v978_v17 = vld [vmem:[#allocation5 + $0x19c0] sm:$0xff] }
 0x199   :  { %2584 = vmatpush.msrb.mxu0 %v863_v18  ;;  %2603 = vmatpush.msrb.mxu1 %v880_v19  ;;  %v928_v18 = vld [vmem:[#allocation5 + $0x1830] sm:$0xff]  ;;  %v945_v19 = vld [vmem:[#allocation5 + $0x18b8] sm:$0xff] }
 0x19a   :  { %2624 = vmatpush.msrb.mxu2 %v895_v20  ;;  %2643 = vmatpush.msrb.mxu3 %v912_v21  ;;  %v960_v20 = vld [vmem:[#allocation5 + $0x1930] sm:$0xff]  ;;  %v977_v21 = vld [vmem:[#allocation5 + $0x19b8] sm:$0xff] }
 0x19b   :  { %2585 = vmatpush.msrb.mxu0 %v862_v22  ;;  %2604 = vmatpush.msrb.mxu1 %v879_v23  ;;  %v927_v22 = vld [vmem:[#allocation5 + $0x1828] sm:$0xff]  ;;  %v944_v23 = vld [vmem:[#allocation5 + $0x18b0] sm:$0xff] }
 0x19c   :  { %2625 = vmatpush.msrb.mxu2 %v894_v24  ;;  %2644 = vmatpush.msrb.mxu3 %v911_v25  ;;  %v959_v24 = vld [vmem:[#allocation5 + $0x1928] sm:$0xff]  ;;  %v976_v25 = vld [vmem:[#allocation5 + $0x19b0] sm:$0xff] }
 0x19d   :  { %2586 = vmatpush.msrb.mxu0 %v861_v26  ;;  %2605 = vmatpush.msrb.mxu1 %v878_v27  ;;  %v926_v26 = vld [vmem:[#allocation5 + $0x1820] sm:$0xff]  ;;  %v943_v27 = vld [vmem:[#allocation5 + $0x18a8] sm:$0xff] }
 0x19e   :  { %2626 = vmatpush.msrb.mxu2 %v893_v28  ;;  %2645 = vmatpush.msrb.mxu3 %v910_v29  ;;  %v958_v28 = vld [vmem:[#allocation5 + $0x1920] sm:$0xff]  ;;  %v975_v29 = vld [vmem:[#allocation5 + $0x19a8] sm:$0xff] }
 0x19f   :  { %2587 = vmatpush.msrb.mxu0 %v860_v30  ;;  %2606 = vmatpush.msrb.mxu1 %v877_v31  ;;  %v925_v30 = vld [vmem:[#allocation5 + $0x1818] sm:$0xff]  ;;  %v942_v31 = vld [vmem:[#allocation5 + $0x18a0] sm:$0xff] }
 0x1a0   :  { %2627 = vmatpush.msrb.mxu2 %v892_v32  ;;  %2646 = vmatpush.msrb.mxu3 %v909_v33  ;;  %v957_v32 = vld [vmem:[#allocation5 + $0x1918] sm:$0xff]  ;;  %v974_v33 = vld [vmem:[#allocation5 + $0x19a0] sm:$0xff] }
 0x1a1   :  { %2588 = vmatpush.msrb.mxu0 %v859_v34  ;;  %2607 = vmatpush.msrb.mxu1 %v876_v35  ;;  %v924_v34 = vld [vmem:[#allocation5 + $0x1810] sm:$0xff]  ;;  %v941_v35 = vld [vmem:[#allocation5 + $0x1898] sm:$0xff] }
 0x1a2   :  { %2628 = vmatpush.msrb.mxu2 %v891_v36  ;;  %2647 = vmatpush.msrb.mxu3 %v908_v37  ;;  %v956_v36 = vld [vmem:[#allocation5 + $0x1910] sm:$0xff]  ;;  %v973_v37 = vld [vmem:[#allocation5 + $0x1998] sm:$0xff] }
 0x1a3   :  { %2589 = vmatpush.msrb.mxu0 %v858_v38  ;;  %2608 = vmatpush.msrb.mxu1 %v875_v39  ;;  %v923_v38 = vld [vmem:[#allocation5 + $0x1808] sm:$0xff]  ;;  %v940_v39 = vld [vmem:[#allocation5 + $0x1890] sm:$0xff] }
 0x1a4   :  { %2629 = vmatpush.msrb.mxu2 %v890_v40  ;;  %2648 = vmatpush.msrb.mxu3 %v907_v41  ;;  %v955_v40 = vld [vmem:[#allocation5 + $0x1908] sm:$0xff]  ;;  %v972_v41 = vld [vmem:[#allocation5 + $0x1990] sm:$0xff] }
 0x1a5   :  { %2590 = vmatmul.f32.vlgmr.msrb.gmra.mxu0 %v102_v42  ;;  %2630 = vmatmul.f32.vlgmr.msrb.gmra.mxu2 %v104_v43  ;;  %v922_v42 = vld [vmem:[#allocation5 + $0x1800] sm:$0xff]  ;;  %v939_v43 = vld [vmem:[#allocation5 + $0x1888] sm:$0xff] }
 0x1a6   :  { %2654 = vmatpush.msra.mxu0 %v937_v44  ;;  %2694 = vmatpush.msra.mxu2 %v969_v45  ;;  %v954_v44 = vld [vmem:[#allocation5 + $0x1900] sm:$0xff]  ;;  %v971_v45 = vld [vmem:[#allocation5 + $0x1988] sm:$0xff] }
 0x1a7   :  { %2609 = vmatpush.msrb.mxu1 %v874_v46  ;;  %2649 = vmatpush.msrb.mxu3 %v906_v47  ;;  %v106_v46 = vld [vmem:[#allocation2 + $0x180] sm:$0xff]  ;;  %v108_v47 = vld [vmem:[#allocation2 + $0x190] sm:$0xff] }
 0x1a8   :  { %2610 = vmatmul.f32.vlgmr.msrb.gmra.mxu1 %v103_v48  ;;  %2650 = vmatmul.f32.vlgmr.msrb.gmra.mxu3 %v105_v49  ;;  %v1001_v48 = vld [vmem:[#allocation5 + $0x1a78] sm:$0xff] }
 0x1a9   :  { %2655 = vmatpush.msra.mxu0 %v936_v50  ;;  %2674 = vmatpush.msra.mxu1 %v953_v51  ;;  %v1033_v49 = vld [vmem:[#allocation5 + $0x1b78] sm:$0xff]  ;;  %v938_v50 = vld [vmem:[#allocation5 + $0x1880] sm:$0xff] }
 0x1aa   :  { %2695 = vmatpush.msra.mxu2 %v968_v52  ;;  %2714 = vmatpush.msra.mxu3 %v985_v53  ;;  %v970_v51 = vld [vmem:[#allocation5 + $0x1980] sm:$0xff]  ;;  %v107_v52 = vld [vmem:[#allocation2 + $0x188] sm:$0xff]  ;;  %v109_v53 = vld [vmem:[#allocation2 + $0x198] sm:$0xff] }
 0x1ab   :  { %2656 = vmatpush.msra.mxu0 %v935_v54  ;;  %2675 = vmatpush.msra.mxu1 %v952_v55  ;;  %v1000_v54 = vld [vmem:[#allocation5 + $0x1a70] sm:$0xff]  ;;  %v1017_v55 = vld [vmem:[#allocation5 + $0x1af8] sm:$0xff] }
 0x1ac   :  { %2696 = vmatpush.msra.mxu2 %v967_v56  ;;  %2715 = vmatpush.msra.mxu3 %v984_v57  ;;  %v1032_v56 = vld [vmem:[#allocation5 + $0x1b70] sm:$0xff]  ;;  %v1049_v57 = vld [vmem:[#allocation5 + $0x1bf8] sm:$0xff] }
 0x1ad   :  { %2657 = vmatpush.msra.mxu0 %v934_v58  ;;  %2676 = vmatpush.msra.mxu1 %v951_v59  ;;  %v999_v58 = vld [vmem:[#allocation5 + $0x1a68] sm:$0xff]  ;;  %v1016_v59 = vld [vmem:[#allocation5 + $0x1af0] sm:$0xff] }
 0x1ae   :  { %2697 = vmatpush.msra.mxu2 %v966_v60  ;;  %2716 = vmatpush.msra.mxu3 %v983_v61  ;;  %v1031_v60 = vld [vmem:[#allocation5 + $0x1b68] sm:$0xff]  ;;  %v1048_v61 = vld [vmem:[#allocation5 + $0x1bf0] sm:$0xff] }
 0x1af   :  { %2658 = vmatpush.msra.mxu0 %v933_v62  ;;  %2677 = vmatpush.msra.mxu1 %v950_v63  ;;  %v998_v62 = vld [vmem:[#allocation5 + $0x1a60] sm:$0xff]  ;;  %v1015_v63 = vld [vmem:[#allocation5 + $0x1ae8] sm:$0xff] }
 0x1b0   :  { %2698 = vmatpush.msra.mxu2 %v965_v0  ;;  %2717 = vmatpush.msra.mxu3 %v982_v1  ;;  %v1030_v0 = vld [vmem:[#allocation5 + $0x1b60] sm:$0xff]  ;;  %v1047_v1 = vld [vmem:[#allocation5 + $0x1be8] sm:$0xff] }
 0x1b1   :  { %2659 = vmatpush.msra.mxu0 %v932_v2  ;;  %2678 = vmatpush.msra.mxu1 %v949_v3  ;;  %v997_v2 = vld [vmem:[#allocation5 + $0x1a58] sm:$0xff]  ;;  %v1014_v3 = vld [vmem:[#allocation5 + $0x1ae0] sm:$0xff] }
 0x1b2   :  { %2699 = vmatpush.msra.mxu2 %v964_v4  ;;  %2718 = vmatpush.msra.mxu3 %v981_v5  ;;  %v1029_v4 = vld [vmem:[#allocation5 + $0x1b58] sm:$0xff]  ;;  %v1046_v5 = vld [vmem:[#allocation5 + $0x1be0] sm:$0xff] }
 0x1b3   :  { %2660 = vmatpush.msra.mxu0 %v931_v6  ;;  %2679 = vmatpush.msra.mxu1 %v948_v7  ;;  %v996_v6 = vld [vmem:[#allocation5 + $0x1a50] sm:$0xff]  ;;  %v1013_v7 = vld [vmem:[#allocation5 + $0x1ad8] sm:$0xff] }
 0x1b4   :  { %2700 = vmatpush.msra.mxu2 %v963_v8  ;;  %2719 = vmatpush.msra.mxu3 %v980_v9  ;;  %v1028_v8 = vld [vmem:[#allocation5 + $0x1b50] sm:$0xff]  ;;  %v1045_v9 = vld [vmem:[#allocation5 + $0x1bd8] sm:$0xff] }
 0x1b5   :  { %2661 = vmatpush.msra.mxu0 %v930_v10  ;;  %2680 = vmatpush.msra.mxu1 %v947_v11  ;;  %v995_v10 = vld [vmem:[#allocation5 + $0x1a48] sm:$0xff]  ;;  %v1012_v11 = vld [vmem:[#allocation5 + $0x1ad0] sm:$0xff] }
 0x1b6   :  { %2701 = vmatpush.msra.mxu2 %v962_v12  ;;  %2720 = vmatpush.msra.mxu3 %v979_v13  ;;  %v1027_v12 = vld [vmem:[#allocation5 + $0x1b48] sm:$0xff]  ;;  %v1044_v13 = vld [vmem:[#allocation5 + $0x1bd0] sm:$0xff] }
 0x1b7   :  { %2662 = vmatpush.msra.mxu0 %v929_v14  ;;  %2681 = vmatpush.msra.mxu1 %v946_v15  ;;  %v994_v14 = vld [vmem:[#allocation5 + $0x1a40] sm:$0xff]  ;;  %v1011_v15 = vld [vmem:[#allocation5 + $0x1ac8] sm:$0xff] }
 0x1b8   :  { %2702 = vmatpush.msra.mxu2 %v961_v16  ;;  %2721 = vmatpush.msra.mxu3 %v978_v17  ;;  %v1026_v16 = vld [vmem:[#allocation5 + $0x1b40] sm:$0xff]  ;;  %v1043_v17 = vld [vmem:[#allocation5 + $0x1bc8] sm:$0xff] }
 0x1b9   :  { %2663 = vmatpush.msra.mxu0 %v928_v18  ;;  %2682 = vmatpush.msra.mxu1 %v945_v19  ;;  %v993_v18 = vld [vmem:[#allocation5 + $0x1a38] sm:$0xff]  ;;  %v1010_v19 = vld [vmem:[#allocation5 + $0x1ac0] sm:$0xff] }
 0x1ba   :  { %2703 = vmatpush.msra.mxu2 %v960_v20  ;;  %2722 = vmatpush.msra.mxu3 %v977_v21  ;;  %v1025_v20 = vld [vmem:[#allocation5 + $0x1b38] sm:$0xff]  ;;  %v1042_v21 = vld [vmem:[#allocation5 + $0x1bc0] sm:$0xff] }
 0x1bb   :  { %2664 = vmatpush.msra.mxu0 %v927_v22  ;;  %2683 = vmatpush.msra.mxu1 %v944_v23  ;;  %v992_v22 = vld [vmem:[#allocation5 + $0x1a30] sm:$0xff]  ;;  %v1009_v23 = vld [vmem:[#allocation5 + $0x1ab8] sm:$0xff] }
 0x1bc   :  { %2704 = vmatpush.msra.mxu2 %v959_v24  ;;  %2723 = vmatpush.msra.mxu3 %v976_v25  ;;  %v1024_v24 = vld [vmem:[#allocation5 + $0x1b30] sm:$0xff]  ;;  %v1041_v25 = vld [vmem:[#allocation5 + $0x1bb8] sm:$0xff] }
 0x1bd   :  { %2665 = vmatpush.msra.mxu0 %v926_v26  ;;  %2684 = vmatpush.msra.mxu1 %v943_v27  ;;  %v991_v26 = vld [vmem:[#allocation5 + $0x1a28] sm:$0xff]  ;;  %v1008_v27 = vld [vmem:[#allocation5 + $0x1ab0] sm:$0xff] }
 0x1be   :  { %2705 = vmatpush.msra.mxu2 %v958_v28  ;;  %2724 = vmatpush.msra.mxu3 %v975_v29  ;;  %v1023_v28 = vld [vmem:[#allocation5 + $0x1b28] sm:$0xff]  ;;  %v1040_v29 = vld [vmem:[#allocation5 + $0x1bb0] sm:$0xff] }
 0x1bf   :  { %2666 = vmatpush.msra.mxu0 %v925_v30  ;;  %2685 = vmatpush.msra.mxu1 %v942_v31  ;;  %v990_v30 = vld [vmem:[#allocation5 + $0x1a20] sm:$0xff]  ;;  %v1007_v31 = vld [vmem:[#allocation5 + $0x1aa8] sm:$0xff] }
 0x1c0   :  { %2706 = vmatpush.msra.mxu2 %v957_v32  ;;  %2725 = vmatpush.msra.mxu3 %v974_v33  ;;  %v1022_v32 = vld [vmem:[#allocation5 + $0x1b20] sm:$0xff]  ;;  %v1039_v33 = vld [vmem:[#allocation5 + $0x1ba8] sm:$0xff] }
 0x1c1   :  { %2667 = vmatpush.msra.mxu0 %v924_v34  ;;  %2686 = vmatpush.msra.mxu1 %v941_v35  ;;  %v989_v34 = vld [vmem:[#allocation5 + $0x1a18] sm:$0xff]  ;;  %v1006_v35 = vld [vmem:[#allocation5 + $0x1aa0] sm:$0xff] }
 0x1c2   :  { %2707 = vmatpush.msra.mxu2 %v956_v36  ;;  %2726 = vmatpush.msra.mxu3 %v973_v37  ;;  %v1021_v36 = vld [vmem:[#allocation5 + $0x1b18] sm:$0xff]  ;;  %v1038_v37 = vld [vmem:[#allocation5 + $0x1ba0] sm:$0xff] }
 0x1c3   :  { %2668 = vmatpush.msra.mxu0 %v923_v38  ;;  %2687 = vmatpush.msra.mxu1 %v940_v39  ;;  %v988_v38 = vld [vmem:[#allocation5 + $0x1a10] sm:$0xff]  ;;  %v1005_v39 = vld [vmem:[#allocation5 + $0x1a98] sm:$0xff] }
 0x1c4   :  { %2708 = vmatpush.msra.mxu2 %v955_v40  ;;  %2727 = vmatpush.msra.mxu3 %v972_v41  ;;  %v1020_v40 = vld [vmem:[#allocation5 + $0x1b10] sm:$0xff]  ;;  %v1037_v41 = vld [vmem:[#allocation5 + $0x1b98] sm:$0xff] }
 0x1c5   :  { %2669 = vmatpush.msra.mxu0 %v922_v42  ;;  %2688 = vmatpush.msra.mxu1 %v939_v43  ;;  %v987_v42 = vld [vmem:[#allocation5 + $0x1a08] sm:$0xff]  ;;  %v1004_v43 = vld [vmem:[#allocation5 + $0x1a90] sm:$0xff] }
 0x1c6   :  { %2709 = vmatpush.msra.mxu2 %v954_v44  ;;  %2728 = vmatpush.msra.mxu3 %v971_v45  ;;  %v1019_v44 = vld [vmem:[#allocation5 + $0x1b08] sm:$0xff]  ;;  %v1036_v45 = vld [vmem:[#allocation5 + $0x1b90] sm:$0xff] }
 0x1c7   :  { %2670 = vmatmul.f32.vlgmr.msra.gmra.mxu0 %v106_v46  ;;  %2710 = vmatmul.f32.vlgmr.msra.gmra.mxu2 %v108_v47  ;;  %v986_v46 = vld [vmem:[#allocation5 + $0x1a00] sm:$0xff]  ;;  %v1003_v47 = vld [vmem:[#allocation5 + $0x1a88] sm:$0xff] }
 0x1c8   :  { %2734 = vmatpush.msrb.mxu0 %v1001_v48  ;;  %2774 = vmatpush.msrb.mxu2 %v1033_v49  ;;  %v1018_v48 = vld [vmem:[#allocation5 + $0x1b00] sm:$0xff]  ;;  %v1035_v49 = vld [vmem:[#allocation5 + $0x1b88] sm:$0xff] }
 0x1c9   :  { %2689 = vmatpush.msra.mxu1 %v938_v50  ;;  %2729 = vmatpush.msra.mxu3 %v970_v51  ;;  %v110_v50 = vld [vmem:[#allocation2 + $0x1a0] sm:$0xff]  ;;  %v112_v51 = vld [vmem:[#allocation2 + $0x1b0] sm:$0xff] }
 0x1ca   :  { %2690 = vmatmul.f32.vlgmr.msra.gmra.mxu1 %v107_v52  ;;  %2730 = vmatmul.f32.vlgmr.msra.gmra.mxu3 %v109_v53  ;;  %v1065_v52 = vld [vmem:[#allocation5 + $0x1c78] sm:$0xff] }
 0x1cb   :  { %2735 = vmatpush.msrb.mxu0 %v1000_v54  ;;  %2754 = vmatpush.msrb.mxu1 %v1017_v55  ;;  %v1097_v53 = vld [vmem:[#allocation5 + $0x1d78] sm:$0xff]  ;;  %v1002_v54 = vld [vmem:[#allocation5 + $0x1a80] sm:$0xff] }
 0x1cc   :  { %2775 = vmatpush.msrb.mxu2 %v1032_v56  ;;  %2794 = vmatpush.msrb.mxu3 %v1049_v57  ;;  %v1034_v55 = vld [vmem:[#allocation5 + $0x1b80] sm:$0xff]  ;;  %v111_v56 = vld [vmem:[#allocation2 + $0x1a8] sm:$0xff]  ;;  %v113_v57 = vld [vmem:[#allocation2 + $0x1b8] sm:$0xff] }
 0x1cd   :  { %2736 = vmatpush.msrb.mxu0 %v999_v58  ;;  %2755 = vmatpush.msrb.mxu1 %v1016_v59  ;;  %v1064_v58 = vld [vmem:[#allocation5 + $0x1c70] sm:$0xff]  ;;  %v1081_v59 = vld [vmem:[#allocation5 + $0x1cf8] sm:$0xff] }
 0x1ce   :  { %2776 = vmatpush.msrb.mxu2 %v1031_v60  ;;  %2795 = vmatpush.msrb.mxu3 %v1048_v61  ;;  %v1096_v60 = vld [vmem:[#allocation5 + $0x1d70] sm:$0xff]  ;;  %v1113_v61 = vld [vmem:[#allocation5 + $0x1df8] sm:$0xff] }
 0x1cf   :  { %2737 = vmatpush.msrb.mxu0 %v998_v62  ;;  %2756 = vmatpush.msrb.mxu1 %v1015_v63  ;;  %v1063_v62 = vld [vmem:[#allocation5 + $0x1c68] sm:$0xff]  ;;  %v1080_v63 = vld [vmem:[#allocation5 + $0x1cf0] sm:$0xff] }
 0x1d0   :  { %2777 = vmatpush.msrb.mxu2 %v1030_v0  ;;  %2796 = vmatpush.msrb.mxu3 %v1047_v1  ;;  %v1095_v0 = vld [vmem:[#allocation5 + $0x1d68] sm:$0xff]  ;;  %v1112_v1 = vld [vmem:[#allocation5 + $0x1df0] sm:$0xff] }
 0x1d1   :  { %2738 = vmatpush.msrb.mxu0 %v997_v2  ;;  %2757 = vmatpush.msrb.mxu1 %v1014_v3  ;;  %v1062_v2 = vld [vmem:[#allocation5 + $0x1c60] sm:$0xff]  ;;  %v1079_v3 = vld [vmem:[#allocation5 + $0x1ce8] sm:$0xff] }
 0x1d2   :  { %2778 = vmatpush.msrb.mxu2 %v1029_v4  ;;  %2797 = vmatpush.msrb.mxu3 %v1046_v5  ;;  %v1094_v4 = vld [vmem:[#allocation5 + $0x1d60] sm:$0xff]  ;;  %v1111_v5 = vld [vmem:[#allocation5 + $0x1de8] sm:$0xff] }
 0x1d3   :  { %2739 = vmatpush.msrb.mxu0 %v996_v6  ;;  %2758 = vmatpush.msrb.mxu1 %v1013_v7  ;;  %v1061_v6 = vld [vmem:[#allocation5 + $0x1c58] sm:$0xff]  ;;  %v1078_v7 = vld [vmem:[#allocation5 + $0x1ce0] sm:$0xff] }
 0x1d4   :  { %2779 = vmatpush.msrb.mxu2 %v1028_v8  ;;  %2798 = vmatpush.msrb.mxu3 %v1045_v9  ;;  %v1093_v8 = vld [vmem:[#allocation5 + $0x1d58] sm:$0xff]  ;;  %v1110_v9 = vld [vmem:[#allocation5 + $0x1de0] sm:$0xff] }
 0x1d5   :  { %2740 = vmatpush.msrb.mxu0 %v995_v10  ;;  %2759 = vmatpush.msrb.mxu1 %v1012_v11  ;;  %v1060_v10 = vld [vmem:[#allocation5 + $0x1c50] sm:$0xff]  ;;  %v1077_v11 = vld [vmem:[#allocation5 + $0x1cd8] sm:$0xff] }
 0x1d6   :  { %2780 = vmatpush.msrb.mxu2 %v1027_v12  ;;  %2799 = vmatpush.msrb.mxu3 %v1044_v13  ;;  %v1092_v12 = vld [vmem:[#allocation5 + $0x1d50] sm:$0xff]  ;;  %v1109_v13 = vld [vmem:[#allocation5 + $0x1dd8] sm:$0xff] }
 0x1d7   :  { %2741 = vmatpush.msrb.mxu0 %v994_v14  ;;  %2760 = vmatpush.msrb.mxu1 %v1011_v15  ;;  %v1059_v14 = vld [vmem:[#allocation5 + $0x1c48] sm:$0xff]  ;;  %v1076_v15 = vld [vmem:[#allocation5 + $0x1cd0] sm:$0xff] }
 0x1d8   :  { %2781 = vmatpush.msrb.mxu2 %v1026_v16  ;;  %2800 = vmatpush.msrb.mxu3 %v1043_v17  ;;  %v1091_v16 = vld [vmem:[#allocation5 + $0x1d48] sm:$0xff]  ;;  %v1108_v17 = vld [vmem:[#allocation5 + $0x1dd0] sm:$0xff] }
 0x1d9   :  { %2742 = vmatpush.msrb.mxu0 %v993_v18  ;;  %2761 = vmatpush.msrb.mxu1 %v1010_v19  ;;  %v1058_v18 = vld [vmem:[#allocation5 + $0x1c40] sm:$0xff]  ;;  %v1075_v19 = vld [vmem:[#allocation5 + $0x1cc8] sm:$0xff] }
 0x1da   :  { %2782 = vmatpush.msrb.mxu2 %v1025_v20  ;;  %2801 = vmatpush.msrb.mxu3 %v1042_v21  ;;  %v1090_v20 = vld [vmem:[#allocation5 + $0x1d40] sm:$0xff]  ;;  %v1107_v21 = vld [vmem:[#allocation5 + $0x1dc8] sm:$0xff] }
 0x1db   :  { %2743 = vmatpush.msrb.mxu0 %v992_v22  ;;  %2762 = vmatpush.msrb.mxu1 %v1009_v23  ;;  %v1057_v22 = vld [vmem:[#allocation5 + $0x1c38] sm:$0xff]  ;;  %v1074_v23 = vld [vmem:[#allocation5 + $0x1cc0] sm:$0xff] }
 0x1dc   :  { %2783 = vmatpush.msrb.mxu2 %v1024_v24  ;;  %2802 = vmatpush.msrb.mxu3 %v1041_v25  ;;  %v1089_v24 = vld [vmem:[#allocation5 + $0x1d38] sm:$0xff]  ;;  %v1106_v25 = vld [vmem:[#allocation5 + $0x1dc0] sm:$0xff] }
 0x1dd   :  { %2744 = vmatpush.msrb.mxu0 %v991_v26  ;;  %2763 = vmatpush.msrb.mxu1 %v1008_v27  ;;  %v1056_v26 = vld [vmem:[#allocation5 + $0x1c30] sm:$0xff]  ;;  %v1073_v27 = vld [vmem:[#allocation5 + $0x1cb8] sm:$0xff] }
 0x1de   :  { %2784 = vmatpush.msrb.mxu2 %v1023_v28  ;;  %2803 = vmatpush.msrb.mxu3 %v1040_v29  ;;  %v1088_v28 = vld [vmem:[#allocation5 + $0x1d30] sm:$0xff]  ;;  %v1105_v29 = vld [vmem:[#allocation5 + $0x1db8] sm:$0xff] }
 0x1df   :  { %2745 = vmatpush.msrb.mxu0 %v990_v30  ;;  %2764 = vmatpush.msrb.mxu1 %v1007_v31  ;;  %v1055_v30 = vld [vmem:[#allocation5 + $0x1c28] sm:$0xff]  ;;  %v1072_v31 = vld [vmem:[#allocation5 + $0x1cb0] sm:$0xff] }
 0x1e0   :  { %2785 = vmatpush.msrb.mxu2 %v1022_v32  ;;  %2804 = vmatpush.msrb.mxu3 %v1039_v33  ;;  %v1087_v32 = vld [vmem:[#allocation5 + $0x1d28] sm:$0xff]  ;;  %v1104_v33 = vld [vmem:[#allocation5 + $0x1db0] sm:$0xff] }
 0x1e1   :  { %2746 = vmatpush.msrb.mxu0 %v989_v34  ;;  %2765 = vmatpush.msrb.mxu1 %v1006_v35  ;;  %v1054_v34 = vld [vmem:[#allocation5 + $0x1c20] sm:$0xff]  ;;  %v1071_v35 = vld [vmem:[#allocation5 + $0x1ca8] sm:$0xff] }
 0x1e2   :  { %2786 = vmatpush.msrb.mxu2 %v1021_v36  ;;  %2805 = vmatpush.msrb.mxu3 %v1038_v37  ;;  %v1086_v36 = vld [vmem:[#allocation5 + $0x1d20] sm:$0xff]  ;;  %v1103_v37 = vld [vmem:[#allocation5 + $0x1da8] sm:$0xff] }
 0x1e3   :  { %2747 = vmatpush.msrb.mxu0 %v988_v38  ;;  %2766 = vmatpush.msrb.mxu1 %v1005_v39  ;;  %v1053_v38 = vld [vmem:[#allocation5 + $0x1c18] sm:$0xff]  ;;  %v1070_v39 = vld [vmem:[#allocation5 + $0x1ca0] sm:$0xff] }
 0x1e4   :  { %2787 = vmatpush.msrb.mxu2 %v1020_v40  ;;  %2806 = vmatpush.msrb.mxu3 %v1037_v41  ;;  %v1085_v40 = vld [vmem:[#allocation5 + $0x1d18] sm:$0xff]  ;;  %v1102_v41 = vld [vmem:[#allocation5 + $0x1da0] sm:$0xff] }
 0x1e5   :  { %2748 = vmatpush.msrb.mxu0 %v987_v42  ;;  %2767 = vmatpush.msrb.mxu1 %v1004_v43  ;;  %v1052_v42 = vld [vmem:[#allocation5 + $0x1c10] sm:$0xff]  ;;  %v1069_v43 = vld [vmem:[#allocation5 + $0x1c98] sm:$0xff] }
 0x1e6   :  { %2788 = vmatpush.msrb.mxu2 %v1019_v44  ;;  %2807 = vmatpush.msrb.mxu3 %v1036_v45  ;;  %v1084_v44 = vld [vmem:[#allocation5 + $0x1d10] sm:$0xff]  ;;  %v1101_v45 = vld [vmem:[#allocation5 + $0x1d98] sm:$0xff] }
 0x1e7   :  { %2749 = vmatpush.msrb.mxu0 %v986_v46  ;;  %2768 = vmatpush.msrb.mxu1 %v1003_v47  ;;  %v1051_v46 = vld [vmem:[#allocation5 + $0x1c08] sm:$0xff]  ;;  %v1068_v47 = vld [vmem:[#allocation5 + $0x1c90] sm:$0xff] }
 0x1e8   :  { %2789 = vmatpush.msrb.mxu2 %v1018_v48  ;;  %2808 = vmatpush.msrb.mxu3 %v1035_v49  ;;  %v1083_v48 = vld [vmem:[#allocation5 + $0x1d08] sm:$0xff]  ;;  %v1100_v49 = vld [vmem:[#allocation5 + $0x1d90] sm:$0xff] }
 0x1e9   :  { %2750 = vmatmul.f32.vlgmr.msrb.gmra.mxu0 %v110_v50  ;;  %2790 = vmatmul.f32.vlgmr.msrb.gmra.mxu2 %v112_v51  ;;  %v1050_v50 = vld [vmem:[#allocation5 + $0x1c00] sm:$0xff]  ;;  %v1067_v51 = vld [vmem:[#allocation5 + $0x1c88] sm:$0xff] }
 0x1ea   :  { %2814 = vmatpush.msra.mxu0 %v1065_v52  ;;  %2854 = vmatpush.msra.mxu2 %v1097_v53  ;;  %v1082_v52 = vld [vmem:[#allocation5 + $0x1d00] sm:$0xff]  ;;  %v1099_v53 = vld [vmem:[#allocation5 + $0x1d88] sm:$0xff] }
 0x1eb   :  { %2769 = vmatpush.msrb.mxu1 %v1002_v54  ;;  %2809 = vmatpush.msrb.mxu3 %v1034_v55  ;;  %v114_v54 = vld [vmem:[#allocation2 + $0x1c0] sm:$0xff]  ;;  %v116_v55 = vld [vmem:[#allocation2 + $0x1d0] sm:$0xff] }
 0x1ec   :  { %2770 = vmatmul.f32.vlgmr.msrb.gmra.mxu1 %v111_v56  ;;  %2810 = vmatmul.f32.vlgmr.msrb.gmra.mxu3 %v113_v57  ;;  %v1129_v56 = vld [vmem:[#allocation5 + $0x1e78] sm:$0xff] }
 0x1ed   :  { %2815 = vmatpush.msra.mxu0 %v1064_v58  ;;  %2834 = vmatpush.msra.mxu1 %v1081_v59  ;;  %v1161_v57 = vld [vmem:[#allocation5 + $0x1f78] sm:$0xff]  ;;  %v1066_v58 = vld [vmem:[#allocation5 + $0x1c80] sm:$0xff] }
 0x1ee   :  { %2855 = vmatpush.msra.mxu2 %v1096_v60  ;;  %2874 = vmatpush.msra.mxu3 %v1113_v61  ;;  %v1098_v59 = vld [vmem:[#allocation5 + $0x1d80] sm:$0xff]  ;;  %v115_v60 = vld [vmem:[#allocation2 + $0x1c8] sm:$0xff]  ;;  %v117_v61 = vld [vmem:[#allocation2 + $0x1d8] sm:$0xff] }
 0x1ef   :  { %2816 = vmatpush.msra.mxu0 %v1063_v62  ;;  %2835 = vmatpush.msra.mxu1 %v1080_v63  ;;  %v1128_v62 = vld [vmem:[#allocation5 + $0x1e70] sm:$0xff]  ;;  %v1145_v63 = vld [vmem:[#allocation5 + $0x1ef8] sm:$0xff] }
 0x1f0   :  { %2856 = vmatpush.msra.mxu2 %v1095_v0  ;;  %2875 = vmatpush.msra.mxu3 %v1112_v1  ;;  %v1160_v0 = vld [vmem:[#allocation5 + $0x1f70] sm:$0xff]  ;;  %v1177_v1 = vld [vmem:[#allocation5 + $0x1ff8] sm:$0xff] }
 0x1f1   :  { %2817 = vmatpush.msra.mxu0 %v1062_v2  ;;  %2836 = vmatpush.msra.mxu1 %v1079_v3  ;;  %v1127_v2 = vld [vmem:[#allocation5 + $0x1e68] sm:$0xff]  ;;  %v1144_v3 = vld [vmem:[#allocation5 + $0x1ef0] sm:$0xff] }
 0x1f2   :  { %2857 = vmatpush.msra.mxu2 %v1094_v4  ;;  %2876 = vmatpush.msra.mxu3 %v1111_v5  ;;  %v1159_v4 = vld [vmem:[#allocation5 + $0x1f68] sm:$0xff]  ;;  %v1176_v5 = vld [vmem:[#allocation5 + $0x1ff0] sm:$0xff] }
 0x1f3   :  { %2818 = vmatpush.msra.mxu0 %v1061_v6  ;;  %2837 = vmatpush.msra.mxu1 %v1078_v7  ;;  %v1126_v6 = vld [vmem:[#allocation5 + $0x1e60] sm:$0xff]  ;;  %v1143_v7 = vld [vmem:[#allocation5 + $0x1ee8] sm:$0xff] }
 0x1f4   :  { %2858 = vmatpush.msra.mxu2 %v1093_v8  ;;  %2877 = vmatpush.msra.mxu3 %v1110_v9  ;;  %v1158_v8 = vld [vmem:[#allocation5 + $0x1f60] sm:$0xff]  ;;  %v1175_v9 = vld [vmem:[#allocation5 + $0x1fe8] sm:$0xff] }
 0x1f5   :  { %2819 = vmatpush.msra.mxu0 %v1060_v10  ;;  %2838 = vmatpush.msra.mxu1 %v1077_v11  ;;  %v1125_v10 = vld [vmem:[#allocation5 + $0x1e58] sm:$0xff]  ;;  %v1142_v11 = vld [vmem:[#allocation5 + $0x1ee0] sm:$0xff] }
 0x1f6   :  { %2859 = vmatpush.msra.mxu2 %v1092_v12  ;;  %2878 = vmatpush.msra.mxu3 %v1109_v13  ;;  %v1157_v12 = vld [vmem:[#allocation5 + $0x1f58] sm:$0xff]  ;;  %v1174_v13 = vld [vmem:[#allocation5 + $0x1fe0] sm:$0xff] }
 0x1f7   :  { %2820 = vmatpush.msra.mxu0 %v1059_v14  ;;  %2839 = vmatpush.msra.mxu1 %v1076_v15  ;;  %v1124_v14 = vld [vmem:[#allocation5 + $0x1e50] sm:$0xff]  ;;  %v1141_v15 = vld [vmem:[#allocation5 + $0x1ed8] sm:$0xff] }
 0x1f8   :  { %2860 = vmatpush.msra.mxu2 %v1091_v16  ;;  %2879 = vmatpush.msra.mxu3 %v1108_v17  ;;  %v1156_v16 = vld [vmem:[#allocation5 + $0x1f50] sm:$0xff]  ;;  %v1173_v17 = vld [vmem:[#allocation5 + $0x1fd8] sm:$0xff] }
 0x1f9   :  { %2821 = vmatpush.msra.mxu0 %v1058_v18  ;;  %2840 = vmatpush.msra.mxu1 %v1075_v19  ;;  %v1123_v18 = vld [vmem:[#allocation5 + $0x1e48] sm:$0xff]  ;;  %v1140_v19 = vld [vmem:[#allocation5 + $0x1ed0] sm:$0xff] }
 0x1fa   :  { %2861 = vmatpush.msra.mxu2 %v1090_v20  ;;  %2880 = vmatpush.msra.mxu3 %v1107_v21  ;;  %v1155_v20 = vld [vmem:[#allocation5 + $0x1f48] sm:$0xff]  ;;  %v1172_v21 = vld [vmem:[#allocation5 + $0x1fd0] sm:$0xff] }
 0x1fb   :  { %2822 = vmatpush.msra.mxu0 %v1057_v22  ;;  %2841 = vmatpush.msra.mxu1 %v1074_v23  ;;  %v1122_v22 = vld [vmem:[#allocation5 + $0x1e40] sm:$0xff]  ;;  %v1139_v23 = vld [vmem:[#allocation5 + $0x1ec8] sm:$0xff] }
 0x1fc   :  { %2862 = vmatpush.msra.mxu2 %v1089_v24  ;;  %2881 = vmatpush.msra.mxu3 %v1106_v25  ;;  %v1154_v24 = vld [vmem:[#allocation5 + $0x1f40] sm:$0xff]  ;;  %v1171_v25 = vld [vmem:[#allocation5 + $0x1fc8] sm:$0xff] }
 0x1fd   :  { %2823 = vmatpush.msra.mxu0 %v1056_v26  ;;  %2842 = vmatpush.msra.mxu1 %v1073_v27  ;;  %v1121_v26 = vld [vmem:[#allocation5 + $0x1e38] sm:$0xff]  ;;  %v1138_v27 = vld [vmem:[#allocation5 + $0x1ec0] sm:$0xff] }
 0x1fe   :  { %2863 = vmatpush.msra.mxu2 %v1088_v28  ;;  %2882 = vmatpush.msra.mxu3 %v1105_v29  ;;  %v1153_v28 = vld [vmem:[#allocation5 + $0x1f38] sm:$0xff]  ;;  %v1170_v29 = vld [vmem:[#allocation5 + $0x1fc0] sm:$0xff] }
 0x1ff   :  { %2824 = vmatpush.msra.mxu0 %v1055_v30  ;;  %2843 = vmatpush.msra.mxu1 %v1072_v31  ;;  %v1120_v30 = vld [vmem:[#allocation5 + $0x1e30] sm:$0xff]  ;;  %v1137_v31 = vld [vmem:[#allocation5 + $0x1eb8] sm:$0xff] }
 0x200   :  { %2864 = vmatpush.msra.mxu2 %v1087_v32  ;;  %2883 = vmatpush.msra.mxu3 %v1104_v33  ;;  %v1152_v32 = vld [vmem:[#allocation5 + $0x1f30] sm:$0xff]  ;;  %v1169_v33 = vld [vmem:[#allocation5 + $0x1fb8] sm:$0xff] }
 0x201   :  { %2825 = vmatpush.msra.mxu0 %v1054_v34  ;;  %2844 = vmatpush.msra.mxu1 %v1071_v35  ;;  %v1119_v34 = vld [vmem:[#allocation5 + $0x1e28] sm:$0xff]  ;;  %v1136_v35 = vld [vmem:[#allocation5 + $0x1eb0] sm:$0xff] }
 0x202   :  { %2865 = vmatpush.msra.mxu2 %v1086_v36  ;;  %2884 = vmatpush.msra.mxu3 %v1103_v37  ;;  %v1151_v36 = vld [vmem:[#allocation5 + $0x1f28] sm:$0xff]  ;;  %v1168_v37 = vld [vmem:[#allocation5 + $0x1fb0] sm:$0xff] }
 0x203   :  { %2826 = vmatpush.msra.mxu0 %v1053_v38  ;;  %2845 = vmatpush.msra.mxu1 %v1070_v39  ;;  %v1118_v38 = vld [vmem:[#allocation5 + $0x1e20] sm:$0xff]  ;;  %v1135_v39 = vld [vmem:[#allocation5 + $0x1ea8] sm:$0xff] }
 0x204   :  { %2866 = vmatpush.msra.mxu2 %v1085_v40  ;;  %2885 = vmatpush.msra.mxu3 %v1102_v41  ;;  %v1150_v40 = vld [vmem:[#allocation5 + $0x1f20] sm:$0xff]  ;;  %v1167_v41 = vld [vmem:[#allocation5 + $0x1fa8] sm:$0xff] }
 0x205   :  { %2827 = vmatpush.msra.mxu0 %v1052_v42  ;;  %2846 = vmatpush.msra.mxu1 %v1069_v43  ;;  %v1117_v42 = vld [vmem:[#allocation5 + $0x1e18] sm:$0xff]  ;;  %v1134_v43 = vld [vmem:[#allocation5 + $0x1ea0] sm:$0xff] }
 0x206   :  { %2867 = vmatpush.msra.mxu2 %v1084_v44  ;;  %2886 = vmatpush.msra.mxu3 %v1101_v45  ;;  %v1149_v44 = vld [vmem:[#allocation5 + $0x1f18] sm:$0xff]  ;;  %v1166_v45 = vld [vmem:[#allocation5 + $0x1fa0] sm:$0xff] }
 0x207   :  { %2828 = vmatpush.msra.mxu0 %v1051_v46  ;;  %2847 = vmatpush.msra.mxu1 %v1068_v47  ;;  %v1116_v46 = vld [vmem:[#allocation5 + $0x1e10] sm:$0xff]  ;;  %v1133_v47 = vld [vmem:[#allocation5 + $0x1e98] sm:$0xff] }
 0x208   :  { %2868 = vmatpush.msra.mxu2 %v1083_v48  ;;  %2887 = vmatpush.msra.mxu3 %v1100_v49  ;;  %v1148_v48 = vld [vmem:[#allocation5 + $0x1f10] sm:$0xff]  ;;  %v1165_v49 = vld [vmem:[#allocation5 + $0x1f98] sm:$0xff] }
 0x209   :  { %2829 = vmatpush.msra.mxu0 %v1050_v50  ;;  %2848 = vmatpush.msra.mxu1 %v1067_v51  ;;  %v1115_v50 = vld [vmem:[#allocation5 + $0x1e08] sm:$0xff]  ;;  %v1132_v51 = vld [vmem:[#allocation5 + $0x1e90] sm:$0xff] }
 0x20a   :  { %2869 = vmatpush.msra.mxu2 %v1082_v52  ;;  %2888 = vmatpush.msra.mxu3 %v1099_v53  ;;  %v1147_v52 = vld [vmem:[#allocation5 + $0x1f08] sm:$0xff]  ;;  %v1164_v53 = vld [vmem:[#allocation5 + $0x1f90] sm:$0xff] }
 0x20b   :  { %2830 = vmatmul.f32.vlgmr.msra.gmra.mxu0 %v114_v54  ;;  %2870 = vmatmul.f32.vlgmr.msra.gmra.mxu2 %v116_v55  ;;  %v1114_v54 = vld [vmem:[#allocation5 + $0x1e00] sm:$0xff]  ;;  %v1131_v55 = vld [vmem:[#allocation5 + $0x1e88] sm:$0xff] }
 0x20c   :  { %2894 = vmatpush.msrb.mxu0 %v1129_v56  ;;  %2934 = vmatpush.msrb.mxu2 %v1161_v57  ;;  %v1146_v56 = vld [vmem:[#allocation5 + $0x1f00] sm:$0xff]  ;;  %v1163_v57 = vld [vmem:[#allocation5 + $0x1f88] sm:$0xff] }
 0x20d   :  { %2849 = vmatpush.msra.mxu1 %v1066_v58  ;;  %2889 = vmatpush.msra.mxu3 %v1098_v59  ;;  %v118_v58 = vld [vmem:[#allocation2 + $0x1e0] sm:$0xff]  ;;  %v120_v59 = vld [vmem:[#allocation2 + $0x1f0] sm:$0xff] }
 0x20e   :  { %2850 = vmatmul.f32.vlgmr.msra.gmra.mxu1 %v115_v60  ;;  %2890 = vmatmul.f32.vlgmr.msra.gmra.mxu3 %v117_v61  ;;  %v1193_v60 = vld [vmem:[#allocation5 + $0x2078] sm:$0xff] }
 0x20f   :  { %2895 = vmatpush.msrb.mxu0 %v1128_v62  ;;  %2914 = vmatpush.msrb.mxu1 %v1145_v63  ;;  %v1225_v61 = vld [vmem:[#allocation5 + $0x2178] sm:$0xff]  ;;  %v1130_v62 = vld [vmem:[#allocation5 + $0x1e80] sm:$0xff] }
 0x210   :  { %2935 = vmatpush.msrb.mxu2 %v1160_v0  ;;  %2954 = vmatpush.msrb.mxu3 %v1177_v1  ;;  %v1162_v63 = vld [vmem:[#allocation5 + $0x1f80] sm:$0xff]  ;;  %v119_v0 = vld [vmem:[#allocation2 + $0x1e8] sm:$0xff]  ;;  %v121_v1 = vld [vmem:[#allocation2 + $0x1f8] sm:$0xff] }
 0x211   :  { %2896 = vmatpush.msrb.mxu0 %v1127_v2  ;;  %2915 = vmatpush.msrb.mxu1 %v1144_v3  ;;  %v1192_v2 = vld [vmem:[#allocation5 + $0x2070] sm:$0xff]  ;;  %v1209_v3 = vld [vmem:[#allocation5 + $0x20f8] sm:$0xff] }
 0x212   :  { %2936 = vmatpush.msrb.mxu2 %v1159_v4  ;;  %2955 = vmatpush.msrb.mxu3 %v1176_v5  ;;  %v1224_v4 = vld [vmem:[#allocation5 + $0x2170] sm:$0xff]  ;;  %v1241_v5 = vld [vmem:[#allocation5 + $0x21f8] sm:$0xff] }
 0x213   :  { %2897 = vmatpush.msrb.mxu0 %v1126_v6  ;;  %2916 = vmatpush.msrb.mxu1 %v1143_v7  ;;  %v1191_v6 = vld [vmem:[#allocation5 + $0x2068] sm:$0xff]  ;;  %v1208_v7 = vld [vmem:[#allocation5 + $0x20f0] sm:$0xff] }
 0x214   :  { %2937 = vmatpush.msrb.mxu2 %v1158_v8  ;;  %2956 = vmatpush.msrb.mxu3 %v1175_v9  ;;  %v1223_v8 = vld [vmem:[#allocation5 + $0x2168] sm:$0xff]  ;;  %v1240_v9 = vld [vmem:[#allocation5 + $0x21f0] sm:$0xff] }
 0x215   :  { %2898 = vmatpush.msrb.mxu0 %v1125_v10  ;;  %2917 = vmatpush.msrb.mxu1 %v1142_v11  ;;  %v1190_v10 = vld [vmem:[#allocation5 + $0x2060] sm:$0xff]  ;;  %v1207_v11 = vld [vmem:[#allocation5 + $0x20e8] sm:$0xff] }
 0x216   :  { %2938 = vmatpush.msrb.mxu2 %v1157_v12  ;;  %2957 = vmatpush.msrb.mxu3 %v1174_v13  ;;  %v1222_v12 = vld [vmem:[#allocation5 + $0x2160] sm:$0xff]  ;;  %v1239_v13 = vld [vmem:[#allocation5 + $0x21e8] sm:$0xff] }
 0x217   :  { %2899 = vmatpush.msrb.mxu0 %v1124_v14  ;;  %2918 = vmatpush.msrb.mxu1 %v1141_v15  ;;  %v1189_v14 = vld [vmem:[#allocation5 + $0x2058] sm:$0xff]  ;;  %v1206_v15 = vld [vmem:[#allocation5 + $0x20e0] sm:$0xff] }
 0x218   :  { %2939 = vmatpush.msrb.mxu2 %v1156_v16  ;;  %2958 = vmatpush.msrb.mxu3 %v1173_v17  ;;  %v1221_v16 = vld [vmem:[#allocation5 + $0x2158] sm:$0xff]  ;;  %v1238_v17 = vld [vmem:[#allocation5 + $0x21e0] sm:$0xff] }
 0x219   :  { %2900 = vmatpush.msrb.mxu0 %v1123_v18  ;;  %2919 = vmatpush.msrb.mxu1 %v1140_v19  ;;  %v1188_v18 = vld [vmem:[#allocation5 + $0x2050] sm:$0xff]  ;;  %v1205_v19 = vld [vmem:[#allocation5 + $0x20d8] sm:$0xff] }
 0x21a   :  { %2940 = vmatpush.msrb.mxu2 %v1155_v20  ;;  %2959 = vmatpush.msrb.mxu3 %v1172_v21  ;;  %v1220_v20 = vld [vmem:[#allocation5 + $0x2150] sm:$0xff]  ;;  %v1237_v21 = vld [vmem:[#allocation5 + $0x21d8] sm:$0xff] }
 0x21b   :  { %2901 = vmatpush.msrb.mxu0 %v1122_v22  ;;  %2920 = vmatpush.msrb.mxu1 %v1139_v23  ;;  %v1187_v22 = vld [vmem:[#allocation5 + $0x2048] sm:$0xff]  ;;  %v1204_v23 = vld [vmem:[#allocation5 + $0x20d0] sm:$0xff] }
 0x21c   :  { %2941 = vmatpush.msrb.mxu2 %v1154_v24  ;;  %2960 = vmatpush.msrb.mxu3 %v1171_v25  ;;  %v1219_v24 = vld [vmem:[#allocation5 + $0x2148] sm:$0xff]  ;;  %v1236_v25 = vld [vmem:[#allocation5 + $0x21d0] sm:$0xff] }
 0x21d   :  { %2902 = vmatpush.msrb.mxu0 %v1121_v26  ;;  %2921 = vmatpush.msrb.mxu1 %v1138_v27  ;;  %v1186_v26 = vld [vmem:[#allocation5 + $0x2040] sm:$0xff]  ;;  %v1203_v27 = vld [vmem:[#allocation5 + $0x20c8] sm:$0xff] }
 0x21e   :  { %2942 = vmatpush.msrb.mxu2 %v1153_v28  ;;  %2961 = vmatpush.msrb.mxu3 %v1170_v29  ;;  %v1218_v28 = vld [vmem:[#allocation5 + $0x2140] sm:$0xff]  ;;  %v1235_v29 = vld [vmem:[#allocation5 + $0x21c8] sm:$0xff] }
 0x21f   :  { %2903 = vmatpush.msrb.mxu0 %v1120_v30  ;;  %2922 = vmatpush.msrb.mxu1 %v1137_v31  ;;  %v1185_v30 = vld [vmem:[#allocation5 + $0x2038] sm:$0xff]  ;;  %v1202_v31 = vld [vmem:[#allocation5 + $0x20c0] sm:$0xff] }
 0x220   :  { %2943 = vmatpush.msrb.mxu2 %v1152_v32  ;;  %2962 = vmatpush.msrb.mxu3 %v1169_v33  ;;  %v1217_v32 = vld [vmem:[#allocation5 + $0x2138] sm:$0xff]  ;;  %v1234_v33 = vld [vmem:[#allocation5 + $0x21c0] sm:$0xff] }
 0x221   :  { %2904 = vmatpush.msrb.mxu0 %v1119_v34  ;;  %2923 = vmatpush.msrb.mxu1 %v1136_v35  ;;  %v1184_v34 = vld [vmem:[#allocation5 + $0x2030] sm:$0xff]  ;;  %v1201_v35 = vld [vmem:[#allocation5 + $0x20b8] sm:$0xff] }
 0x222   :  { %2944 = vmatpush.msrb.mxu2 %v1151_v36  ;;  %2963 = vmatpush.msrb.mxu3 %v1168_v37  ;;  %v1216_v36 = vld [vmem:[#allocation5 + $0x2130] sm:$0xff]  ;;  %v1233_v37 = vld [vmem:[#allocation5 + $0x21b8] sm:$0xff] }
 0x223   :  { %2905 = vmatpush.msrb.mxu0 %v1118_v38  ;;  %2924 = vmatpush.msrb.mxu1 %v1135_v39  ;;  %v1183_v38 = vld [vmem:[#allocation5 + $0x2028] sm:$0xff]  ;;  %v1200_v39 = vld [vmem:[#allocation5 + $0x20b0] sm:$0xff] }
 0x224   :  { %2945 = vmatpush.msrb.mxu2 %v1150_v40  ;;  %2964 = vmatpush.msrb.mxu3 %v1167_v41  ;;  %v1215_v40 = vld [vmem:[#allocation5 + $0x2128] sm:$0xff]  ;;  %v1232_v41 = vld [vmem:[#allocation5 + $0x21b0] sm:$0xff] }
 0x225   :  { %2906 = vmatpush.msrb.mxu0 %v1117_v42  ;;  %2925 = vmatpush.msrb.mxu1 %v1134_v43  ;;  %v1182_v42 = vld [vmem:[#allocation5 + $0x2020] sm:$0xff]  ;;  %v1199_v43 = vld [vmem:[#allocation5 + $0x20a8] sm:$0xff] }
 0x226   :  { %2946 = vmatpush.msrb.mxu2 %v1149_v44  ;;  %2965 = vmatpush.msrb.mxu3 %v1166_v45  ;;  %v1214_v44 = vld [vmem:[#allocation5 + $0x2120] sm:$0xff]  ;;  %v1231_v45 = vld [vmem:[#allocation5 + $0x21a8] sm:$0xff] }
 0x227   :  { %2907 = vmatpush.msrb.mxu0 %v1116_v46  ;;  %2926 = vmatpush.msrb.mxu1 %v1133_v47  ;;  %v1181_v46 = vld [vmem:[#allocation5 + $0x2018] sm:$0xff]  ;;  %v1198_v47 = vld [vmem:[#allocation5 + $0x20a0] sm:$0xff] }
 0x228   :  { %2947 = vmatpush.msrb.mxu2 %v1148_v48  ;;  %2966 = vmatpush.msrb.mxu3 %v1165_v49  ;;  %v1213_v48 = vld [vmem:[#allocation5 + $0x2118] sm:$0xff]  ;;  %v1230_v49 = vld [vmem:[#allocation5 + $0x21a0] sm:$0xff] }
 0x229   :  { %2908 = vmatpush.msrb.mxu0 %v1115_v50  ;;  %2927 = vmatpush.msrb.mxu1 %v1132_v51  ;;  %v1180_v50 = vld [vmem:[#allocation5 + $0x2010] sm:$0xff]  ;;  %v1197_v51 = vld [vmem:[#allocation5 + $0x2098] sm:$0xff] }
 0x22a   :  { %2948 = vmatpush.msrb.mxu2 %v1147_v52  ;;  %2967 = vmatpush.msrb.mxu3 %v1164_v53  ;;  %v1212_v52 = vld [vmem:[#allocation5 + $0x2110] sm:$0xff]  ;;  %v1229_v53 = vld [vmem:[#allocation5 + $0x2198] sm:$0xff] }
 0x22b   :  { %2909 = vmatpush.msrb.mxu0 %v1114_v54  ;;  %2928 = vmatpush.msrb.mxu1 %v1131_v55  ;;  %v1179_v54 = vld [vmem:[#allocation5 + $0x2008] sm:$0xff]  ;;  %v1196_v55 = vld [vmem:[#allocation5 + $0x2090] sm:$0xff] }
 0x22c   :  { %2949 = vmatpush.msrb.mxu2 %v1146_v56  ;;  %2968 = vmatpush.msrb.mxu3 %v1163_v57  ;;  %v1211_v56 = vld [vmem:[#allocation5 + $0x2108] sm:$0xff]  ;;  %v1228_v57 = vld [vmem:[#allocation5 + $0x2190] sm:$0xff] }
 0x22d   :  { %2910 = vmatmul.f32.vlgmr.msrb.gmra.mxu0 %v118_v58  ;;  %2950 = vmatmul.f32.vlgmr.msrb.gmra.mxu2 %v120_v59  ;;  %v1178_v58 = vld [vmem:[#allocation5 + $0x2000] sm:$0xff]  ;;  %v1195_v59 = vld [vmem:[#allocation5 + $0x2088] sm:$0xff] }
 0x22e   :  { %2974 = vmatpush.msra.mxu0 %v1193_v60  ;;  %3014 = vmatpush.msra.mxu2 %v1225_v61  ;;  %v1210_v60 = vld [vmem:[#allocation5 + $0x2100] sm:$0xff]  ;;  %v1227_v61 = vld [vmem:[#allocation5 + $0x2188] sm:$0xff] }
 0x22f   :  { %2929 = vmatpush.msrb.mxu1 %v1130_v62  ;;  %2969 = vmatpush.msrb.mxu3 %v1162_v63  ;;  %v122_v62 = vld [vmem:[#allocation2 + $0x200] sm:$0xff]  ;;  %v124_v63 = vld [vmem:[#allocation2 + $0x210] sm:$0xff] }
 0x230   :  { %2930 = vmatmul.f32.vlgmr.msrb.gmra.mxu1 %v119_v0  ;;  %2970 = vmatmul.f32.vlgmr.msrb.gmra.mxu3 %v121_v1  ;;  %v1257_v0 = vld [vmem:[#allocation5 + $0x2278] sm:$0xff] }
 0x231   :  { %2975 = vmatpush.msra.mxu0 %v1192_v2  ;;  %2994 = vmatpush.msra.mxu1 %v1209_v3  ;;  %v1289_v1 = vld [vmem:[#allocation5 + $0x2378] sm:$0xff]  ;;  %v1194_v2 = vld [vmem:[#allocation5 + $0x2080] sm:$0xff] }
 0x232   :  { %3015 = vmatpush.msra.mxu2 %v1224_v4  ;;  %3034 = vmatpush.msra.mxu3 %v1241_v5  ;;  %v1226_v3 = vld [vmem:[#allocation5 + $0x2180] sm:$0xff]  ;;  %v123_v4 = vld [vmem:[#allocation2 + $0x208] sm:$0xff]  ;;  %v125_v5 = vld [vmem:[#allocation2 + $0x218] sm:$0xff] }
 0x233   :  { %2976 = vmatpush.msra.mxu0 %v1191_v6  ;;  %2995 = vmatpush.msra.mxu1 %v1208_v7  ;;  %v1256_v6 = vld [vmem:[#allocation5 + $0x2270] sm:$0xff]  ;;  %v1273_v7 = vld [vmem:[#allocation5 + $0x22f8] sm:$0xff] }
 0x234   :  { %3016 = vmatpush.msra.mxu2 %v1223_v8  ;;  %3035 = vmatpush.msra.mxu3 %v1240_v9  ;;  %v1288_v8 = vld [vmem:[#allocation5 + $0x2370] sm:$0xff]  ;;  %v1305_v9 = vld [vmem:[#allocation5 + $0x23f8] sm:$0xff] }
 0x235   :  { %2977 = vmatpush.msra.mxu0 %v1190_v10  ;;  %2996 = vmatpush.msra.mxu1 %v1207_v11  ;;  %v1255_v10 = vld [vmem:[#allocation5 + $0x2268] sm:$0xff]  ;;  %v1272_v11 = vld [vmem:[#allocation5 + $0x22f0] sm:$0xff] }
 0x236   :  { %3017 = vmatpush.msra.mxu2 %v1222_v12  ;;  %3036 = vmatpush.msra.mxu3 %v1239_v13  ;;  %v1287_v12 = vld [vmem:[#allocation5 + $0x2368] sm:$0xff]  ;;  %v1304_v13 = vld [vmem:[#allocation5 + $0x23f0] sm:$0xff] }
 0x237   :  { %2978 = vmatpush.msra.mxu0 %v1189_v14  ;;  %2997 = vmatpush.msra.mxu1 %v1206_v15  ;;  %v1254_v14 = vld [vmem:[#allocation5 + $0x2260] sm:$0xff]  ;;  %v1271_v15 = vld [vmem:[#allocation5 + $0x22e8] sm:$0xff] }
 0x238   :  { %3018 = vmatpush.msra.mxu2 %v1221_v16  ;;  %3037 = vmatpush.msra.mxu3 %v1238_v17  ;;  %v1286_v16 = vld [vmem:[#allocation5 + $0x2360] sm:$0xff]  ;;  %v1303_v17 = vld [vmem:[#allocation5 + $0x23e8] sm:$0xff] }
 0x239   :  { %2979 = vmatpush.msra.mxu0 %v1188_v18  ;;  %2998 = vmatpush.msra.mxu1 %v1205_v19  ;;  %v1253_v18 = vld [vmem:[#allocation5 + $0x2258] sm:$0xff]  ;;  %v1270_v19 = vld [vmem:[#allocation5 + $0x22e0] sm:$0xff] }
 0x23a   :  { %3019 = vmatpush.msra.mxu2 %v1220_v20  ;;  %3038 = vmatpush.msra.mxu3 %v1237_v21  ;;  %v1285_v20 = vld [vmem:[#allocation5 + $0x2358] sm:$0xff]  ;;  %v1302_v21 = vld [vmem:[#allocation5 + $0x23e0] sm:$0xff] }
 0x23b   :  { %2980 = vmatpush.msra.mxu0 %v1187_v22  ;;  %2999 = vmatpush.msra.mxu1 %v1204_v23  ;;  %v1252_v22 = vld [vmem:[#allocation5 + $0x2250] sm:$0xff]  ;;  %v1269_v23 = vld [vmem:[#allocation5 + $0x22d8] sm:$0xff] }
 0x23c   :  { %3020 = vmatpush.msra.mxu2 %v1219_v24  ;;  %3039 = vmatpush.msra.mxu3 %v1236_v25  ;;  %v1284_v24 = vld [vmem:[#allocation5 + $0x2350] sm:$0xff]  ;;  %v1301_v25 = vld [vmem:[#allocation5 + $0x23d8] sm:$0xff] }
 0x23d   :  { %2981 = vmatpush.msra.mxu0 %v1186_v26  ;;  %3000 = vmatpush.msra.mxu1 %v1203_v27  ;;  %v1251_v26 = vld [vmem:[#allocation5 + $0x2248] sm:$0xff]  ;;  %v1268_v27 = vld [vmem:[#allocation5 + $0x22d0] sm:$0xff] }
 0x23e   :  { %3021 = vmatpush.msra.mxu2 %v1218_v28  ;;  %3040 = vmatpush.msra.mxu3 %v1235_v29  ;;  %v1283_v28 = vld [vmem:[#allocation5 + $0x2348] sm:$0xff]  ;;  %v1300_v29 = vld [vmem:[#allocation5 + $0x23d0] sm:$0xff] }
 0x23f   :  { %2982 = vmatpush.msra.mxu0 %v1185_v30  ;;  %3001 = vmatpush.msra.mxu1 %v1202_v31  ;;  %v1250_v30 = vld [vmem:[#allocation5 + $0x2240] sm:$0xff]  ;;  %v1267_v31 = vld [vmem:[#allocation5 + $0x22c8] sm:$0xff] }
 0x240   :  { %3022 = vmatpush.msra.mxu2 %v1217_v32  ;;  %3041 = vmatpush.msra.mxu3 %v1234_v33  ;;  %v1282_v32 = vld [vmem:[#allocation5 + $0x2340] sm:$0xff]  ;;  %v1299_v33 = vld [vmem:[#allocation5 + $0x23c8] sm:$0xff] }
 0x241   :  { %2983 = vmatpush.msra.mxu0 %v1184_v34  ;;  %3002 = vmatpush.msra.mxu1 %v1201_v35  ;;  %v1249_v34 = vld [vmem:[#allocation5 + $0x2238] sm:$0xff]  ;;  %v1266_v35 = vld [vmem:[#allocation5 + $0x22c0] sm:$0xff] }
 0x242   :  { %3023 = vmatpush.msra.mxu2 %v1216_v36  ;;  %3042 = vmatpush.msra.mxu3 %v1233_v37  ;;  %v1281_v36 = vld [vmem:[#allocation5 + $0x2338] sm:$0xff]  ;;  %v1298_v37 = vld [vmem:[#allocation5 + $0x23c0] sm:$0xff] }
 0x243   :  { %2984 = vmatpush.msra.mxu0 %v1183_v38  ;;  %3003 = vmatpush.msra.mxu1 %v1200_v39  ;;  %v1248_v38 = vld [vmem:[#allocation5 + $0x2230] sm:$0xff]  ;;  %v1265_v39 = vld [vmem:[#allocation5 + $0x22b8] sm:$0xff] }
 0x244   :  { %3024 = vmatpush.msra.mxu2 %v1215_v40  ;;  %3043 = vmatpush.msra.mxu3 %v1232_v41  ;;  %v1280_v40 = vld [vmem:[#allocation5 + $0x2330] sm:$0xff]  ;;  %v1297_v41 = vld [vmem:[#allocation5 + $0x23b8] sm:$0xff] }
 0x245   :  { %2985 = vmatpush.msra.mxu0 %v1182_v42  ;;  %3004 = vmatpush.msra.mxu1 %v1199_v43  ;;  %v1247_v42 = vld [vmem:[#allocation5 + $0x2228] sm:$0xff]  ;;  %v1264_v43 = vld [vmem:[#allocation5 + $0x22b0] sm:$0xff] }
 0x246   :  { %3025 = vmatpush.msra.mxu2 %v1214_v44  ;;  %3044 = vmatpush.msra.mxu3 %v1231_v45  ;;  %v1279_v44 = vld [vmem:[#allocation5 + $0x2328] sm:$0xff]  ;;  %v1296_v45 = vld [vmem:[#allocation5 + $0x23b0] sm:$0xff] }
 0x247   :  { %2986 = vmatpush.msra.mxu0 %v1181_v46  ;;  %3005 = vmatpush.msra.mxu1 %v1198_v47  ;;  %v1246_v46 = vld [vmem:[#allocation5 + $0x2220] sm:$0xff]  ;;  %v1263_v47 = vld [vmem:[#allocation5 + $0x22a8] sm:$0xff] }
 0x248   :  { %3026 = vmatpush.msra.mxu2 %v1213_v48  ;;  %3045 = vmatpush.msra.mxu3 %v1230_v49  ;;  %v1278_v48 = vld [vmem:[#allocation5 + $0x2320] sm:$0xff]  ;;  %v1295_v49 = vld [vmem:[#allocation5 + $0x23a8] sm:$0xff] }
 0x249   :  { %2987 = vmatpush.msra.mxu0 %v1180_v50  ;;  %3006 = vmatpush.msra.mxu1 %v1197_v51  ;;  %v1245_v50 = vld [vmem:[#allocation5 + $0x2218] sm:$0xff]  ;;  %v1262_v51 = vld [vmem:[#allocation5 + $0x22a0] sm:$0xff] }
 0x24a   :  { %3027 = vmatpush.msra.mxu2 %v1212_v52  ;;  %3046 = vmatpush.msra.mxu3 %v1229_v53  ;;  %v1277_v52 = vld [vmem:[#allocation5 + $0x2318] sm:$0xff]  ;;  %v1294_v53 = vld [vmem:[#allocation5 + $0x23a0] sm:$0xff] }
 0x24b   :  { %2988 = vmatpush.msra.mxu0 %v1179_v54  ;;  %3007 = vmatpush.msra.mxu1 %v1196_v55  ;;  %v1244_v54 = vld [vmem:[#allocation5 + $0x2210] sm:$0xff]  ;;  %v1261_v55 = vld [vmem:[#allocation5 + $0x2298] sm:$0xff] }
 0x24c   :  { %3028 = vmatpush.msra.mxu2 %v1211_v56  ;;  %3047 = vmatpush.msra.mxu3 %v1228_v57  ;;  %v1276_v56 = vld [vmem:[#allocation5 + $0x2310] sm:$0xff]  ;;  %v1293_v57 = vld [vmem:[#allocation5 + $0x2398] sm:$0xff] }
 0x24d   :  { %2989 = vmatpush.msra.mxu0 %v1178_v58  ;;  %3008 = vmatpush.msra.mxu1 %v1195_v59  ;;  %v1243_v58 = vld [vmem:[#allocation5 + $0x2208] sm:$0xff]  ;;  %v1260_v59 = vld [vmem:[#allocation5 + $0x2290] sm:$0xff] }
 0x24e   :  { %3029 = vmatpush.msra.mxu2 %v1210_v60  ;;  %3048 = vmatpush.msra.mxu3 %v1227_v61  ;;  %v1275_v60 = vld [vmem:[#allocation5 + $0x2308] sm:$0xff]  ;;  %v1292_v61 = vld [vmem:[#allocation5 + $0x2390] sm:$0xff] }
 0x24f   :  { %2990 = vmatmul.f32.vlgmr.msra.gmra.mxu0 %v122_v62  ;;  %3030 = vmatmul.f32.vlgmr.msra.gmra.mxu2 %v124_v63  ;;  %v1242_v62 = vld [vmem:[#allocation5 + $0x2200] sm:$0xff]  ;;  %v1259_v63 = vld [vmem:[#allocation5 + $0x2288] sm:$0xff] }
 0x250   :  { %3054 = vmatpush.msrb.mxu0 %v1257_v0  ;;  %3094 = vmatpush.msrb.mxu2 %v1289_v1  ;;  %v1274_v0 = vld [vmem:[#allocation5 + $0x2300] sm:$0xff]  ;;  %v1291_v1 = vld [vmem:[#allocation5 + $0x2388] sm:$0xff] }
 0x251   :  { %3009 = vmatpush.msra.mxu1 %v1194_v2  ;;  %3049 = vmatpush.msra.mxu3 %v1226_v3  ;;  %v126_v2 = vld [vmem:[#allocation2 + $0x220] sm:$0xff]  ;;  %v128_v3 = vld [vmem:[#allocation2 + $0x230] sm:$0xff] }
 0x252   :  { %3010 = vmatmul.f32.vlgmr.msra.gmra.mxu1 %v123_v4  ;;  %3050 = vmatmul.f32.vlgmr.msra.gmra.mxu3 %v125_v5  ;;  %v1321_v4 = vld [vmem:[#allocation5 + $0x2478] sm:$0xff] }
 0x253   :  { %3055 = vmatpush.msrb.mxu0 %v1256_v6  ;;  %3074 = vmatpush.msrb.mxu1 %v1273_v7  ;;  %v1353_v5 = vld [vmem:[#allocation5 + $0x2578] sm:$0xff]  ;;  %v1258_v6 = vld [vmem:[#allocation5 + $0x2280] sm:$0xff] }
 0x254   :  { %3095 = vmatpush.msrb.mxu2 %v1288_v8  ;;  %3114 = vmatpush.msrb.mxu3 %v1305_v9  ;;  %v1290_v7 = vld [vmem:[#allocation5 + $0x2380] sm:$0xff]  ;;  %v127_v8 = vld [vmem:[#allocation2 + $0x228] sm:$0xff]  ;;  %v129_v9 = vld [vmem:[#allocation2 + $0x238] sm:$0xff] }
 0x255   :  { %3056 = vmatpush.msrb.mxu0 %v1255_v10  ;;  %3075 = vmatpush.msrb.mxu1 %v1272_v11  ;;  %v1320_v10 = vld [vmem:[#allocation5 + $0x2470] sm:$0xff]  ;;  %v1337_v11 = vld [vmem:[#allocation5 + $0x24f8] sm:$0xff] }
 0x256   :  { %3096 = vmatpush.msrb.mxu2 %v1287_v12  ;;  %3115 = vmatpush.msrb.mxu3 %v1304_v13  ;;  %v1352_v12 = vld [vmem:[#allocation5 + $0x2570] sm:$0xff]  ;;  %v1369_v13 = vld [vmem:[#allocation5 + $0x25f8] sm:$0xff] }
 0x257   :  { %3057 = vmatpush.msrb.mxu0 %v1254_v14  ;;  %3076 = vmatpush.msrb.mxu1 %v1271_v15  ;;  %v1319_v14 = vld [vmem:[#allocation5 + $0x2468] sm:$0xff]  ;;  %v1336_v15 = vld [vmem:[#allocation5 + $0x24f0] sm:$0xff] }
 0x258   :  { %3097 = vmatpush.msrb.mxu2 %v1286_v16  ;;  %3116 = vmatpush.msrb.mxu3 %v1303_v17  ;;  %v1351_v16 = vld [vmem:[#allocation5 + $0x2568] sm:$0xff]  ;;  %v1368_v17 = vld [vmem:[#allocation5 + $0x25f0] sm:$0xff] }
 0x259   :  { %3058 = vmatpush.msrb.mxu0 %v1253_v18  ;;  %3077 = vmatpush.msrb.mxu1 %v1270_v19  ;;  %v1318_v18 = vld [vmem:[#allocation5 + $0x2460] sm:$0xff]  ;;  %v1335_v19 = vld [vmem:[#allocation5 + $0x24e8] sm:$0xff] }
 0x25a   :  { %3098 = vmatpush.msrb.mxu2 %v1285_v20  ;;  %3117 = vmatpush.msrb.mxu3 %v1302_v21  ;;  %v1350_v20 = vld [vmem:[#allocation5 + $0x2560] sm:$0xff]  ;;  %v1367_v21 = vld [vmem:[#allocation5 + $0x25e8] sm:$0xff] }
 0x25b   :  { %3059 = vmatpush.msrb.mxu0 %v1252_v22  ;;  %3078 = vmatpush.msrb.mxu1 %v1269_v23  ;;  %v1317_v22 = vld [vmem:[#allocation5 + $0x2458] sm:$0xff]  ;;  %v1334_v23 = vld [vmem:[#allocation5 + $0x24e0] sm:$0xff] }
 0x25c   :  { %3099 = vmatpush.msrb.mxu2 %v1284_v24  ;;  %3118 = vmatpush.msrb.mxu3 %v1301_v25  ;;  %v1349_v24 = vld [vmem:[#allocation5 + $0x2558] sm:$0xff]  ;;  %v1366_v25 = vld [vmem:[#allocation5 + $0x25e0] sm:$0xff] }
 0x25d   :  { %3060 = vmatpush.msrb.mxu0 %v1251_v26  ;;  %3079 = vmatpush.msrb.mxu1 %v1268_v27  ;;  %v1316_v26 = vld [vmem:[#allocation5 + $0x2450] sm:$0xff]  ;;  %v1333_v27 = vld [vmem:[#allocation5 + $0x24d8] sm:$0xff] }
 0x25e   :  { %3100 = vmatpush.msrb.mxu2 %v1283_v28  ;;  %3119 = vmatpush.msrb.mxu3 %v1300_v29  ;;  %v1348_v28 = vld [vmem:[#allocation5 + $0x2550] sm:$0xff]  ;;  %v1365_v29 = vld [vmem:[#allocation5 + $0x25d8] sm:$0xff] }
 0x25f   :  { %3061 = vmatpush.msrb.mxu0 %v1250_v30  ;;  %3080 = vmatpush.msrb.mxu1 %v1267_v31  ;;  %v1315_v30 = vld [vmem:[#allocation5 + $0x2448] sm:$0xff]  ;;  %v1332_v31 = vld [vmem:[#allocation5 + $0x24d0] sm:$0xff] }
 0x260   :  { %3101 = vmatpush.msrb.mxu2 %v1282_v32  ;;  %3120 = vmatpush.msrb.mxu3 %v1299_v33  ;;  %v1347_v32 = vld [vmem:[#allocation5 + $0x2548] sm:$0xff]  ;;  %v1364_v33 = vld [vmem:[#allocation5 + $0x25d0] sm:$0xff] }
 0x261   :  { %3062 = vmatpush.msrb.mxu0 %v1249_v34  ;;  %3081 = vmatpush.msrb.mxu1 %v1266_v35  ;;  %v1314_v34 = vld [vmem:[#allocation5 + $0x2440] sm:$0xff]  ;;  %v1331_v35 = vld [vmem:[#allocation5 + $0x24c8] sm:$0xff] }
 0x262   :  { %3102 = vmatpush.msrb.mxu2 %v1281_v36  ;;  %3121 = vmatpush.msrb.mxu3 %v1298_v37  ;;  %v1346_v36 = vld [vmem:[#allocation5 + $0x2540] sm:$0xff]  ;;  %v1363_v37 = vld [vmem:[#allocation5 + $0x25c8] sm:$0xff] }
 0x263   :  { %3063 = vmatpush.msrb.mxu0 %v1248_v38  ;;  %3082 = vmatpush.msrb.mxu1 %v1265_v39  ;;  %v1313_v38 = vld [vmem:[#allocation5 + $0x2438] sm:$0xff]  ;;  %v1330_v39 = vld [vmem:[#allocation5 + $0x24c0] sm:$0xff] }
 0x264   :  { %3103 = vmatpush.msrb.mxu2 %v1280_v40  ;;  %3122 = vmatpush.msrb.mxu3 %v1297_v41  ;;  %v1345_v40 = vld [vmem:[#allocation5 + $0x2538] sm:$0xff]  ;;  %v1362_v41 = vld [vmem:[#allocation5 + $0x25c0] sm:$0xff] }
 0x265   :  { %3064 = vmatpush.msrb.mxu0 %v1247_v42  ;;  %3083 = vmatpush.msrb.mxu1 %v1264_v43  ;;  %v1312_v42 = vld [vmem:[#allocation5 + $0x2430] sm:$0xff]  ;;  %v1329_v43 = vld [vmem:[#allocation5 + $0x24b8] sm:$0xff] }
 0x266   :  { %3104 = vmatpush.msrb.mxu2 %v1279_v44  ;;  %3123 = vmatpush.msrb.mxu3 %v1296_v45  ;;  %v1344_v44 = vld [vmem:[#allocation5 + $0x2530] sm:$0xff]  ;;  %v1361_v45 = vld [vmem:[#allocation5 + $0x25b8] sm:$0xff] }
 0x267   :  { %3065 = vmatpush.msrb.mxu0 %v1246_v46  ;;  %3084 = vmatpush.msrb.mxu1 %v1263_v47  ;;  %v1311_v46 = vld [vmem:[#allocation5 + $0x2428] sm:$0xff]  ;;  %v1328_v47 = vld [vmem:[#allocation5 + $0x24b0] sm:$0xff] }
 0x268   :  { %3105 = vmatpush.msrb.mxu2 %v1278_v48  ;;  %3124 = vmatpush.msrb.mxu3 %v1295_v49  ;;  %v1343_v48 = vld [vmem:[#allocation5 + $0x2528] sm:$0xff]  ;;  %v1360_v49 = vld [vmem:[#allocation5 + $0x25b0] sm:$0xff] }
 0x269   :  { %3066 = vmatpush.msrb.mxu0 %v1245_v50  ;;  %3085 = vmatpush.msrb.mxu1 %v1262_v51  ;;  %v1310_v50 = vld [vmem:[#allocation5 + $0x2420] sm:$0xff]  ;;  %v1327_v51 = vld [vmem:[#allocation5 + $0x24a8] sm:$0xff] }
 0x26a   :  { %3106 = vmatpush.msrb.mxu2 %v1277_v52  ;;  %3125 = vmatpush.msrb.mxu3 %v1294_v53  ;;  %v1342_v52 = vld [vmem:[#allocation5 + $0x2520] sm:$0xff]  ;;  %v1359_v53 = vld [vmem:[#allocation5 + $0x25a8] sm:$0xff] }
 0x26b   :  { %3067 = vmatpush.msrb.mxu0 %v1244_v54  ;;  %3086 = vmatpush.msrb.mxu1 %v1261_v55  ;;  %v1309_v54 = vld [vmem:[#allocation5 + $0x2418] sm:$0xff]  ;;  %v1326_v55 = vld [vmem:[#allocation5 + $0x24a0] sm:$0xff] }
 0x26c   :  { %3107 = vmatpush.msrb.mxu2 %v1276_v56  ;;  %3126 = vmatpush.msrb.mxu3 %v1293_v57  ;;  %v1341_v56 = vld [vmem:[#allocation5 + $0x2518] sm:$0xff]  ;;  %v1358_v57 = vld [vmem:[#allocation5 + $0x25a0] sm:$0xff] }
 0x26d   :  { %3068 = vmatpush.msrb.mxu0 %v1243_v58  ;;  %3087 = vmatpush.msrb.mxu1 %v1260_v59  ;;  %v1308_v58 = vld [vmem:[#allocation5 + $0x2410] sm:$0xff]  ;;  %v1325_v59 = vld [vmem:[#allocation5 + $0x2498] sm:$0xff] }
 0x26e   :  { %3108 = vmatpush.msrb.mxu2 %v1275_v60  ;;  %3127 = vmatpush.msrb.mxu3 %v1292_v61  ;;  %v1340_v60 = vld [vmem:[#allocation5 + $0x2510] sm:$0xff]  ;;  %v1357_v61 = vld [vmem:[#allocation5 + $0x2598] sm:$0xff] }
 0x26f   :  { %3069 = vmatpush.msrb.mxu0 %v1242_v62  ;;  %3088 = vmatpush.msrb.mxu1 %v1259_v63  ;;  %v1307_v62 = vld [vmem:[#allocation5 + $0x2408] sm:$0xff]  ;;  %v1324_v63 = vld [vmem:[#allocation5 + $0x2490] sm:$0xff] }
 0x270   :  { %3109 = vmatpush.msrb.mxu2 %v1274_v0  ;;  %3128 = vmatpush.msrb.mxu3 %v1291_v1  ;;  %v1339_v0 = vld [vmem:[#allocation5 + $0x2508] sm:$0xff]  ;;  %v1356_v1 = vld [vmem:[#allocation5 + $0x2590] sm:$0xff] }
 0x271   :  { %3070 = vmatmul.f32.vlgmr.msrb.gmra.mxu0 %v126_v2  ;;  %3110 = vmatmul.f32.vlgmr.msrb.gmra.mxu2 %v128_v3  ;;  %v1306_v2 = vld [vmem:[#allocation5 + $0x2400] sm:$0xff]  ;;  %v1323_v3 = vld [vmem:[#allocation5 + $0x2488] sm:$0xff] }
 0x272   :  { %3134 = vmatpush.msra.mxu0 %v1321_v4  ;;  %3174 = vmatpush.msra.mxu2 %v1353_v5  ;;  %v1338_v4 = vld [vmem:[#allocation5 + $0x2500] sm:$0xff]  ;;  %v1355_v5 = vld [vmem:[#allocation5 + $0x2588] sm:$0xff] }
 0x273   :  { %3089 = vmatpush.msrb.mxu1 %v1258_v6  ;;  %3129 = vmatpush.msrb.mxu3 %v1290_v7  ;;  %v130_v6 = vld [vmem:[#allocation2 + $0x240] sm:$0xff]  ;;  %v132_v7 = vld [vmem:[#allocation2 + $0x250] sm:$0xff] }
 0x274   :  { %3090 = vmatmul.f32.vlgmr.msrb.gmra.mxu1 %v127_v8  ;;  %3130 = vmatmul.f32.vlgmr.msrb.gmra.mxu3 %v129_v9  ;;  %v1385_v8 = vld [vmem:[#allocation5 + $0x2678] sm:$0xff] }
 0x275   :  { %3135 = vmatpush.msra.mxu0 %v1320_v10  ;;  %3154 = vmatpush.msra.mxu1 %v1337_v11  ;;  %v1417_v9 = vld [vmem:[#allocation5 + $0x2778] sm:$0xff]  ;;  %v1322_v10 = vld [vmem:[#allocation5 + $0x2480] sm:$0xff] }
 0x276   :  { %3175 = vmatpush.msra.mxu2 %v1352_v12  ;;  %3194 = vmatpush.msra.mxu3 %v1369_v13  ;;  %v1354_v11 = vld [vmem:[#allocation5 + $0x2580] sm:$0xff]  ;;  %v131_v12 = vld [vmem:[#allocation2 + $0x248] sm:$0xff]  ;;  %v133_v13 = vld [vmem:[#allocation2 + $0x258] sm:$0xff] }
 0x277   :  { %3136 = vmatpush.msra.mxu0 %v1319_v14  ;;  %3155 = vmatpush.msra.mxu1 %v1336_v15  ;;  %v1384_v14 = vld [vmem:[#allocation5 + $0x2670] sm:$0xff]  ;;  %v1401_v15 = vld [vmem:[#allocation5 + $0x26f8] sm:$0xff] }
 0x278   :  { %3176 = vmatpush.msra.mxu2 %v1351_v16  ;;  %3195 = vmatpush.msra.mxu3 %v1368_v17  ;;  %v1416_v16 = vld [vmem:[#allocation5 + $0x2770] sm:$0xff]  ;;  %v1433_v17 = vld [vmem:[#allocation5 + $0x27f8] sm:$0xff] }
 0x279   :  { %3137 = vmatpush.msra.mxu0 %v1318_v18  ;;  %3156 = vmatpush.msra.mxu1 %v1335_v19  ;;  %v1383_v18 = vld [vmem:[#allocation5 + $0x2668] sm:$0xff]  ;;  %v1400_v19 = vld [vmem:[#allocation5 + $0x26f0] sm:$0xff] }
 0x27a   :  { %3177 = vmatpush.msra.mxu2 %v1350_v20  ;;  %3196 = vmatpush.msra.mxu3 %v1367_v21  ;;  %v1415_v20 = vld [vmem:[#allocation5 + $0x2768] sm:$0xff]  ;;  %v1432_v21 = vld [vmem:[#allocation5 + $0x27f0] sm:$0xff] }
 0x27b   :  { %3138 = vmatpush.msra.mxu0 %v1317_v22  ;;  %3157 = vmatpush.msra.mxu1 %v1334_v23  ;;  %v1382_v22 = vld [vmem:[#allocation5 + $0x2660] sm:$0xff]  ;;  %v1399_v23 = vld [vmem:[#allocation5 + $0x26e8] sm:$0xff] }
 0x27c   :  { %3178 = vmatpush.msra.mxu2 %v1349_v24  ;;  %3197 = vmatpush.msra.mxu3 %v1366_v25  ;;  %v1414_v24 = vld [vmem:[#allocation5 + $0x2760] sm:$0xff]  ;;  %v1431_v25 = vld [vmem:[#allocation5 + $0x27e8] sm:$0xff] }
 0x27d   :  { %3139 = vmatpush.msra.mxu0 %v1316_v26  ;;  %3158 = vmatpush.msra.mxu1 %v1333_v27  ;;  %v1381_v26 = vld [vmem:[#allocation5 + $0x2658] sm:$0xff]  ;;  %v1398_v27 = vld [vmem:[#allocation5 + $0x26e0] sm:$0xff] }
 0x27e   :  { %3179 = vmatpush.msra.mxu2 %v1348_v28  ;;  %3198 = vmatpush.msra.mxu3 %v1365_v29  ;;  %v1413_v28 = vld [vmem:[#allocation5 + $0x2758] sm:$0xff]  ;;  %v1430_v29 = vld [vmem:[#allocation5 + $0x27e0] sm:$0xff] }
 0x27f   :  { %3140 = vmatpush.msra.mxu0 %v1315_v30  ;;  %3159 = vmatpush.msra.mxu1 %v1332_v31  ;;  %v1380_v30 = vld [vmem:[#allocation5 + $0x2650] sm:$0xff]  ;;  %v1397_v31 = vld [vmem:[#allocation5 + $0x26d8] sm:$0xff] }
 0x280   :  { %3180 = vmatpush.msra.mxu2 %v1347_v32  ;;  %3199 = vmatpush.msra.mxu3 %v1364_v33  ;;  %v3639_v32 = vld [vmem:[#allocation7] ss:$0 sm:$0xff]  ;;  %v1412_v33 = vld [vmem:[#allocation5 + $0x2750] sm:$0xff] }
 0x281   :  { %3141 = vmatpush.msra.mxu0 %v1314_v34  ;;  %3160 = vmatpush.msra.mxu1 %v1331_v35  ;;  %v1429_v34 = vld [vmem:[#allocation5 + $0x27d8] sm:$0xff]  ;;  %v1711_v35 = vpop.f32.mrf.mxu0 }
 0x282   :  { %3181 = vmatpush.msra.mxu2 %v1346_v36  ;;  %3200 = vmatpush.msra.mxu3 %v1363_v37  ;;  %v1379_v36 = vld [vmem:[#allocation5 + $0x2648] sm:$0xff]  ;;  %v1396_v37 = vld [vmem:[#allocation5 + $0x26d0] sm:$0xff] }
 0x283   :  { %3142 = vmatpush.msra.mxu0 %v1313_v38  ;;  %3161 = vmatpush.msra.mxu1 %v1330_v39  ;;  %v1411_v38 = vld [vmem:[#allocation5 + $0x2748] sm:$0xff]  ;;  %v1428_v39 = vld [vmem:[#allocation5 + $0x27d0] sm:$0xff] }
 0x284   :  { %3182 = vmatpush.msra.mxu2 %v1345_v40  ;;  %3201 = vmatpush.msra.mxu3 %v1362_v41  ;;  %v1378_v40 = vld [vmem:[#allocation5 + $0x2640] sm:$0xff]  ;;  %v1395_v41 = vld [vmem:[#allocation5 + $0x26c8] sm:$0xff] }
 0x285   :  { %3143 = vmatpush.msra.mxu0 %v1312_v42  ;;  %3162 = vmatpush.msra.mxu1 %v1329_v43  ;;  %v1712_v42 = vadd.f32 %v3639_v32, %v1711_v35  ;;  %v1410_v43 = vld [vmem:[#allocation5 + $0x2740] sm:$0xff]  ;;  %v1448_v32 = vld [vmem:[#allocation5 + $0x2870] sm:$0xff]  ;;  %v1497_v35 = vld [vmem:[#allocation5 + $0x29f8] sm:$0xff] }
 0x286   :  { %3183 = vmatpush.msra.mxu2 %v1344_v44  ;;  %3202 = vmatpush.msra.mxu3 %v1361_v45  ;;  %v1427_v44 = vld [vmem:[#allocation5 + $0x27c8] sm:$0xff]  ;;  %v1731_v45 = vpop.f32.mrf.mxu1 }
 0x287   :  { %3144 = vmatpush.msra.mxu0 %v1311_v46  ;;  %3163 = vmatpush.msra.mxu1 %v1328_v47  ;;  %v1377_v46 = vld [vmem:[#allocation5 + $0x2638] sm:$0xff]  ;;  %v1394_v47 = vld [vmem:[#allocation5 + $0x26c0] sm:$0xff] }
 0x288   :  { %3184 = vmatpush.msra.mxu2 %v1343_v48  ;;  %3203 = vmatpush.msra.mxu3 %v1360_v49  ;;  %v1409_v48 = vld [vmem:[#allocation5 + $0x2738] sm:$0xff]  ;;  %v1426_v49 = vld [vmem:[#allocation5 + $0x27c0] sm:$0xff] }
 0x289   :  { %3145 = vmatpush.msra.mxu0 %v1310_v50  ;;  %3164 = vmatpush.msra.mxu1 %v1327_v51  ;;  %v1376_v50 = vld [vmem:[#allocation5 + $0x2630] sm:$0xff]  ;;  %v1393_v51 = vld [vmem:[#allocation5 + $0x26b8] sm:$0xff] }
 0x28a   :  { %3185 = vmatpush.msra.mxu2 %v1342_v52  ;;  %3204 = vmatpush.msra.mxu3 %v1359_v53  ;;  %v1732_v52 = vadd.f32 %v1731_v45, %v1712_v42  ;;  %v1408_v53 = vld [vmem:[#allocation5 + $0x2730] sm:$0xff]  ;;  %v1446_v42 = vld [vmem:[#allocation5 + $0x2860] sm:$0xff]  ;;  %v1495_v45 = vld [vmem:[#allocation5 + $0x29e8] sm:$0xff] }
 0x28b   :  { %3146 = vmatpush.msra.mxu0 %v1309_v54  ;;  %3165 = vmatpush.msra.mxu1 %v1326_v55  ;;  %v1425_v54 = vld [vmem:[#allocation5 + $0x27b8] sm:$0xff]  ;;  %v1751_v55 = vpop.f32.mrf.mxu2 }
 0x28c   :  { %3186 = vmatpush.msra.mxu2 %v1341_v56  ;;  %3205 = vmatpush.msra.mxu3 %v1358_v57  ;;  %v1375_v56 = vld [vmem:[#allocation5 + $0x2628] sm:$0xff]  ;;  %v1392_v57 = vld [vmem:[#allocation5 + $0x26b0] sm:$0xff] }
 0x28d   :  { %3147 = vmatpush.msra.mxu0 %v1308_v58  ;;  %3166 = vmatpush.msra.mxu1 %v1325_v59  ;;  %v1407_v58 = vld [vmem:[#allocation5 + $0x2728] sm:$0xff]  ;;  %v1424_v59 = vld [vmem:[#allocation5 + $0x27b0] sm:$0xff] }
 0x28e   :  { %3187 = vmatpush.msra.mxu2 %v1340_v60  ;;  %3206 = vmatpush.msra.mxu3 %v1357_v61  ;;  %v1374_v60 = vld [vmem:[#allocation5 + $0x2620] sm:$0xff]  ;;  %v1391_v61 = vld [vmem:[#allocation5 + $0x26a8] sm:$0xff] }
 0x28f   :  { %3148 = vmatpush.msra.mxu0 %v1307_v62  ;;  %3167 = vmatpush.msra.mxu1 %v1324_v63  ;;  %v1752_v62 = vadd.f32 %v1751_v55, %v1732_v52  ;;  %v1406_v63 = vld [vmem:[#allocation5 + $0x2720] sm:$0xff]  ;;  %v1444_v52 = vld [vmem:[#allocation5 + $0x2850] sm:$0xff] }
 0x290   :  { %3188 = vmatpush.msra.mxu2 %v1339_v0  ;;  %3207 = vmatpush.msra.mxu3 %v1356_v1  ;;  %v1423_v0 = vld [vmem:[#allocation5 + $0x27a8] sm:$0xff]  ;;  %v1771_v1 = vpop.f32.mrf.mxu3  ;;  %v1476_v55 = vld [vmem:[#allocation5 + $0x2950] sm:$0xff] }
 0x291   :  { %3149 = vmatpush.msra.mxu0 %v1306_v2  ;;  %3168 = vmatpush.msra.mxu1 %v1323_v3  ;;  %v1373_v2 = vld [vmem:[#allocation5 + $0x2618] sm:$0xff]  ;;  %v1390_v3 = vld [vmem:[#allocation5 + $0x26a0] sm:$0xff] }
 0x292   :  { %3189 = vmatpush.msra.mxu2 %v1338_v4  ;;  %3208 = vmatpush.msra.mxu3 %v1355_v5  ;;  %v1405_v4 = vld [vmem:[#allocation5 + $0x2718] sm:$0xff]  ;;  %v1422_v5 = vld [vmem:[#allocation5 + $0x27a0] sm:$0xff] }
 0x293   :  { %3150 = vmatmul.f32.vlgmr.msra.gmra.mxu0 %v130_v6  ;;  %3190 = vmatmul.f32.vlgmr.msra.gmra.mxu2 %v132_v7  ;;  %v1372_v6 = vld [vmem:[#allocation5 + $0x2610] sm:$0xff]  ;;  %v1389_v7 = vld [vmem:[#allocation5 + $0x2698] sm:$0xff] }
 0x294   :  { %3214 = vmatpush.msrb.mxu0 %v1385_v8  ;;  %3254 = vmatpush.msrb.mxu2 %v1417_v9  ;;  %v1772_v8 = vadd.f32 %v1771_v1, %v1752_v62  ;;  %v1404_v9 = vld [vmem:[#allocation5 + $0x2710] sm:$0xff] }
 0x295   :  { %3169 = vmatpush.msra.mxu1 %v1322_v10  ;;  %3209 = vmatpush.msra.mxu3 %v1354_v11  ;;  %v1421_v10 = vld [vmem:[#allocation5 + $0x2798] sm:$0xff]  ;;  %v1791_v11 = vpop.f32.mrf.mxu0 }
 0x296   :  { %3170 = vmatmul.f32.vlgmr.msra.gmra.mxu1 %v131_v12  ;;  %3210 = vmatmul.f32.vlgmr.msra.gmra.mxu3 %v133_v13  ;;  %v1371_v12 = vld [vmem:[#allocation5 + $0x2608] sm:$0xff]  ;;  %v1388_v13 = vld [vmem:[#allocation5 + $0x2690] sm:$0xff] }
 0x297   :  { %3215 = vmatpush.msrb.mxu0 %v1384_v14  ;;  %3234 = vmatpush.msrb.mxu1 %v1401_v15  ;;  %v1403_v14 = vld [vmem:[#allocation5 + $0x2708] sm:$0xff]  ;;  %v1420_v15 = vld [vmem:[#allocation5 + $0x2790] sm:$0xff] }
 0x298   :  { %3255 = vmatpush.msrb.mxu2 %v1416_v16  ;;  %3274 = vmatpush.msrb.mxu3 %v1433_v17  ;;  %v1370_v16 = vld [vmem:[#allocation5 + $0x2600] sm:$0xff]  ;;  %v1387_v17 = vld [vmem:[#allocation5 + $0x2688] sm:$0xff] }
 0x299   :  { %3216 = vmatpush.msrb.mxu0 %v1383_v18  ;;  %3235 = vmatpush.msrb.mxu1 %v1400_v19  ;;  %v1792_v18 = vadd.f32 %v1791_v11, %v1772_v8  ;;  %v1402_v19 = vld [vmem:[#allocation5 + $0x2700] sm:$0xff]  ;;  %v1457_v11 = vld [vmem:[#allocation5 + $0x28b8] sm:$0xff] }
 0x29a   :  { %3256 = vmatpush.msrb.mxu2 %v1415_v20  ;;  %3275 = vmatpush.msrb.mxu3 %v1432_v21  ;;  %v1419_v20 = vld [vmem:[#allocation5 + $0x2788] sm:$0xff]  ;;  %v1811_v21 = vpop.f32.mrf.mxu1  ;;  %v1490_v8 = vld [vmem:[#allocation5 + $0x29c0] sm:$0xff] }
 0x29b   :  { %3217 = vmatpush.msrb.mxu0 %v1382_v22  ;;  %3236 = vmatpush.msrb.mxu1 %v1399_v23  ;;  %v134_v22 = vld [vmem:[#allocation2 + $0x260] sm:$0xff]  ;;  %v136_v23 = vld [vmem:[#allocation2 + $0x270] sm:$0xff] }
 0x29c   :  { %3257 = vmatpush.msrb.mxu2 %v1414_v24  ;;  %3276 = vmatpush.msrb.mxu3 %v1431_v25  ;;  %v1449_v24 = vld [vmem:[#allocation5 + $0x2878] sm:$0xff] }
 0x29d   :  { %3218 = vmatpush.msrb.mxu0 %v1381_v26  ;;  %3237 = vmatpush.msrb.mxu1 %v1398_v27  ;;  %v1481_v25 = vld [vmem:[#allocation5 + $0x2978] sm:$0xff]  ;;  %v1386_v26 = vld [vmem:[#allocation5 + $0x2680] sm:$0xff] }
 0x29e   :  { %3258 = vmatpush.msrb.mxu2 %v1413_v28  ;;  %3277 = vmatpush.msrb.mxu3 %v1430_v29  ;;  %v1418_v27 = vld [vmem:[#allocation5 + $0x2780] sm:$0xff]  ;;  %v1812_v28 = vadd.f32 %v1811_v21, %v1792_v18  ;;  %v135_v29 = vld [vmem:[#allocation2 + $0x268] sm:$0xff] }
 0x29f   :  { %3219 = vmatpush.msrb.mxu0 %v1380_v30  ;;  %3238 = vmatpush.msrb.mxu1 %v1397_v31  ;;  %v137_v30 = vld [vmem:[#allocation2 + $0x278] sm:$0xff]  ;;  %v1831_v31 = vpop.f32.mrf.mxu2  ;;  %v1471_v18 = vld [vmem:[#allocation5 + $0x2928] sm:$0xff] }
 0x2a0   :  { %3259 = vmatpush.msrb.mxu2 %v1412_v33  ;;  %3278 = vmatpush.msrb.mxu3 %v1429_v34  ;;  %v1465_v33 = vld [vmem:[#allocation5 + $0x28f8] sm:$0xff]  ;;  %v1480_v34 = vld [vmem:[#allocation5 + $0x2970] sm:$0xff]  ;;  %v1455_v21 = vld [vmem:[#allocation5 + $0x28a8] sm:$0xff] }
 0x2a1   :  { %3220 = vmatpush.msrb.mxu0 %v1379_v36  ;;  %3239 = vmatpush.msrb.mxu1 %v1396_v37  ;;  %v1447_v36 = vld [vmem:[#allocation5 + $0x2868] sm:$0xff]  ;;  %v1464_v37 = vld [vmem:[#allocation5 + $0x28f0] sm:$0xff] }
 0x2a2   :  { %3260 = vmatpush.msrb.mxu2 %v1411_v38  ;;  %3279 = vmatpush.msrb.mxu3 %v1428_v39  ;;  %v1832_v38 = vadd.f32 %v1831_v31, %v1812_v28  ;;  %v1479_v39 = vld [vmem:[#allocation5 + $0x2968] sm:$0xff]  ;;  %v1469_v28 = vld [vmem:[#allocation5 + $0x2918] sm:$0xff]  ;;  %v1436_v31 = vld [vmem:[#allocation5 + $0x2810] sm:$0xff] }
 0x2a3   :  { %3221 = vmatpush.msrb.mxu0 %v1378_v40  ;;  %3240 = vmatpush.msrb.mxu1 %v1395_v41  ;;  %v1496_v40 = vld [vmem:[#allocation5 + $0x29f0] sm:$0xff]  ;;  %v1851_v41 = vpop.f32.mrf.mxu3 }
 0x2a4   :  { %3261 = vmatpush.msrb.mxu2 %v1410_v43  ;;  %3280 = vmatpush.msrb.mxu3 %v1427_v44  ;;  %v1463_v43 = vld [vmem:[#allocation5 + $0x28e8] sm:$0xff]  ;;  %v1478_v44 = vld [vmem:[#allocation5 + $0x2960] sm:$0xff] }
 0x2a5   :  { %3222 = vmatpush.msrb.mxu0 %v1377_v46  ;;  %3241 = vmatpush.msrb.mxu1 %v1394_v47  ;;  %v1871_v46 = vpop.f32.mrf.mxu0  ;;  %v1445_v47 = vld [vmem:[#allocation5 + $0x2858] sm:$0xff] }
 0x2a6   :  { %3262 = vmatpush.msrb.mxu2 %v1409_v48  ;;  %3281 = vmatpush.msrb.mxu3 %v1426_v49  ;;  %v1462_v48 = vld [vmem:[#allocation5 + $0x28e0] sm:$0xff]  ;;  %v1852_v49 = vadd.f32 %v1851_v41, %v1832_v38 }
 0x2a7   :  { %3223 = vmatpush.msrb.mxu0 %v1376_v50  ;;  %3242 = vmatpush.msrb.mxu1 %v1393_v51  ;;  %v1477_v50 = vld [vmem:[#allocation5 + $0x2958] sm:$0xff]  ;;  %v1494_v51 = vld [vmem:[#allocation5 + $0x29e0] sm:$0xff]  ;;  %v1911_v62 = vpop.f32.mrf.mxu2 }
 0x2a8   :  { %3263 = vmatpush.msrb.mxu2 %v1408_v53  ;;  %3282 = vmatpush.msrb.mxu3 %v1425_v54  ;;  %v1461_v53 = vld [vmem:[#allocation5 + $0x28d8] sm:$0xff]  ;;  %v1872_v54 = vadd.f32 %v1871_v46, %v1852_v49 }
 0x2a9   :  { %3224 = vmatpush.msrb.mxu0 %v1375_v56  ;;  %3243 = vmatpush.msrb.mxu1 %v1392_v57  ;;  %v1493_v56 = vld [vmem:[#allocation5 + $0x29d8] sm:$0xff]  ;;  %v1891_v57 = vpop.f32.mrf.mxu1 }
 0x2aa   :  { %3264 = vmatpush.msrb.mxu2 %v1407_v58  ;;  %3283 = vmatpush.msrb.mxu3 %v1424_v59  ;;  %v1443_v58 = vld [vmem:[#allocation5 + $0x2848] sm:$0xff]  ;;  %v1460_v59 = vld [vmem:[#allocation5 + $0x28d0] sm:$0xff]  ;;  %v1892_v1 = vadd.f32 %v1891_v57, %v1872_v54 }
 0x2ab   :  { %3225 = vmatpush.msrb.mxu0 %v1374_v60  ;;  %3244 = vmatpush.msrb.mxu1 %v1391_v61  ;;  %v1475_v60 = vld [vmem:[#allocation5 + $0x2948] sm:$0xff]  ;;  %v1492_v61 = vld [vmem:[#allocation5 + $0x29d0] sm:$0xff] }
 0x2ac   :  { %3265 = vmatpush.msrb.mxu2 %v1406_v63  ;;  %3284 = vmatpush.msrb.mxu3 %v1423_v0  ;;  %v1442_v63 = vld [vmem:[#allocation5 + $0x2840] sm:$0xff]  ;;  %v1459_v0 = vld [vmem:[#allocation5 + $0x28c8] sm:$0xff] }
 0x2ad   :  { %3226 = vmatpush.msrb.mxu0 %v1373_v2  ;;  %3245 = vmatpush.msrb.mxu1 %v1390_v3  ;;  %v1474_v2 = vld [vmem:[#allocation5 + $0x2940] sm:$0xff]  ;;  %v1491_v3 = vld [vmem:[#allocation5 + $0x29c8] sm:$0xff] }
 0x2ae   :  { %3266 = vmatpush.msrb.mxu2 %v1405_v4  ;;  %3285 = vmatpush.msrb.mxu3 %v1422_v5  ;;  %v1441_v4 = vld [vmem:[#allocation5 + $0x2838] sm:$0xff]  ;;  %v1458_v5 = vld [vmem:[#allocation5 + $0x28c0] sm:$0xff] }
 0x2af   :  { %3227 = vmatpush.msrb.mxu0 %v1372_v6  ;;  %3246 = vmatpush.msrb.mxu1 %v1389_v7  ;;  %v1912_v6 = vadd.f32 %v1911_v62, %v1892_v1  ;;  %v1473_v7 = vld [vmem:[#allocation5 + $0x2938] sm:$0xff] }
 0x2b0   :  { %3267 = vmatpush.msrb.mxu2 %v1404_v9  ;;  %3286 = vmatpush.msrb.mxu3 %v1421_v10  ;;  %v1931_v9 = vpop.f32.mrf.mxu3  ;;  %v1440_v10 = vld [vmem:[#allocation5 + $0x2830] sm:$0xff] }
 0x2b1   :  { %3228 = vmatpush.msrb.mxu0 %v1371_v12  ;;  %3247 = vmatpush.msrb.mxu1 %v1388_v13  ;;  %v1472_v12 = vld [vmem:[#allocation5 + $0x2930] sm:$0xff]  ;;  %v1489_v13 = vld [vmem:[#allocation5 + $0x29b8] sm:$0xff] }
 0x2b2   :  { %3268 = vmatpush.msrb.mxu2 %v1403_v14  ;;  %3287 = vmatpush.msrb.mxu3 %v1420_v15  ;;  %v1951_v14 = vpop.f32.mrf.mxu0  ;;  %v1439_v15 = vld [vmem:[#allocation5 + $0x2828] sm:$0xff] }
 0x2b3   :  { %3229 = vmatpush.msrb.mxu0 %v1370_v16  ;;  %3248 = vmatpush.msrb.mxu1 %v1387_v17  ;;  %v1456_v16 = vld [vmem:[#allocation5 + $0x28b0] sm:$0xff]  ;;  %v1932_v17 = vadd.f32 %v1931_v9, %v1912_v6 }
 0x2b4   :  { %3269 = vmatpush.msrb.mxu2 %v1402_v19  ;;  %3288 = vmatpush.msrb.mxu3 %v1419_v20  ;;  %v1488_v19 = vld [vmem:[#allocation5 + $0x29b0] sm:$0xff]  ;;  %v1438_v20 = vld [vmem:[#allocation5 + $0x2820] sm:$0xff] }
 0x2b5   :  { %3230 = vmatmul.f32.vlgmr.msrb.gmra.mxu0 %v134_v22  ;;  %3270 = vmatmul.f32.vlgmr.msrb.gmra.mxu2 %v136_v23  ;;  %v1952_v22 = vadd.f32 %v1951_v14, %v1932_v17  ;;  %v1470_v23 = vld [vmem:[#allocation5 + $0x2920] sm:$0xff] }
 0x2b6   :  { %3294 = vmatpush.msra.mxu0 %v1449_v24  ;;  %3334 = vmatpush.msra.mxu2 %v1481_v25  ;;  %v1487_v24 = vld [vmem:[#allocation5 + $0x29a8] sm:$0xff]  ;;  %v1971_v25 = vpop.f32.mrf.mxu1 }
 0x2b7   :  { %3249 = vmatpush.msrb.mxu1 %v1386_v26  ;;  %3289 = vmatpush.msrb.mxu3 %v1418_v27  ;;  %v1437_v26 = vld [vmem:[#allocation5 + $0x2818] sm:$0xff]  ;;  %v1454_v27 = vld [vmem:[#allocation5 + $0x28a0] sm:$0xff] }
 0x2b8   :  { %3250 = vmatmul.f32.vlgmr.msrb.gmra.mxu1 %v135_v29  ;;  %3290 = vmatmul.f32.vlgmr.msrb.gmra.mxu3 %v137_v30  ;;  %v1486_v29 = vld [vmem:[#allocation5 + $0x29a0] sm:$0xff]  ;;  %v1991_v30 = vpop.f32.mrf.mxu2  ;;  %v2011_v41 = vpop.f32.mrf.mxu3 }
 0x2b9   :  { %3295 = vmatpush.msra.mxu0 %v1448_v32  ;;  %3314 = vmatpush.msra.mxu1 %v1465_v33  ;;  %v1453_v32 = vld [vmem:[#allocation5 + $0x2898] sm:$0xff]  ;;  %v1972_v33 = vadd.f32 %v1971_v25, %v1952_v22 }
 0x2ba   :  { %3335 = vmatpush.msra.mxu2 %v1480_v34  ;;  %3354 = vmatpush.msra.mxu3 %v1497_v35  ;;  %v1468_v34 = vld [vmem:[#allocation5 + $0x2910] sm:$0xff]  ;;  %v1485_v35 = vld [vmem:[#allocation5 + $0x2998] sm:$0xff]  ;;  %v2031_v46 = vpop.f32.mrf.mxu0 }
 0x2bb   :  { %3296 = vmatpush.msra.mxu0 %v1447_v36  ;;  %3315 = vmatpush.msra.mxu1 %v1464_v37  ;;  %v1435_v36 = vld [vmem:[#allocation5 + $0x2808] sm:$0xff]  ;;  %v1452_v37 = vld [vmem:[#allocation5 + $0x2890] sm:$0xff]  ;;  %v1992_v38 = vadd.f32 %v1991_v30, %v1972_v33 }
 0x2bc   :  { %3336 = vmatpush.msra.mxu2 %v1479_v39  ;;  %3355 = vmatpush.msra.mxu3 %v1496_v40  ;;  %v1467_v39 = vld [vmem:[#allocation5 + $0x2908] sm:$0xff]  ;;  %v1484_v40 = vld [vmem:[#allocation5 + $0x2990] sm:$0xff] }
 0x2bd   :  { %3297 = vmatpush.msra.mxu0 %v1446_v42  ;;  %3316 = vmatpush.msra.mxu1 %v1463_v43  ;;  %v1434_v42 = vld [vmem:[#allocation5 + $0x2800] sm:$0xff]  ;;  %v1451_v43 = vld [vmem:[#allocation5 + $0x2888] sm:$0xff]  ;;  %v2012_v49 = vadd.f32 %v2011_v41, %v1992_v38 }
 0x2be   :  { %3337 = vmatpush.msra.mxu2 %v1478_v44  ;;  %3356 = vmatpush.msra.mxu3 %v1495_v45  ;;  %v1466_v44 = vld [vmem:[#allocation5 + $0x2900] sm:$0xff]  ;;  %v1483_v45 = vld [vmem:[#allocation5 + $0x2988] sm:$0xff]  ;;  %v2051_v57 = vpop.f32.mrf.mxu1 }
 0x2bf   :  { %3298 = vmatpush.msra.mxu0 %v1445_v47  ;;  %3317 = vmatpush.msra.mxu1 %v1462_v48  ;;  %v138_v47 = vld [vmem:[#allocation2 + $0x280] sm:$0xff]  ;;  %v140_v48 = vld [vmem:[#allocation2 + $0x290] sm:$0xff]  ;;  %v2032_v54 = vadd.f32 %v2031_v46, %v2012_v49 }
 0x2c0   :  { %3338 = vmatpush.msra.mxu2 %v1477_v50  ;;  %3357 = vmatpush.msra.mxu3 %v1494_v51  ;;  %v1513_v50 = vld [vmem:[#allocation5 + $0x2a78] sm:$0xff]  ;;  %v2071_v62 = vpop.f32.mrf.mxu2  ;;  %v2091_v9 = vpop.f32.mrf.mxu3 }
 0x2c1   :  { %3299 = vmatpush.msra.mxu0 %v1444_v52  ;;  %3318 = vmatpush.msra.mxu1 %v1461_v53  ;;  %v1545_v51 = vld [vmem:[#allocation5 + $0x2b78] sm:$0xff]  ;;  %v1450_v52 = vld [vmem:[#allocation5 + $0x2880] sm:$0xff]  ;;  %v2052_v1 = vadd.f32 %v2051_v57, %v2032_v54 }
 0x2c2   :  { %3339 = vmatpush.msra.mxu2 %v1476_v55  ;;  %3358 = vmatpush.msra.mxu3 %v1493_v56  ;;  %v1482_v53 = vld [vmem:[#allocation5 + $0x2980] sm:$0xff]  ;;  %v139_v55 = vld [vmem:[#allocation2 + $0x288] sm:$0xff]  ;;  %v141_v56 = vld [vmem:[#allocation2 + $0x298] sm:$0xff]  ;;  %v2111_v14 = vpop.f32.mrf.mxu0 }
 0x2c3   :  { %3300 = vmatpush.msra.mxu0 %v1443_v58  ;;  %3319 = vmatpush.msra.mxu1 %v1460_v59  ;;  %v1512_v58 = vld [vmem:[#allocation5 + $0x2a70] sm:$0xff]  ;;  %v1529_v59 = vld [vmem:[#allocation5 + $0x2af8] sm:$0xff]  ;;  %v2072_v6 = vadd.f32 %v2071_v62, %v2052_v1 }
 0x2c4   :  { %3340 = vmatpush.msra.mxu2 %v1475_v60  ;;  %3359 = vmatpush.msra.mxu3 %v1492_v61  ;;  %v1544_v60 = vld [vmem:[#allocation5 + $0x2b70] sm:$0xff]  ;;  %v1561_v61 = vld [vmem:[#allocation5 + $0x2bf8] sm:$0xff] }
 0x2c5   :  { %3301 = vmatpush.msra.mxu0 %v1442_v63  ;;  %3320 = vmatpush.msra.mxu1 %v1459_v0  ;;  %v1511_v63 = vld [vmem:[#allocation5 + $0x2a68] sm:$0xff]  ;;  %v1528_v0 = vld [vmem:[#allocation5 + $0x2af0] sm:$0xff]  ;;  %v2092_v17 = vadd.f32 %v2091_v9, %v2072_v6 }
 0x2c6   :  { %3341 = vmatpush.msra.mxu2 %v1474_v2  ;;  %3360 = vmatpush.msra.mxu3 %v1491_v3  ;;  %v1543_v2 = vld [vmem:[#allocation5 + $0x2b68] sm:$0xff]  ;;  %v1560_v3 = vld [vmem:[#allocation5 + $0x2bf0] sm:$0xff]  ;;  %v2131_v25 = vpop.f32.mrf.mxu1 }
 0x2c7   :  { %3302 = vmatpush.msra.mxu0 %v1441_v4  ;;  %3321 = vmatpush.msra.mxu1 %v1458_v5  ;;  %v1510_v4 = vld [vmem:[#allocation5 + $0x2a60] sm:$0xff]  ;;  %v1527_v5 = vld [vmem:[#allocation5 + $0x2ae8] sm:$0xff]  ;;  %v2112_v22 = vadd.f32 %v2111_v14, %v2092_v17 }
 0x2c8   :  { %3342 = vmatpush.msra.mxu2 %v1473_v7  ;;  %3361 = vmatpush.msra.mxu3 %v1490_v8  ;;  %v1542_v7 = vld [vmem:[#allocation5 + $0x2b60] sm:$0xff]  ;;  %v1559_v8 = vld [vmem:[#allocation5 + $0x2be8] sm:$0xff]  ;;  %v2151_v30 = vpop.f32.mrf.mxu2  ;;  %v2171_v41 = vpop.f32.mrf.mxu3 }
 0x2c9   :  { %3303 = vmatpush.msra.mxu0 %v1440_v10  ;;  %3322 = vmatpush.msra.mxu1 %v1457_v11  ;;  %v1509_v10 = vld [vmem:[#allocation5 + $0x2a58] sm:$0xff]  ;;  %v1526_v11 = vld [vmem:[#allocation5 + $0x2ae0] sm:$0xff]  ;;  %v2132_v33 = vadd.f32 %v2131_v25, %v2112_v22 }
 0x2ca   :  { %3343 = vmatpush.msra.mxu2 %v1472_v12  ;;  %3362 = vmatpush.msra.mxu3 %v1489_v13  ;;  %v1541_v12 = vld [vmem:[#allocation5 + $0x2b58] sm:$0xff]  ;;  %v1558_v13 = vld [vmem:[#allocation5 + $0x2be0] sm:$0xff]  ;;  %v2191_v46 = vpop.f32.mrf.mxu0 }
 0x2cb   :  { %3304 = vmatpush.msra.mxu0 %v1439_v15  ;;  %3323 = vmatpush.msra.mxu1 %v1456_v16  ;;  %v1508_v15 = vld [vmem:[#allocation5 + $0x2a50] sm:$0xff]  ;;  %v1525_v16 = vld [vmem:[#allocation5 + $0x2ad8] sm:$0xff]  ;;  %v2152_v38 = vadd.f32 %v2151_v30, %v2132_v33 }
 0x2cc   :  { %3344 = vmatpush.msra.mxu2 %v1471_v18  ;;  %3363 = vmatpush.msra.mxu3 %v1488_v19  ;;  %v1540_v18 = vld [vmem:[#allocation5 + $0x2b50] sm:$0xff]  ;;  %v1557_v19 = vld [vmem:[#allocation5 + $0x2bd8] sm:$0xff] }
 0x2cd   :  { %3305 = vmatpush.msra.mxu0 %v1438_v20  ;;  %3324 = vmatpush.msra.mxu1 %v1455_v21  ;;  %v1507_v20 = vld [vmem:[#allocation5 + $0x2a48] sm:$0xff]  ;;  %v1524_v21 = vld [vmem:[#allocation5 + $0x2ad0] sm:$0xff]  ;;  %v2172_v49 = vadd.f32 %v2171_v41, %v2152_v38 }
 0x2ce   :  { %3345 = vmatpush.msra.mxu2 %v1470_v23  ;;  %3364 = vmatpush.msra.mxu3 %v1487_v24  ;;  %v1539_v23 = vld [vmem:[#allocation5 + $0x2b48] sm:$0xff]  ;;  %v1556_v24 = vld [vmem:[#allocation5 + $0x2bd0] sm:$0xff]  ;;  %v2211_v57 = vpop.f32.mrf.mxu1 }
 0x2cf   :  { %3306 = vmatpush.msra.mxu0 %v1437_v26  ;;  %3325 = vmatpush.msra.mxu1 %v1454_v27  ;;  %v1506_v26 = vld [vmem:[#allocation5 + $0x2a40] sm:$0xff]  ;;  %v1523_v27 = vld [vmem:[#allocation5 + $0x2ac8] sm:$0xff]  ;;  %v2192_v54 = vadd.f32 %v2191_v46, %v2172_v49 }
 0x2d0   :  { %3346 = vmatpush.msra.mxu2 %v1469_v28  ;;  %3365 = vmatpush.msra.mxu3 %v1486_v29  ;;  %v1538_v28 = vld [vmem:[#allocation5 + $0x2b40] sm:$0xff]  ;;  %v1555_v29 = vld [vmem:[#allocation5 + $0x2bc8] sm:$0xff]  ;;  %v2231_v62 = vpop.f32.mrf.mxu2  ;;  %v2251_v9 = vpop.f32.mrf.mxu3 }
 0x2d1   :  { %3307 = vmatpush.msra.mxu0 %v1436_v31  ;;  %3326 = vmatpush.msra.mxu1 %v1453_v32  ;;  %v1505_v31 = vld [vmem:[#allocation5 + $0x2a38] sm:$0xff]  ;;  %v1522_v32 = vld [vmem:[#allocation5 + $0x2ac0] sm:$0xff]  ;;  %v2212_v1 = vadd.f32 %v2211_v57, %v2192_v54 }
 0x2d2   :  { %3347 = vmatpush.msra.mxu2 %v1468_v34  ;;  %3366 = vmatpush.msra.mxu3 %v1485_v35  ;;  %v1537_v34 = vld [vmem:[#allocation5 + $0x2b38] sm:$0xff]  ;;  %v1554_v35 = vld [vmem:[#allocation5 + $0x2bc0] sm:$0xff]  ;;  %v2271_v14 = vpop.f32.mrf.mxu0 }
 0x2d3   :  { %3308 = vmatpush.msra.mxu0 %v1435_v36  ;;  %3327 = vmatpush.msra.mxu1 %v1452_v37  ;;  %v1504_v36 = vld [vmem:[#allocation5 + $0x2a30] sm:$0xff]  ;;  %v1521_v37 = vld [vmem:[#allocation5 + $0x2ab8] sm:$0xff]  ;;  %v2232_v6 = vadd.f32 %v2231_v62, %v2212_v1 }
 0x2d4   :  { %3348 = vmatpush.msra.mxu2 %v1467_v39  ;;  %3367 = vmatpush.msra.mxu3 %v1484_v40  ;;  %v1536_v39 = vld [vmem:[#allocation5 + $0x2b30] sm:$0xff]  ;;  %v1553_v40 = vld [vmem:[#allocation5 + $0x2bb8] sm:$0xff] }
 0x2d5   :  { %3309 = vmatpush.msra.mxu0 %v1434_v42  ;;  %3328 = vmatpush.msra.mxu1 %v1451_v43  ;;  %v1503_v42 = vld [vmem:[#allocation5 + $0x2a28] sm:$0xff]  ;;  %v1520_v43 = vld [vmem:[#allocation5 + $0x2ab0] sm:$0xff]  ;;  %v2252_v17 = vadd.f32 %v2251_v9, %v2232_v6 }
 0x2d6   :  { %3349 = vmatpush.msra.mxu2 %v1466_v44  ;;  %3368 = vmatpush.msra.mxu3 %v1483_v45  ;;  %v1535_v44 = vld [vmem:[#allocation5 + $0x2b28] sm:$0xff]  ;;  %v1552_v45 = vld [vmem:[#allocation5 + $0x2bb0] sm:$0xff]  ;;  %v2291_v25 = vpop.f32.mrf.mxu1 }
 0x2d7   :  { %3310 = vmatmul.f32.vlgmr.msra.gmra.mxu0 %v138_v47  ;;  %3350 = vmatmul.f32.vlgmr.msra.gmra.mxu2 %v140_v48  ;;  %v1502_v47 = vld [vmem:[#allocation5 + $0x2a20] sm:$0xff]  ;;  %v1519_v48 = vld [vmem:[#allocation5 + $0x2aa8] sm:$0xff]  ;;  %v2272_v22 = vadd.f32 %v2271_v14, %v2252_v17 }
 0x2d8   :  { %3374 = vmatpush.msrb.mxu0 %v1513_v50  ;;  %3414 = vmatpush.msrb.mxu2 %v1545_v51  ;;  %v1534_v50 = vld [vmem:[#allocation5 + $0x2b20] sm:$0xff]  ;;  %v1551_v51 = vld [vmem:[#allocation5 + $0x2ba8] sm:$0xff]  ;;  %v2311_v30 = vpop.f32.mrf.mxu2  ;;  %v2331_v41 = vpop.f32.mrf.mxu3 }
 0x2d9   :  { %3329 = vmatpush.msra.mxu1 %v1450_v52  ;;  %3369 = vmatpush.msra.mxu3 %v1482_v53  ;;  %v1501_v52 = vld [vmem:[#allocation5 + $0x2a18] sm:$0xff]  ;;  %v1518_v53 = vld [vmem:[#allocation5 + $0x2aa0] sm:$0xff]  ;;  %v2292_v33 = vadd.f32 %v2291_v25, %v2272_v22 }
 0x2da   :  { %3330 = vmatmul.f32.vlgmr.msra.gmra.mxu1 %v139_v55  ;;  %3370 = vmatmul.f32.vlgmr.msra.gmra.mxu3 %v141_v56  ;;  %v1533_v55 = vld [vmem:[#allocation5 + $0x2b18] sm:$0xff]  ;;  %v1550_v56 = vld [vmem:[#allocation5 + $0x2ba0] sm:$0xff]  ;;  %v2351_v46 = vpop.f32.mrf.mxu0 }
 0x2db   :  { %3375 = vmatpush.msrb.mxu0 %v1512_v58  ;;  %3394 = vmatpush.msrb.mxu1 %v1529_v59  ;;  %v1500_v58 = vld [vmem:[#allocation5 + $0x2a10] sm:$0xff]  ;;  %v1517_v59 = vld [vmem:[#allocation5 + $0x2a98] sm:$0xff]  ;;  %v2312_v38 = vadd.f32 %v2311_v30, %v2292_v33 }
 0x2dc   :  { %3415 = vmatpush.msrb.mxu2 %v1544_v60  ;;  %3434 = vmatpush.msrb.mxu3 %v1561_v61  ;;  %v1532_v60 = vld [vmem:[#allocation5 + $0x2b10] sm:$0xff]  ;;  %v1549_v61 = vld [vmem:[#allocation5 + $0x2b98] sm:$0xff] }
 0x2dd   :  { %3376 = vmatpush.msrb.mxu0 %v1511_v63  ;;  %3395 = vmatpush.msrb.mxu1 %v1528_v0  ;;  %v1499_v63 = vld [vmem:[#allocation5 + $0x2a08] sm:$0xff]  ;;  %v1516_v0 = vld [vmem:[#allocation5 + $0x2a90] sm:$0xff]  ;;  %v2332_v49 = vadd.f32 %v2331_v41, %v2312_v38 }
 0x2de   :  { %3416 = vmatpush.msrb.mxu2 %v1543_v2  ;;  %3435 = vmatpush.msrb.mxu3 %v1560_v3  ;;  %v1531_v2 = vld [vmem:[#allocation5 + $0x2b08] sm:$0xff]  ;;  %v1548_v3 = vld [vmem:[#allocation5 + $0x2b90] sm:$0xff]  ;;  %v2371_v57 = vpop.f32.mrf.mxu1 }
 0x2df   :  { %3377 = vmatpush.msrb.mxu0 %v1510_v4  ;;  %3396 = vmatpush.msrb.mxu1 %v1527_v5  ;;  %v1498_v4 = vld [vmem:[#allocation5 + $0x2a00] sm:$0xff]  ;;  %v1515_v5 = vld [vmem:[#allocation5 + $0x2a88] sm:$0xff]  ;;  %v2352_v54 = vadd.f32 %v2351_v46, %v2332_v49 }
 0x2e0   :  { %3417 = vmatpush.msrb.mxu2 %v1542_v7  ;;  %3436 = vmatpush.msrb.mxu3 %v1559_v8  ;;  %v1530_v7 = vld [vmem:[#allocation5 + $0x2b00] sm:$0xff]  ;;  %v1547_v8 = vld [vmem:[#allocation5 + $0x2b88] sm:$0xff]  ;;  %v2391_v62 = vpop.f32.mrf.mxu2  ;;  %v2411_v9 = vpop.f32.mrf.mxu3 }
 0x2e1   :  { %3378 = vmatpush.msrb.mxu0 %v1509_v10  ;;  %3397 = vmatpush.msrb.mxu1 %v1526_v11  ;;  %v142_v10 = vld [vmem:[#allocation2 + $0x2a0] sm:$0xff]  ;;  %v144_v11 = vld [vmem:[#allocation2 + $0x2b0] sm:$0xff]  ;;  %v2372_v1 = vadd.f32 %v2371_v57, %v2352_v54 }
 0x2e2   :  { %3418 = vmatpush.msrb.mxu2 %v1541_v12  ;;  %3437 = vmatpush.msrb.mxu3 %v1558_v13  ;;  %v1577_v12 = vld [vmem:[#allocation5 + $0x2c78] sm:$0xff]  ;;  %v2431_v14 = vpop.f32.mrf.mxu0 }
 0x2e3   :  { %3379 = vmatpush.msrb.mxu0 %v1508_v15  ;;  %3398 = vmatpush.msrb.mxu1 %v1525_v16  ;;  %v1609_v13 = vld [vmem:[#allocation5 + $0x2d78] sm:$0xff]  ;;  %v1514_v15 = vld [vmem:[#allocation5 + $0x2a80] sm:$0xff]  ;;  %v2392_v6 = vadd.f32 %v2391_v62, %v2372_v1 }
 0x2e4   :  { %3419 = vmatpush.msrb.mxu2 %v1540_v18  ;;  %3438 = vmatpush.msrb.mxu3 %v1557_v19  ;;  %v1546_v16 = vld [vmem:[#allocation5 + $0x2b80] sm:$0xff]  ;;  %v143_v18 = vld [vmem:[#allocation2 + $0x2a8] sm:$0xff]  ;;  %v145_v19 = vld [vmem:[#allocation2 + $0x2b8] sm:$0xff] }
 0x2e5   :  { %3380 = vmatpush.msrb.mxu0 %v1507_v20  ;;  %3399 = vmatpush.msrb.mxu1 %v1524_v21  ;;  %v1576_v20 = vld [vmem:[#allocation5 + $0x2c70] sm:$0xff]  ;;  %v1593_v21 = vld [vmem:[#allocation5 + $0x2cf8] sm:$0xff]  ;;  %v2412_v17 = vadd.f32 %v2411_v9, %v2392_v6 }
 0x2e6   :  { %3420 = vmatpush.msrb.mxu2 %v1539_v23  ;;  %3439 = vmatpush.msrb.mxu3 %v1556_v24  ;;  %v1608_v23 = vld [vmem:[#allocation5 + $0x2d70] sm:$0xff]  ;;  %v1625_v24 = vld [vmem:[#allocation5 + $0x2df8] sm:$0xff]  ;;  %v2451_v25 = vpop.f32.mrf.mxu1 }
 0x2e7   :  { %3381 = vmatpush.msrb.mxu0 %v1506_v26  ;;  %3400 = vmatpush.msrb.mxu1 %v1523_v27  ;;  %v1575_v26 = vld [vmem:[#allocation5 + $0x2c68] sm:$0xff]  ;;  %v1592_v27 = vld [vmem:[#allocation5 + $0x2cf0] sm:$0xff]  ;;  %v2432_v22 = vadd.f32 %v2431_v14, %v2412_v17 }
 0x2e8   :  { %3421 = vmatpush.msrb.mxu2 %v1538_v28  ;;  %3440 = vmatpush.msrb.mxu3 %v1555_v29  ;;  %v1607_v28 = vld [vmem:[#allocation5 + $0x2d68] sm:$0xff]  ;;  %v1624_v29 = vld [vmem:[#allocation5 + $0x2df0] sm:$0xff]  ;;  %v2471_v30 = vpop.f32.mrf.mxu2  ;;  %v2491_v41 = vpop.f32.mrf.mxu3 }
 0x2e9   :  { %3382 = vmatpush.msrb.mxu0 %v1505_v31  ;;  %3401 = vmatpush.msrb.mxu1 %v1522_v32  ;;  %v1574_v31 = vld [vmem:[#allocation5 + $0x2c60] sm:$0xff]  ;;  %v1591_v32 = vld [vmem:[#allocation5 + $0x2ce8] sm:$0xff]  ;;  %v2452_v33 = vadd.f32 %v2451_v25, %v2432_v22 }
 0x2ea   :  { %3422 = vmatpush.msrb.mxu2 %v1537_v34  ;;  %3441 = vmatpush.msrb.mxu3 %v1554_v35  ;;  %v1606_v34 = vld [vmem:[#allocation5 + $0x2d60] sm:$0xff]  ;;  %v1623_v35 = vld [vmem:[#allocation5 + $0x2de8] sm:$0xff]  ;;  %v2511_v46 = vpop.f32.mrf.mxu0 }
 0x2eb   :  { %3383 = vmatpush.msrb.mxu0 %v1504_v36  ;;  %3402 = vmatpush.msrb.mxu1 %v1521_v37  ;;  %v1573_v36 = vld [vmem:[#allocation5 + $0x2c58] sm:$0xff]  ;;  %v1590_v37 = vld [vmem:[#allocation5 + $0x2ce0] sm:$0xff]  ;;  %v2472_v38 = vadd.f32 %v2471_v30, %v2452_v33 }
 0x2ec   :  { %3423 = vmatpush.msrb.mxu2 %v1536_v39  ;;  %3442 = vmatpush.msrb.mxu3 %v1553_v40  ;;  %v1605_v39 = vld [vmem:[#allocation5 + $0x2d58] sm:$0xff]  ;;  %v1622_v40 = vld [vmem:[#allocation5 + $0x2de0] sm:$0xff] }
 0x2ed   :  { %3384 = vmatpush.msrb.mxu0 %v1503_v42  ;;  %3403 = vmatpush.msrb.mxu1 %v1520_v43  ;;  %v1572_v42 = vld [vmem:[#allocation5 + $0x2c50] sm:$0xff]  ;;  %v1589_v43 = vld [vmem:[#allocation5 + $0x2cd8] sm:$0xff]  ;;  %v2492_v49 = vadd.f32 %v2491_v41, %v2472_v38 }
 0x2ee   :  { %3424 = vmatpush.msrb.mxu2 %v1535_v44  ;;  %3443 = vmatpush.msrb.mxu3 %v1552_v45  ;;  %v1604_v44 = vld [vmem:[#allocation5 + $0x2d50] sm:$0xff]  ;;  %v1621_v45 = vld [vmem:[#allocation5 + $0x2dd8] sm:$0xff]  ;;  %v2531_v57 = vpop.f32.mrf.mxu1 }
 0x2ef   :  { %3385 = vmatpush.msrb.mxu0 %v1502_v47  ;;  %3404 = vmatpush.msrb.mxu1 %v1519_v48  ;;  %v1571_v47 = vld [vmem:[#allocation5 + $0x2c48] sm:$0xff]  ;;  %v1588_v48 = vld [vmem:[#allocation5 + $0x2cd0] sm:$0xff]  ;;  %v2512_v54 = vadd.f32 %v2511_v46, %v2492_v49 }
 0x2f0   :  { %3425 = vmatpush.msrb.mxu2 %v1534_v50  ;;  %3444 = vmatpush.msrb.mxu3 %v1551_v51  ;;  %v1603_v50 = vld [vmem:[#allocation5 + $0x2d48] sm:$0xff]  ;;  %v1620_v51 = vld [vmem:[#allocation5 + $0x2dd0] sm:$0xff]  ;;  %v2551_v62 = vpop.f32.mrf.mxu2  ;;  %v2571_v9 = vpop.f32.mrf.mxu3 }
 0x2f1   :  { %3386 = vmatpush.msrb.mxu0 %v1501_v52  ;;  %3405 = vmatpush.msrb.mxu1 %v1518_v53  ;;  %v1570_v52 = vld [vmem:[#allocation5 + $0x2c40] sm:$0xff]  ;;  %v1587_v53 = vld [vmem:[#allocation5 + $0x2cc8] sm:$0xff]  ;;  %v2532_v1 = vadd.f32 %v2531_v57, %v2512_v54 }
 0x2f2   :  { %3426 = vmatpush.msrb.mxu2 %v1533_v55  ;;  %3445 = vmatpush.msrb.mxu3 %v1550_v56  ;;  %v1602_v55 = vld [vmem:[#allocation5 + $0x2d40] sm:$0xff]  ;;  %v1619_v56 = vld [vmem:[#allocation5 + $0x2dc8] sm:$0xff]  ;;  %v2591_v14 = vpop.f32.mrf.mxu0 }
 0x2f3   :  { %3387 = vmatpush.msrb.mxu0 %v1500_v58  ;;  %3406 = vmatpush.msrb.mxu1 %v1517_v59  ;;  %v1569_v58 = vld [vmem:[#allocation5 + $0x2c38] sm:$0xff]  ;;  %v1586_v59 = vld [vmem:[#allocation5 + $0x2cc0] sm:$0xff]  ;;  %v2552_v6 = vadd.f32 %v2551_v62, %v2532_v1 }
 0x2f4   :  { %3427 = vmatpush.msrb.mxu2 %v1532_v60  ;;  %3446 = vmatpush.msrb.mxu3 %v1549_v61  ;;  %v1601_v60 = vld [vmem:[#allocation5 + $0x2d38] sm:$0xff]  ;;  %v1618_v61 = vld [vmem:[#allocation5 + $0x2dc0] sm:$0xff] }
 0x2f5   :  { %3388 = vmatpush.msrb.mxu0 %v1499_v63  ;;  %3407 = vmatpush.msrb.mxu1 %v1516_v0  ;;  %v1568_v63 = vld [vmem:[#allocation5 + $0x2c30] sm:$0xff]  ;;  %v1585_v0 = vld [vmem:[#allocation5 + $0x2cb8] sm:$0xff]  ;;  %v2572_v17 = vadd.f32 %v2571_v9, %v2552_v6 }
 0x2f6   :  { %3428 = vmatpush.msrb.mxu2 %v1531_v2  ;;  %3447 = vmatpush.msrb.mxu3 %v1548_v3  ;;  %v1600_v2 = vld [vmem:[#allocation5 + $0x2d30] sm:$0xff]  ;;  %v1617_v3 = vld [vmem:[#allocation5 + $0x2db8] sm:$0xff]  ;;  %v2611_v25 = vpop.f32.mrf.mxu1 }
 0x2f7   :  { %3389 = vmatpush.msrb.mxu0 %v1498_v4  ;;  %3408 = vmatpush.msrb.mxu1 %v1515_v5  ;;  %v1567_v4 = vld [vmem:[#allocation5 + $0x2c28] sm:$0xff]  ;;  %v1584_v5 = vld [vmem:[#allocation5 + $0x2cb0] sm:$0xff]  ;;  %v2592_v22 = vadd.f32 %v2591_v14, %v2572_v17 }
 0x2f8   :  { %3429 = vmatpush.msrb.mxu2 %v1530_v7  ;;  %3448 = vmatpush.msrb.mxu3 %v1547_v8  ;;  %v1599_v7 = vld [vmem:[#allocation5 + $0x2d28] sm:$0xff]  ;;  %v1616_v8 = vld [vmem:[#allocation5 + $0x2db0] sm:$0xff]  ;;  %v2631_v30 = vpop.f32.mrf.mxu2  ;;  %v2651_v41 = vpop.f32.mrf.mxu3 }
 0x2f9   :  { %3390 = vmatmul.f32.vlgmr.msrb.gmra.mxu0 %v142_v10  ;;  %3430 = vmatmul.f32.vlgmr.msrb.gmra.mxu2 %v144_v11  ;;  %v1566_v10 = vld [vmem:[#allocation5 + $0x2c20] sm:$0xff]  ;;  %v1583_v11 = vld [vmem:[#allocation5 + $0x2ca8] sm:$0xff]  ;;  %v2612_v33 = vadd.f32 %v2611_v25, %v2592_v22 }
 0x2fa   :  { %3454 = vmatpush.msra.mxu0 %v1577_v12  ;;  %3494 = vmatpush.msra.mxu2 %v1609_v13  ;;  %v1598_v12 = vld [vmem:[#allocation5 + $0x2d20] sm:$0xff]  ;;  %v1615_v13 = vld [vmem:[#allocation5 + $0x2da8] sm:$0xff]  ;;  %v2671_v46 = vpop.f32.mrf.mxu0 }
 0x2fb   :  { %3409 = vmatpush.msrb.mxu1 %v1514_v15  ;;  %3449 = vmatpush.msrb.mxu3 %v1546_v16  ;;  %v1565_v15 = vld [vmem:[#allocation5 + $0x2c18] sm:$0xff]  ;;  %v1582_v16 = vld [vmem:[#allocation5 + $0x2ca0] sm:$0xff]  ;;  %v2632_v38 = vadd.f32 %v2631_v30, %v2612_v33 }
 0x2fc   :  { %3410 = vmatmul.f32.vlgmr.msrb.gmra.mxu1 %v143_v18  ;;  %3450 = vmatmul.f32.vlgmr.msrb.gmra.mxu3 %v145_v19  ;;  %v1597_v18 = vld [vmem:[#allocation5 + $0x2d18] sm:$0xff]  ;;  %v1614_v19 = vld [vmem:[#allocation5 + $0x2da0] sm:$0xff] }
 0x2fd   :  { %3455 = vmatpush.msra.mxu0 %v1576_v20  ;;  %3474 = vmatpush.msra.mxu1 %v1593_v21  ;;  %v1564_v20 = vld [vmem:[#allocation5 + $0x2c10] sm:$0xff]  ;;  %v1581_v21 = vld [vmem:[#allocation5 + $0x2c98] sm:$0xff]  ;;  %v2652_v49 = vadd.f32 %v2651_v41, %v2632_v38 }
 0x2fe   :  { %3495 = vmatpush.msra.mxu2 %v1608_v23  ;;  %3514 = vmatpush.msra.mxu3 %v1625_v24  ;;  %v1596_v23 = vld [vmem:[#allocation5 + $0x2d10] sm:$0xff]  ;;  %v1613_v24 = vld [vmem:[#allocation5 + $0x2d98] sm:$0xff]  ;;  %v2691_v57 = vpop.f32.mrf.mxu1 }
 0x2ff   :  { %3456 = vmatpush.msra.mxu0 %v1575_v26  ;;  %3475 = vmatpush.msra.mxu1 %v1592_v27  ;;  %v1563_v26 = vld [vmem:[#allocation5 + $0x2c08] sm:$0xff]  ;;  %v1580_v27 = vld [vmem:[#allocation5 + $0x2c90] sm:$0xff]  ;;  %v2672_v54 = vadd.f32 %v2671_v46, %v2652_v49 }
 0x300   :  { %3496 = vmatpush.msra.mxu2 %v1607_v28  ;;  %3515 = vmatpush.msra.mxu3 %v1624_v29  ;;  %v1595_v28 = vld [vmem:[#allocation5 + $0x2d08] sm:$0xff]  ;;  %v1612_v29 = vld [vmem:[#allocation5 + $0x2d90] sm:$0xff]  ;;  %v2711_v62 = vpop.f32.mrf.mxu2 }
 0x301   :  { %3457 = vmatpush.msra.mxu0 %v1574_v31  ;;  %3476 = vmatpush.msra.mxu1 %v1591_v32  ;;  %v1562_v31 = vld [vmem:[#allocation5 + $0x2c00] sm:$0xff]  ;;  %v1579_v32 = vld [vmem:[#allocation5 + $0x2c88] sm:$0xff]  ;;  %v2692_v1 = vadd.f32 %v2691_v57, %v2672_v54 }
 0x302   :  { %3497 = vmatpush.msra.mxu2 %v1606_v34  ;;  %3516 = vmatpush.msra.mxu3 %v1623_v35  ;;  %v1594_v34 = vld [vmem:[#allocation5 + $0x2d00] sm:$0xff]  ;;  %v1611_v35 = vld [vmem:[#allocation5 + $0x2d88] sm:$0xff] }
 0x303   :  { %3458 = vmatpush.msra.mxu0 %v1573_v36  ;;  %3477 = vmatpush.msra.mxu1 %v1590_v37  ;;  %v146_v36 = vld [vmem:[#allocation2 + $0x2c0] sm:$0xff]  ;;  %v148_v37 = vld [vmem:[#allocation2 + $0x2d0] sm:$0xff]  ;;  %v2712_v6 = vadd.f32 %v2711_v62, %v2692_v1 }
 0x304   :  { %3498 = vmatpush.msra.mxu2 %v1605_v39  ;;  %3517 = vmatpush.msra.mxu3 %v1622_v40  ;;  %v1641_v39 = vld [vmem:[#allocation5 + $0x2e78] sm:$0xff] }
 0x305   :  { %3459 = vmatpush.msra.mxu0 %v1572_v42  ;;  %3478 = vmatpush.msra.mxu1 %v1589_v43  ;;  %v1673_v40 = vld [vmem:[#allocation5 + $0x2f78] sm:$0xff]  ;;  %v1578_v42 = vld [vmem:[#allocation5 + $0x2c80] sm:$0xff] }
 0x306   :  { %3499 = vmatpush.msra.mxu2 %v1604_v44  ;;  %3518 = vmatpush.msra.mxu3 %v1621_v45  ;;  %v1610_v43 = vld [vmem:[#allocation5 + $0x2d80] sm:$0xff]  ;;  %v147_v44 = vld [vmem:[#allocation2 + $0x2c8] sm:$0xff]  ;;  %v149_v45 = vld [vmem:[#allocation2 + $0x2d8] sm:$0xff] }
 0x307   :  { %3460 = vmatpush.msra.mxu0 %v1571_v47  ;;  %3479 = vmatpush.msra.mxu1 %v1588_v48  ;;  %v1640_v47 = vld [vmem:[#allocation5 + $0x2e70] sm:$0xff]  ;;  %v1657_v48 = vld [vmem:[#allocation5 + $0x2ef8] sm:$0xff] }
 0x308   :  { %3500 = vmatpush.msra.mxu2 %v1603_v50  ;;  %3519 = vmatpush.msra.mxu3 %v1620_v51  ;;  %v1672_v50 = vld [vmem:[#allocation5 + $0x2f70] sm:$0xff]  ;;  %v1689_v51 = vld [vmem:[#allocation5 + $0x2ff8] sm:$0xff] }
 0x309   :  { %3461 = vmatpush.msra.mxu0 %v1570_v52  ;;  %3480 = vmatpush.msra.mxu1 %v1587_v53  ;;  %v1639_v52 = vld [vmem:[#allocation5 + $0x2e68] sm:$0xff]  ;;  %v1656_v53 = vld [vmem:[#allocation5 + $0x2ef0] sm:$0xff] }
 0x30a   :  { %3501 = vmatpush.msra.mxu2 %v1602_v55  ;;  %3520 = vmatpush.msra.mxu3 %v1619_v56  ;;  %v1671_v55 = vld [vmem:[#allocation5 + $0x2f68] sm:$0xff]  ;;  %v1688_v56 = vld [vmem:[#allocation5 + $0x2ff0] sm:$0xff] }
 0x30b   :  { %3462 = vmatpush.msra.mxu0 %v1569_v58  ;;  %3481 = vmatpush.msra.mxu1 %v1586_v59  ;;  %v1638_v58 = vld [vmem:[#allocation5 + $0x2e60] sm:$0xff]  ;;  %v1655_v59 = vld [vmem:[#allocation5 + $0x2ee8] sm:$0xff] }
 0x30c   :  { %3502 = vmatpush.msra.mxu2 %v1601_v60  ;;  %3521 = vmatpush.msra.mxu3 %v1618_v61  ;;  %v1670_v60 = vld [vmem:[#allocation5 + $0x2f60] sm:$0xff]  ;;  %v1687_v61 = vld [vmem:[#allocation5 + $0x2fe8] sm:$0xff] }
 0x30d   :  { %3463 = vmatpush.msra.mxu0 %v1568_v63  ;;  %3482 = vmatpush.msra.mxu1 %v1585_v0  ;;  %v1637_v63 = vld [vmem:[#allocation5 + $0x2e58] sm:$0xff]  ;;  %v1654_v0 = vld [vmem:[#allocation5 + $0x2ee0] sm:$0xff] }
 0x30e   :  { %3503 = vmatpush.msra.mxu2 %v1600_v2  ;;  %3522 = vmatpush.msra.mxu3 %v1617_v3  ;;  %v1669_v2 = vld [vmem:[#allocation5 + $0x2f58] sm:$0xff]  ;;  %v1686_v3 = vld [vmem:[#allocation5 + $0x2fe0] sm:$0xff] }
 0x30f   :  { %3464 = vmatpush.msra.mxu0 %v1567_v4  ;;  %3483 = vmatpush.msra.mxu1 %v1584_v5  ;;  %v1636_v4 = vld [vmem:[#allocation5 + $0x2e50] sm:$0xff]  ;;  %v1653_v5 = vld [vmem:[#allocation5 + $0x2ed8] sm:$0xff] }
 0x310   :  { %3504 = vmatpush.msra.mxu2 %v1599_v7  ;;  %3523 = vmatpush.msra.mxu3 %v1616_v8  ;;  %v1668_v7 = vld [vmem:[#allocation5 + $0x2f50] sm:$0xff]  ;;  %v1685_v8 = vld [vmem:[#allocation5 + $0x2fd8] sm:$0xff] }
 0x311   :  { %3465 = vmatpush.msra.mxu0 %v1566_v10  ;;  %3484 = vmatpush.msra.mxu1 %v1583_v11  ;;  %v1635_v10 = vld [vmem:[#allocation5 + $0x2e48] sm:$0xff]  ;;  %v1652_v11 = vld [vmem:[#allocation5 + $0x2ed0] sm:$0xff] }
 0x312   :  { %3505 = vmatpush.msra.mxu2 %v1598_v12  ;;  %3524 = vmatpush.msra.mxu3 %v1615_v13  ;;  %v1667_v12 = vld [vmem:[#allocation5 + $0x2f48] sm:$0xff]  ;;  %v1684_v13 = vld [vmem:[#allocation5 + $0x2fd0] sm:$0xff] }
 0x313   :  { %3466 = vmatpush.msra.mxu0 %v1565_v15  ;;  %3485 = vmatpush.msra.mxu1 %v1582_v16  ;;  %v1634_v15 = vld [vmem:[#allocation5 + $0x2e40] sm:$0xff]  ;;  %v1651_v16 = vld [vmem:[#allocation5 + $0x2ec8] sm:$0xff] }
 0x314   :  { %3506 = vmatpush.msra.mxu2 %v1597_v18  ;;  %3525 = vmatpush.msra.mxu3 %v1614_v19  ;;  %v1666_v18 = vld [vmem:[#allocation5 + $0x2f40] sm:$0xff]  ;;  %v1683_v19 = vld [vmem:[#allocation5 + $0x2fc8] sm:$0xff] }
 0x315   :  { %3467 = vmatpush.msra.mxu0 %v1564_v20  ;;  %3486 = vmatpush.msra.mxu1 %v1581_v21  ;;  %v1633_v20 = vld [vmem:[#allocation5 + $0x2e38] sm:$0xff]  ;;  %v1650_v21 = vld [vmem:[#allocation5 + $0x2ec0] sm:$0xff] }
 0x316   :  { %3507 = vmatpush.msra.mxu2 %v1596_v23  ;;  %3526 = vmatpush.msra.mxu3 %v1613_v24  ;;  %v1665_v23 = vld [vmem:[#allocation5 + $0x2f38] sm:$0xff]  ;;  %v1682_v24 = vld [vmem:[#allocation5 + $0x2fc0] sm:$0xff] }
 0x317   :  { %3468 = vmatpush.msra.mxu0 %v1563_v26  ;;  %3487 = vmatpush.msra.mxu1 %v1580_v27  ;;  %v1632_v26 = vld [vmem:[#allocation5 + $0x2e30] sm:$0xff]  ;;  %v1649_v27 = vld [vmem:[#allocation5 + $0x2eb8] sm:$0xff] }
 0x318   :  { %3508 = vmatpush.msra.mxu2 %v1595_v28  ;;  %3527 = vmatpush.msra.mxu3 %v1612_v29  ;;  %v1664_v28 = vld [vmem:[#allocation5 + $0x2f30] sm:$0xff]  ;;  %v1681_v29 = vld [vmem:[#allocation5 + $0x2fb8] sm:$0xff] }
 0x319   :  { %3469 = vmatpush.msra.mxu0 %v1562_v31  ;;  %3488 = vmatpush.msra.mxu1 %v1579_v32  ;;  %v1631_v31 = vld [vmem:[#allocation5 + $0x2e28] sm:$0xff]  ;;  %v1648_v32 = vld [vmem:[#allocation5 + $0x2eb0] sm:$0xff] }
 0x31a   :  { %3509 = vmatpush.msra.mxu2 %v1594_v34  ;;  %3528 = vmatpush.msra.mxu3 %v1611_v35  ;;  %v1663_v34 = vld [vmem:[#allocation5 + $0x2f28] sm:$0xff]  ;;  %v1680_v35 = vld [vmem:[#allocation5 + $0x2fb0] sm:$0xff] }
 0x31b   :  { %3470 = vmatmul.f32.vlgmr.msra.gmra.mxu0 %v146_v36  ;;  %3510 = vmatmul.f32.vlgmr.msra.gmra.mxu2 %v148_v37  ;;  %v1630_v36 = vld [vmem:[#allocation5 + $0x2e20] sm:$0xff]  ;;  %v1647_v37 = vld [vmem:[#allocation5 + $0x2ea8] sm:$0xff] }
 0x31c   :  { %3534 = vmatpush.msrb.mxu0 %v1641_v39  ;;  %3574 = vmatpush.msrb.mxu2 %v1673_v40  ;;  %v1662_v39 = vld [vmem:[#allocation5 + $0x2f20] sm:$0xff]  ;;  %v1679_v40 = vld [vmem:[#allocation5 + $0x2fa8] sm:$0xff] }
 0x31d   :  { %3489 = vmatpush.msra.mxu1 %v1578_v42  ;;  %3529 = vmatpush.msra.mxu3 %v1610_v43  ;;  %v1629_v42 = vld [vmem:[#allocation5 + $0x2e18] sm:$0xff]  ;;  %v1646_v43 = vld [vmem:[#allocation5 + $0x2ea0] sm:$0xff] }
 0x31e   :  { %3490 = vmatmul.f32.vlgmr.msra.gmra.mxu1 %v147_v44  ;;  %3530 = vmatmul.f32.vlgmr.msra.gmra.mxu3 %v149_v45  ;;  %v1661_v44 = vld [vmem:[#allocation5 + $0x2f18] sm:$0xff]  ;;  %v1678_v45 = vld [vmem:[#allocation5 + $0x2fa0] sm:$0xff] }
 0x31f   :  { %3535 = vmatpush.msrb.mxu0 %v1640_v47  ;;  %3554 = vmatpush.msrb.mxu1 %v1657_v48  ;;  %v1628_v47 = vld [vmem:[#allocation5 + $0x2e10] sm:$0xff]  ;;  %v1645_v48 = vld [vmem:[#allocation5 + $0x2e98] sm:$0xff] }
 0x320   :  { %3575 = vmatpush.msrb.mxu2 %v1672_v50  ;;  %3594 = vmatpush.msrb.mxu3 %v1689_v51  ;;  %v1660_v50 = vld [vmem:[#allocation5 + $0x2f10] sm:$0xff]  ;;  %v1677_v51 = vld [vmem:[#allocation5 + $0x2f98] sm:$0xff] }
 0x321   :  { %3536 = vmatpush.msrb.mxu0 %v1639_v52  ;;  %3555 = vmatpush.msrb.mxu1 %v1656_v53  ;;  %v1627_v52 = vld [vmem:[#allocation5 + $0x2e08] sm:$0xff]  ;;  %v1644_v53 = vld [vmem:[#allocation5 + $0x2e90] sm:$0xff] }
 0x322   :  { %3576 = vmatpush.msrb.mxu2 %v1671_v55  ;;  %3595 = vmatpush.msrb.mxu3 %v1688_v56  ;;  %v1659_v55 = vld [vmem:[#allocation5 + $0x2f08] sm:$0xff]  ;;  %v1676_v56 = vld [vmem:[#allocation5 + $0x2f90] sm:$0xff] }
 0x323   :  { %3537 = vmatpush.msrb.mxu0 %v1638_v58  ;;  %3556 = vmatpush.msrb.mxu1 %v1655_v59  ;;  %v1626_v58 = vld [vmem:[#allocation5 + $0x2e00] sm:$0xff]  ;;  %v1643_v59 = vld [vmem:[#allocation5 + $0x2e88] sm:$0xff] }
 0x324   :  { %3577 = vmatpush.msrb.mxu2 %v1670_v60  ;;  %3596 = vmatpush.msrb.mxu3 %v1687_v61  ;;  %v1658_v60 = vld [vmem:[#allocation5 + $0x2f00] sm:$0xff]  ;;  %v1675_v61 = vld [vmem:[#allocation5 + $0x2f88] sm:$0xff] }
 0x325   :  { %3538 = vmatpush.msrb.mxu0 %v1637_v63  ;;  %3557 = vmatpush.msrb.mxu1 %v1654_v0  ;;  %v150_v63 = vld [vmem:[#allocation2 + $0x2e0] sm:$0xff]  ;;  %v152_v0 = vld [vmem:[#allocation2 + $0x2f0] sm:$0xff] }
 0x326   :  { %3578 = vmatpush.msrb.mxu2 %v1669_v2  ;;  %3597 = vmatpush.msrb.mxu3 %v1686_v3  ;;  %v1642_v2 = vld [vmem:[#allocation5 + $0x2e80] sm:$0xff] }
 0x327   :  { %3539 = vmatpush.msrb.mxu0 %v1636_v4  ;;  %3558 = vmatpush.msrb.mxu1 %v1653_v5  ;;  %v1674_v3 = vld [vmem:[#allocation5 + $0x2f80] sm:$0xff]  ;;  %v151_v4 = vld [vmem:[#allocation2 + $0x2e8] sm:$0xff]  ;;  %v153_v5 = vld [vmem:[#allocation2 + $0x2f8] sm:$0xff] }
 0x328   :  { %3579 = vmatpush.msrb.mxu2 %v1668_v7  ;;  %3598 = vmatpush.msrb.mxu3 %v1685_v8  ;;  %v2731_v7 = vpop.f32.mrf.mxu3  ;;  %v2751_v8 = vpop.f32.mrf.mxu0 }
 0x329   :  { %3540 = vmatpush.msrb.mxu0 %v1635_v10  ;;  %3559 = vmatpush.msrb.mxu1 %v1652_v11  ;;  %v2732_v9 = vadd.f32 %v2731_v7, %v2712_v6  ;;  %v2771_v11 = vpop.f32.mrf.mxu1 }
 0x32a   :  { %3580 = vmatpush.msrb.mxu2 %v1667_v12  ;;  %3599 = vmatpush.msrb.mxu3 %v1684_v13  ;;  %v2791_v12 = vpop.f32.mrf.mxu2 }
 0x32b   :  { %3541 = vmatpush.msrb.mxu0 %v1634_v15  ;;  %3560 = vmatpush.msrb.mxu1 %v1651_v16  ;;  %v2752_v10 = vadd.f32 %v2751_v8, %v2732_v9 }
 0x32c   :  { %3581 = vmatpush.msrb.mxu2 %v1666_v18  ;;  %3600 = vmatpush.msrb.mxu3 %v1683_v19 }
 0x32d   :  { %3542 = vmatpush.msrb.mxu0 %v1633_v20  ;;  %3561 = vmatpush.msrb.mxu1 %v1650_v21  ;;  %v2772_v13 = vadd.f32 %v2771_v11, %v2752_v10 }
 0x32e   :  { %3582 = vmatpush.msrb.mxu2 %v1665_v23  ;;  %3601 = vmatpush.msrb.mxu3 %v1682_v24 }
 0x32f   :  { %3543 = vmatpush.msrb.mxu0 %v1632_v26  ;;  %3562 = vmatpush.msrb.mxu1 %v1649_v27  ;;  %v2792_v14 = vadd.f32 %v2791_v12, %v2772_v13 }
 0x330   :  { %3583 = vmatpush.msrb.mxu2 %v1664_v28  ;;  %3602 = vmatpush.msrb.mxu3 %v1681_v29  ;;  %v2811_v15 = vpop.f32.mrf.mxu3  ;;  %v2831_v16 = vpop.f32.mrf.mxu0 }
 0x331   :  { %3544 = vmatpush.msrb.mxu0 %v1631_v31  ;;  %3563 = vmatpush.msrb.mxu1 %v1648_v32  ;;  %v2812_v17 = vadd.f32 %v2811_v15, %v2792_v14  ;;  %v2851_v19 = vpop.f32.mrf.mxu1 }
 0x332   :  { %3584 = vmatpush.msrb.mxu2 %v1663_v34  ;;  %3603 = vmatpush.msrb.mxu3 %v1680_v35  ;;  %v2871_v20 = vpop.f32.mrf.mxu2 }
 0x333   :  { %3545 = vmatpush.msrb.mxu0 %v1630_v36  ;;  %3564 = vmatpush.msrb.mxu1 %v1647_v37  ;;  %v2832_v18 = vadd.f32 %v2831_v16, %v2812_v17 }
 0x334   :  { %3585 = vmatpush.msrb.mxu2 %v1662_v39  ;;  %3604 = vmatpush.msrb.mxu3 %v1679_v40 }
 0x335   :  { %3546 = vmatpush.msrb.mxu0 %v1629_v42  ;;  %3565 = vmatpush.msrb.mxu1 %v1646_v43  ;;  %v2852_v21 = vadd.f32 %v2851_v19, %v2832_v18 }
 0x336   :  { %3586 = vmatpush.msrb.mxu2 %v1661_v44  ;;  %3605 = vmatpush.msrb.mxu3 %v1678_v45 }
 0x337   :  { %3547 = vmatpush.msrb.mxu0 %v1628_v47  ;;  %3566 = vmatpush.msrb.mxu1 %v1645_v48  ;;  %v2872_v22 = vadd.f32 %v2871_v20, %v2852_v21 }
 0x338   :  { %3587 = vmatpush.msrb.mxu2 %v1660_v50  ;;  %3606 = vmatpush.msrb.mxu3 %v1677_v51  ;;  %v2891_v23 = vpop.f32.mrf.mxu3  ;;  %v2911_v24 = vpop.f32.mrf.mxu0 }
 0x339   :  { %3548 = vmatpush.msrb.mxu0 %v1627_v52  ;;  %3567 = vmatpush.msrb.mxu1 %v1644_v53  ;;  %v2892_v25 = vadd.f32 %v2891_v23, %v2872_v22  ;;  %v2931_v27 = vpop.f32.mrf.mxu1 }
 0x33a   :  { %3588 = vmatpush.msrb.mxu2 %v1659_v55  ;;  %3607 = vmatpush.msrb.mxu3 %v1676_v56  ;;  %v2951_v28 = vpop.f32.mrf.mxu2 }
 0x33b   :  { %3549 = vmatpush.msrb.mxu0 %v1626_v58  ;;  %3568 = vmatpush.msrb.mxu1 %v1643_v59  ;;  %v2912_v26 = vadd.f32 %v2911_v24, %v2892_v25 }
 0x33c   :  { %3589 = vmatpush.msrb.mxu2 %v1658_v60  ;;  %3608 = vmatpush.msrb.mxu3 %v1675_v61 }
 0x33d   :  { %3550 = vmatmul.f32.vlgmr.msrb.gmra.mxu0 %v150_v63  ;;  %3590 = vmatmul.f32.vlgmr.msrb.gmra.mxu2 %v152_v0  ;;  %v2932_v29 = vadd.f32 %v2931_v27, %v2912_v26 }
 0x33e   :  { %3569 = vmatpush.msrb.mxu1 %v1642_v2  ;;  %3609 = vmatpush.msrb.mxu3 %v1674_v3 }
 0x33f   :  { %3570 = vmatmul.f32.vlgmr.msrb.gmra.mxu1 %v151_v4  ;;  %3610 = vmatmul.f32.vlgmr.msrb.gmra.mxu3 %v153_v5  ;;  %v2952_v30 = vadd.f32 %v2951_v28, %v2932_v29 }
 0x340   :  { %v2971_v31 = vpop.f32.mrf.mxu3  ;;  %v2991_v32 = vpop.f32.mrf.mxu0 }
 0x341   :  { %v2972_v33 = vadd.f32 %v2971_v31, %v2952_v30  ;;  %v3011_v35 = vpop.f32.mrf.mxu1 }
 0x342   :  { %v3031_v36 = vpop.f32.mrf.mxu2 }
 0x343   :  { %v2992_v34 = vadd.f32 %v2991_v32, %v2972_v33 }
 0x345   :  { %v3012_v37 = vadd.f32 %v3011_v35, %v2992_v34 }
 0x347   :  { %v3032_v38 = vadd.f32 %v3031_v36, %v3012_v37 }
 0x348   :  { %v3051_v39 = vpop.f32.mrf.mxu3  ;;  %v3071_v40 = vpop.f32.mrf.mxu0 }
 0x349   :  { %v3052_v41 = vadd.f32 %v3051_v39, %v3032_v38  ;;  %v3091_v43 = vpop.f32.mrf.mxu1 }
 0x34a   :  { %v3111_v44 = vpop.f32.mrf.mxu2 }
 0x34b   :  { %v3072_v42 = vadd.f32 %v3071_v40, %v3052_v41 }
 0x34d   :  { %v3092_v45 = vadd.f32 %v3091_v43, %v3072_v42 }
 0x34f   :  { %v3112_v46 = vadd.f32 %v3111_v44, %v3092_v45 }
 0x350   :  { %v3131_v47 = vpop.f32.mrf.mxu3  ;;  %v3151_v48 = vpop.f32.mrf.mxu0 }
 0x351   :  { %v3132_v49 = vadd.f32 %v3131_v47, %v3112_v46  ;;  %v3171_v51 = vpop.f32.mrf.mxu1 }
 0x352   :  { %v3191_v52 = vpop.f32.mrf.mxu2 }
 0x353   :  { %v3152_v50 = vadd.f32 %v3151_v48, %v3132_v49 }
 0x355   :  { %v3172_v53 = vadd.f32 %v3171_v51, %v3152_v50 }
 0x357   :  { %v3192_v54 = vadd.f32 %v3191_v52, %v3172_v53 }
 0x358   :  { %v3211_v55 = vpop.f32.mrf.mxu3  ;;  %v3231_v56 = vpop.f32.mrf.mxu0 }
 0x359   :  { %v3212_v57 = vadd.f32 %v3211_v55, %v3192_v54  ;;  %v3251_v59 = vpop.f32.mrf.mxu1 }
 0x35a   :  { %v3271_v60 = vpop.f32.mrf.mxu2 }
 0x35b   :  { %v3232_v58 = vadd.f32 %v3231_v56, %v3212_v57 }
 0x35d   :  { %v3252_v61 = vadd.f32 %v3251_v59, %v3232_v58 }
 0x35f   :  { %v3272_v62 = vadd.f32 %v3271_v60, %v3252_v61 }
 0x360   :  { %v3291_v63 = vpop.f32.mrf.mxu3  ;;  %v3311_v0 = vpop.f32.mrf.mxu0 }
 0x361   :  { %v3292_v1 = vadd.f32 %v3291_v63, %v3272_v62  ;;  %v3331_v3 = vpop.f32.mrf.mxu1 }
 0x362   :  { %v3351_v4 = vpop.f32.mrf.mxu2 }
 0x363   :  { %v3312_v2 = vadd.f32 %v3311_v0, %v3292_v1 }
 0x365   :  { %v3332_v5 = vadd.f32 %v3331_v3, %v3312_v2 }
 0x367   :  { %v3352_v6 = vadd.f32 %v3351_v4, %v3332_v5 }
 0x368   :  { %v3371_v7 = vpop.f32.mrf.mxu3 }
 0x369   :  { %v3372_v9 = vadd.f32 %v3371_v7, %v3352_v6 }
 0x376   :  { %v3391_v8 = vpop.f32.mrf.mxu0 }
 0x377   :  { %v3392_v10 = vadd.f32 %v3391_v8, %v3372_v9 }
 0x379   :  { %v3411_v11 = vpop.f32.mrf.mxu1 }
 0x37a   :  { %v3412_v13 = vadd.f32 %v3411_v11, %v3392_v10 }
 0x37c   :  { %v3431_v12 = vpop.f32.mrf.mxu2 }
 0x37d   :  { %v3432_v14 = vadd.f32 %v3431_v12, %v3412_v13 }
 0x37f   :  { %v3451_v15 = vpop.f32.mrf.mxu3 }
 0x380   :  { %v3452_v17 = vadd.f32 %v3451_v15, %v3432_v14 }
 0x398   :  { %v3471_v16 = vpop.f32.mrf.mxu0 }
 0x399   :  { %v3472_v18 = vadd.f32 %v3471_v16, %v3452_v17 }
 0x39b   :  { %v3491_v19 = vpop.f32.mrf.mxu1 }
 0x39c   :  { %v3492_v21 = vadd.f32 %v3491_v19, %v3472_v18 }
 0x39e   :  { %v3511_v20 = vpop.f32.mrf.mxu2 }
 0x39f   :  { %v3512_v22 = vadd.f32 %v3511_v20, %v3492_v21 }
 0x3a1   :  { %v3531_v23 = vpop.f32.mrf.mxu3 }
 0x3a2   :  { %v3532_v24 = vadd.f32 %v3531_v23, %v3512_v22 }
 0x3ba   :  { %v3551_v25 = vpop.f32.mrf.mxu0 }
 0x3bb   :  { %v3552_v26 = vadd.f32 %v3551_v25, %v3532_v24 }
 0x3bc   :  { %v3571_v27 = vpop.f32.mrf.mxu1 }
 0x3bd   :  { %v3572_v28 = vadd.f32 %v3571_v27, %v3552_v26 }
 0x3c0   :  { %v3591_v29 = vpop.f32.mrf.mxu2 }
 0x3c1   :  { %v3592_v30 = vadd.f32 %v3591_v29, %v3572_v28 }
 0x3c2   :  { %v3611_v31 = vpop.f32.mrf.mxu3 }
 0x3c3   :  { %v3612_v32 = vadd.f32 %v3611_v31, %v3592_v30 }
 0x3c5   :  { %3614 = vst [vmem:[#allocation8] sm:$0xff] %v3612_v32 }
 0x3c6   :  { %3625 = dma.vmem_to_hbm [thread:$0]  %s3621_s2, 128, %s3623_s30, [#allocation4]  }
 0x3c7   :  { %3740 = dma.done.wait [#allocation4], 128  }
 0x3c8   :  { %3741 = vsyncadd [#allocation4], 4294967168 }
 0x3c9   :  { %3630 = vsyncpa [#allocation3], 1 }
 0x3ca   :  { %3631 = vsyncpa [#allocation6], 1 }
 0x3cb   :  { %3632 = vsyncpa [#allocation4], 1 }

</bundles_post_ra>
